<compile_context>
chip_gen: v7x
topology: tpu7x:2x2x1
jax: 0.10.0
libtpu: 0.0.40
codegen_flags: <defaults>
</compile_context>

<pallas_src>
import functools

import jax
import jax.numpy as jnp
from jax.experimental import pallas as pl
from jax.experimental.pallas import tpu as pltpu

FEATURE_SIZE = 64
IN_DIM = FEATURE_SIZE * 2                       # 128
LAYER_DIMS = ((IN_DIM, 256), (256, 256), (256, 64), (64, 64),
              (64, 16), (16, 16), (16, 4))
WIDE_LAYERS = 2                                 # layers kept in [batch, feature] layout
TAIL_DIMS = LAYER_DIMS[WIDE_LAYERS:]            # layers run in [feature, batch] layout
OUT_IN = 4
BN_EPS = 1e-5
LEAKY_SLOPE = 0.01                              # nn.LeakyReLU default
LANE = 128
_TAIL_PAD = 64                                  # row padding of packed tail gamma/beta


def _leaky_relu(x):
    # max(x, a*x) == LeakyReLU(a) for 0 < a < 1: mul+max (2 VPU ops/elem)
    # instead of cmp+mul+select (3 ops/elem).
    return jnp.maximum(x, LEAKY_SLOPE * x)


def _relation_head_long_kernel(n_valid, masked,
                               x_ref, w1_ref, w2_ref, g12_ref, b12_ref,
                               w3_ref, w4_ref, w5_ref, w6_ref, w7_ref,
                               gt_ref, bt_ref, wout_ref, bout_ref, o_ref):
    b_pad = x_ref.shape[0]
    inv_n = jnp.float32(1.0 / n_valid)

    # Batch-validity masks, built once; padded rows never enter BN statistics.
    if masked:
        row = jax.lax.broadcasted_iota(jnp.int32, (1, b_pad), 1)
        mrow = (row < n_valid).astype(jnp.float32)          # [1, b_pad]
        col = jax.lax.broadcasted_iota(jnp.int32, (b_pad, 1), 0)
        mcol = (col < n_valid).astype(jnp.float32)          # [b_pad, 1]
        ones_row = mrow.astype(jnp.bfloat16)                # masked ones, [1, b_pad]
    else:
        mrow = None
        mcol = None
        ones_row = jnp.ones((1, b_pad), jnp.bfloat16)

    # ---- Layers 1-2 (256-wide): [batch, feature] layout, batch on sublanes.
    # Linear bias is omitted: training-mode BN subtracts the batch mean, so a
    # pre-BN bias cancels exactly.
    h = x_ref[...]                                          # bf16 [b_pad, din]
    act_wide = None
    for li, w_ref in enumerate((w1_ref, w2_ref)):
        w = w_ref[...]                                      # bf16 [din, 256]
        z = jnp.dot(h, w, preferred_element_type=jnp.float32)   # f32 [b_pad, 256]
        # Batch mean on the MXU: ((masked_ones @ h) @ W) / n == mean_batch(h @ W).
        hsum = jnp.dot(ones_row, h, preferred_element_type=jnp.float32)     # [1, din]
        mean = jnp.dot(hsum.astype(jnp.bfloat16), w,
                       preferred_element_type=jnp.float32) * inv_n          # [1, 256]
        d = z - mean
        dm = d * mcol if masked else d
        var = jnp.sum(dm * d, axis=0, keepdims=True) * inv_n                # [1, 256]
        scale = g12_ref[li] * jax.lax.rsqrt(var + BN_EPS)                   # [1, 256]
        hn = d * scale + b12_ref[li]
        act = _leaky_relu(hn)                               # f32 [b_pad, 256]
        if li + 1 < WIDE_LAYERS:
            h = act.astype(jnp.bfloat16)                    # feed layer 2's MXU
        else:
            act_wide = act

    # ---- Switch to a batch-on-lanes layout for the narrow tail: one f32
    # [b_pad, 256] -> [256, b_pad] transpose amortized over 5 layers + head.
    ht = act_wide.T.astype(jnp.bfloat16)                    # bf16 [256, b_pad]

    tail_w_refs = (w3_ref, w4_ref, w5_ref, w6_ref, w7_ref)
    for li, ((_, dout), w_ref) in enumerate(zip(TAIL_DIMS, tail_w_refs)):
        w = w_ref[...]                                      # bf16 [dout, din]
        z = jnp.dot(w, ht, preferred_element_type=jnp.float32)   # f32 [dout, b_pad]
        # BN stats over the batch are now native lane reductions.
        zm = z * mrow if masked else z
        mean = jnp.sum(zm, axis=1, keepdims=True) * inv_n        # [dout, 1]
        d = z - mean
        dm = d * mrow if masked else d
        var = jnp.sum(dm * d, axis=1, keepdims=True) * inv_n     # [dout, 1]
        g = gt_ref[li][:dout]                               # f32 [dout, 1]
        beta = bt_ref[li][:dout]                            # f32 [dout, 1]
        scale = g * jax.lax.rsqrt(var + BN_EPS)
        hn = d * scale + beta
        ht = _leaky_relu(hn).astype(jnp.bfloat16)           # bf16 [dout, b_pad]

    # ---- Final Linear(4 -> 1): lane-dense [1, b_pad] output row (batch on lanes).
    y = jnp.dot(wout_ref[...], ht, preferred_element_type=jnp.float32)      # [1, b_pad]
    o_ref[...] = y + bout_ref[...]


def _vmem_limit_bytes():
    """~75% of physical VMEM (~96 MiB on v5e/v6e, ~48 MiB on v7x)."""
    cap = 64 * 1024 * 1024   # conservative fallback (safe on every chip)
    try:
        cap = int(getattr(pltpu.get_tpu_info(), "vmem_capacity_bytes", cap))
    except Exception:
        pass
    return int(max(32 * 1024 * 1024, min((cap * 3) // 4, 112 * 1024 * 1024)))


def relation_head_long(x, params):
    """x: [B, IN_DIM] float32.  params: flat tuple from init_params (PyTorch layout)."""
    B = x.shape[0]
    b_pad = max(LANE, ((B + LANE - 1) // LANE) * LANE)
    masked = b_pad != B

    # Single fused pad of the bf16 cast; skipped entirely for lane-aligned B.
    x_bf16 = x.astype(jnp.bfloat16)
    if masked:
        x_bf16 = jnp.pad(x_bf16, ((0, b_pad - B), (0, 0)))

    flat = list(params)
    lw = [flat[4 * i] for i in range(len(LAYER_DIMS))]
    lg = [flat[4 * i + 2] for i in range(len(LAYER_DIMS))]
    lb = [flat[4 * i + 3] for i in range(len(LAYER_DIMS))]
    # NOTE: per-layer Linear biases flat[4*i+1] are intentionally NOT passed to
    # the kernel: training-mode BatchNorm cancels them exactly.
    w_out, b_out = flat[-2], flat[-1]

    w1 = lw[0].astype(jnp.bfloat16)                          # bf16 [128, 256]
    w2 = lw[1].astype(jnp.bfloat16)                          # bf16 [256, 256]
    g12 = jnp.stack(lg[:WIDE_LAYERS], axis=0)                # f32 [2, 1, 256]
    b12 = jnp.stack(lb[:WIDE_LAYERS], axis=0)                # f32 [2, 1, 256]

    def _col(v):                                             # [1, dout] -> [64, 1]
        dout = v.shape[1]
        return jnp.pad(v.T, ((0, _TAIL_PAD - dout), (0, 0)))

    wt = [w.T.astype(jnp.bfloat16) for w in lw[WIDE_LAYERS:]]        # [dout, din] bf16
    gt = jnp.stack([_col(g) for g in lg[WIDE_LAYERS:]], axis=0)      # f32 [5, 64, 1]
    bt = jnp.stack([_col(b) for b in lb[WIDE_LAYERS:]], axis=0)      # f32 [5, 64, 1]

    args = [x_bf16, w1, w2, g12, b12, *wt, gt, bt,
            w_out.astype(jnp.bfloat16), b_out]

    vmem = pl.BlockSpec(memory_space=pltpu.MemorySpace.VMEM)
    kernel = functools.partial(_relation_head_long_kernel, B, masked)
    out = pl.pallas_call(
        kernel,
        out_shape=jax.ShapeDtypeStruct((1, b_pad), jnp.float32),
        in_specs=[vmem] * len(args),
        out_specs=vmem,
        compiler_params=pltpu.CompilerParams(vmem_limit_bytes=_vmem_limit_bytes()),
    )(*args)
    return out[0, :B].reshape(B, 1)


def init_params(key):
    """PyTorch-style Linear init; BatchNorm1d defaults (gamma=1, beta=0)."""
    keys = jax.random.split(key, 2 * len(LAYER_DIMS) + 2)
    params = []
    for li, (din, dout) in enumerate(LAYER_DIMS):
        bound = 1.0 / (din ** 0.5)
        w = jax.random.uniform(keys[2 * li], (din, dout), jnp.float32, -bound, bound)
        b = jax.random.uniform(keys[2 * li + 1], (1, dout), jnp.float32, -bound, bound)
        g = jnp.ones((1, dout), jnp.float32)
        beta = jnp.zeros((1, dout), jnp.float32)
        params += [w, b, g, beta]
    bound = 1.0 / (OUT_IN ** 0.5)
    w_out = jax.random.uniform(keys[-2], (1, OUT_IN), jnp.float32, -bound, bound)
    b_out = jax.random.uniform(keys[-1], (1, 1), jnp.float32, -bound, bound)
    params += [w_out, b_out]
    return tuple(params)


def _reference(x, params):
    """Pure-JAX f32 reference of the PyTorch forward (training-mode BN, WITH biases)."""
    flat = list(params)
    h = x
    for li in range(len(LAYER_DIMS)):
        w, b, g, beta = flat[4 * li:4 * li + 4]
        z = h @ w + b
        mean = jnp.mean(z, axis=0, keepdims=True)
        var = jnp.mean((z - mean) ** 2, axis=0, keepdims=True)
        zn = (z - mean) * jax.lax.rsqrt(var + BN_EPS) * g + beta
        h = jnp.where(zn >= 0, zn, LEAKY_SLOPE * zn)
    w_out, b_out = flat[-2], flat[-1]
    return h @ w_out.T + b_out


if __name__ == "__main__":
    key = jax.random.PRNGKey(0)
    kx1, kx2, kp = jax.random.split(key, 3)
    params = init_params(kp)

    # Exercise both the masked (ragged batch) and unmasked (lane-aligned) paths.
    for kx, B in ((kx1, 8), (kx2, 128)):
        x = jax.random.normal(kx, (B, IN_DIM), jnp.float32)
        out = relation_head_long(x, params)
        jax.block_until_ready(out)
        assert out.shape == (B, 1)

        ref = _reference(x, params)
        assert bool(jnp.all(jnp.isfinite(out)))
        # bf16 matmul operands -> loose tolerance vs f32 reference.
        assert bool(jnp.allclose(out, ref, atol=1e-1, rtol=1e-1)), (B, out, ref)

    print("KERNEL_OK")
</pallas_src>

<mosaic_0001>
module attributes {stable_mosaic.version = 11 : i64} {
  func.func @_relation_head_long_kernel(%arg0: memref<128x128xbf16, #tpu.memory_space<vmem>>, %arg1: memref<128x256xbf16, #tpu.memory_space<vmem>>, %arg2: memref<256x256xbf16, #tpu.memory_space<vmem>>, %arg3: memref<2x1x256xf32, #tpu.memory_space<vmem>>, %arg4: memref<2x1x256xf32, #tpu.memory_space<vmem>>, %arg5: memref<64x256xbf16, #tpu.memory_space<vmem>>, %arg6: memref<64x64xbf16, #tpu.memory_space<vmem>>, %arg7: memref<16x64xbf16, #tpu.memory_space<vmem>>, %arg8: memref<16x16xbf16, #tpu.memory_space<vmem>>, %arg9: memref<4x16xbf16, #tpu.memory_space<vmem>>, %arg10: memref<5x64x1xf32, #tpu.memory_space<vmem>>, %arg11: memref<5x64x1xf32, #tpu.memory_space<vmem>>, %arg12: memref<1x4xbf16, #tpu.memory_space<vmem>>, %arg13: memref<1x1xf32, #tpu.memory_space<vmem>>, %arg14: memref<1x128xf32, #tpu.memory_space<vmem>>) attributes {dimension_semantics = [], scalar_prefetch = 0 : i64, scratch_operands = 0 : i64, tpu.core_type = #tpu.core_type<tc>} {
    %0 = tpu.iota {dimensions = array<i32: 1>} : vector<1x128xi32>
    %c8_i32 = arith.constant 8 : i32
    %1 = vector.broadcast %c8_i32 : i32 to vector<1x128xi32>
    %2 = arith.cmpi slt, %0, %1 : vector<1x128xi32>
    %3 = arith.extui %2 : vector<1x128xi1> to vector<1x128xi32>
    %4 = arith.sitofp %3 : vector<1x128xi32> to vector<1x128xf32>
    %5 = tpu.iota {dimensions = array<i32: 0>} : vector<128x1xi32>
    %c8_i32_0 = arith.constant 8 : i32
    %6 = vector.broadcast %c8_i32_0 : i32 to vector<128x1xi32>
    %7 = arith.cmpi slt, %5, %6 : vector<128x1xi32>
    %8 = arith.extui %7 : vector<128x1xi1> to vector<128x1xi32>
    %9 = arith.sitofp %8 : vector<128x1xi32> to vector<128x1xf32>
    %10 = arith.truncf %4 : vector<1x128xf32> to vector<1x128xbf16>
    %c0 = arith.constant 0 : index
    %c0_1 = arith.constant 0 : index
    %11 = vector.load %arg0[%c0, %c0_1] : memref<128x128xbf16, #tpu.memory_space<vmem>>, vector<128x128xbf16>
    %c0_2 = arith.constant 0 : index
    %c0_3 = arith.constant 0 : index
    %12 = vector.load %arg1[%c0_2, %c0_3] : memref<128x256xbf16, #tpu.memory_space<vmem>>, vector<128x256xbf16>
    %cst = arith.constant dense<0.000000e+00> : vector<128x256xf32>
    %13 = tpu.matmul %11, %12, %cst {dimension_numbers = #tpu.dot_dimension_numbers<[1], [0], [0], [1], [0, 0, 1, 1], [], []>} : vector<128x128xbf16>, vector<128x256xbf16>, vector<128x256xf32> -> vector<128x256xf32>
    %cst_4 = arith.constant dense<0.000000e+00> : vector<1x128xf32>
    %14 = tpu.matmul %10, %11, %cst_4 {dimension_numbers = #tpu.dot_dimension_numbers<[1], [0], [0], [1], [0, 0, 1, 1], [], []>} : vector<1x128xbf16>, vector<128x128xbf16>, vector<1x128xf32> -> vector<1x128xf32>
    %15 = arith.truncf %14 : vector<1x128xf32> to vector<1x128xbf16>
    %cst_5 = arith.constant dense<0.000000e+00> : vector<1x256xf32>
    %16 = tpu.matmul %15, %12, %cst_5 {dimension_numbers = #tpu.dot_dimension_numbers<[1], [0], [0], [1], [0, 0, 1, 1], [], []>} : vector<1x128xbf16>, vector<128x256xbf16>, vector<1x256xf32> -> vector<1x256xf32>
    %cst_6 = arith.constant 1.250000e-01 : f32
    %17 = vector.broadcast %cst_6 : f32 to vector<1x256xf32>
    %18 = arith.mulf %16, %17 : vector<1x256xf32>
    %19 = vector.broadcast %18 : vector<1x256xf32> to vector<128x256xf32>
    %20 = arith.subf %13, %19 : vector<128x256xf32>
    %21 = vector.broadcast %9 : vector<128x1xf32> to vector<128x256xf32>
    %22 = arith.mulf %20, %21 : vector<128x256xf32>
    %23 = arith.mulf %22, %20 : vector<128x256xf32>
    %cst_7 = arith.constant dense<0.000000e+00> : vector<256xf32>
    %24 = vector.multi_reduction <add>, %23, %cst_7 [0] : vector<128x256xf32> to vector<256xf32>
    %25 = vector.shape_cast %24 : vector<256xf32> to vector<1x256xf32>
    %cst_8 = arith.constant 1.250000e-01 : f32
    %26 = vector.broadcast %cst_8 : f32 to vector<1x256xf32>
    %27 = arith.mulf %25, %26 : vector<1x256xf32>
    %c0_9 = arith.constant 0 : index
    %c0_10 = arith.constant 0 : index
    %c0_11 = arith.constant 0 : index
    %28 = vector.load %arg3[%c0_9, %c0_10, %c0_11] : memref<2x1x256xf32, #tpu.memory_space<vmem>>, vector<1x1x256xf32>
    %29 = vector.shape_cast %28 : vector<1x1x256xf32> to vector<1x256xf32>
    %cst_12 = arith.constant 9.99999974E-6 : f32
    %30 = vector.broadcast %cst_12 : f32 to vector<1x256xf32>
    %31 = arith.addf %27, %30 : vector<1x256xf32>
    %32 = math.rsqrt %31 : vector<1x256xf32>
    %33 = arith.mulf %29, %32 : vector<1x256xf32>
    %34 = vector.broadcast %33 : vector<1x256xf32> to vector<128x256xf32>
    %35 = arith.mulf %20, %34 : vector<128x256xf32>
    %c0_13 = arith.constant 0 : index
    %c0_14 = arith.constant 0 : index
    %c0_15 = arith.constant 0 : index
    %36 = vector.load %arg4[%c0_13, %c0_14, %c0_15] : memref<2x1x256xf32, #tpu.memory_space<vmem>>, vector<1x1x256xf32>
    %37 = vector.shape_cast %36 : vector<1x1x256xf32> to vector<1x256xf32>
    %38 = vector.broadcast %37 : vector<1x256xf32> to vector<128x256xf32>
    %39 = arith.addf %35, %38 : vector<128x256xf32>
    %cst_16 = arith.constant 0.00999999977 : f32
    %40 = vector.broadcast %cst_16 : f32 to vector<128x256xf32>
    %41 = arith.mulf %40, %39 : vector<128x256xf32>
    %42 = arith.maximumf %39, %41 : vector<128x256xf32>
    %43 = arith.truncf %42 : vector<128x256xf32> to vector<128x256xbf16>
    %c0_17 = arith.constant 0 : index
    %c0_18 = arith.constant 0 : index
    %44 = vector.load %arg2[%c0_17, %c0_18] : memref<256x256xbf16, #tpu.memory_space<vmem>>, vector<256x256xbf16>
    %cst_19 = arith.constant dense<0.000000e+00> : vector<128x256xf32>
    %45 = tpu.matmul %43, %44, %cst_19 {dimension_numbers = #tpu.dot_dimension_numbers<[1], [0], [0], [1], [0, 0, 1, 1], [], []>} : vector<128x256xbf16>, vector<256x256xbf16>, vector<128x256xf32> -> vector<128x256xf32>
    %cst_20 = arith.constant dense<0.000000e+00> : vector<1x256xf32>
    %46 = tpu.matmul %10, %43, %cst_20 {dimension_numbers = #tpu.dot_dimension_numbers<[1], [0], [0], [1], [0, 0, 1, 1], [], []>} : vector<1x128xbf16>, vector<128x256xbf16>, vector<1x256xf32> -> vector<1x256xf32>
    %47 = arith.truncf %46 : vector<1x256xf32> to vector<1x256xbf16>
    %cst_21 = arith.constant dense<0.000000e+00> : vector<1x256xf32>
    %48 = tpu.matmul %47, %44, %cst_21 {dimension_numbers = #tpu.dot_dimension_numbers<[1], [0], [0], [1], [0, 0, 1, 1], [], []>} : vector<1x256xbf16>, vector<256x256xbf16>, vector<1x256xf32> -> vector<1x256xf32>
    %cst_22 = arith.constant 1.250000e-01 : f32
    %49 = vector.broadcast %cst_22 : f32 to vector<1x256xf32>
    %50 = arith.mulf %48, %49 : vector<1x256xf32>
    %51 = vector.broadcast %50 : vector<1x256xf32> to vector<128x256xf32>
    %52 = arith.subf %45, %51 : vector<128x256xf32>
    %53 = vector.broadcast %9 : vector<128x1xf32> to vector<128x256xf32>
    %54 = arith.mulf %52, %53 : vector<128x256xf32>
    %55 = arith.mulf %54, %52 : vector<128x256xf32>
    %cst_23 = arith.constant dense<0.000000e+00> : vector<256xf32>
    %56 = vector.multi_reduction <add>, %55, %cst_23 [0] : vector<128x256xf32> to vector<256xf32>
    %57 = vector.shape_cast %56 : vector<256xf32> to vector<1x256xf32>
    %cst_24 = arith.constant 1.250000e-01 : f32
    %58 = vector.broadcast %cst_24 : f32 to vector<1x256xf32>
    %59 = arith.mulf %57, %58 : vector<1x256xf32>
    %c1 = arith.constant 1 : index
    %c0_25 = arith.constant 0 : index
    %c0_26 = arith.constant 0 : index
    %60 = vector.load %arg3[%c1, %c0_25, %c0_26] : memref<2x1x256xf32, #tpu.memory_space<vmem>>, vector<1x1x256xf32>
    %61 = vector.shape_cast %60 : vector<1x1x256xf32> to vector<1x256xf32>
    %cst_27 = arith.constant 9.99999974E-6 : f32
    %62 = vector.broadcast %cst_27 : f32 to vector<1x256xf32>
    %63 = arith.addf %59, %62 : vector<1x256xf32>
    %64 = math.rsqrt %63 : vector<1x256xf32>
    %65 = arith.mulf %61, %64 : vector<1x256xf32>
    %66 = vector.broadcast %65 : vector<1x256xf32> to vector<128x256xf32>
    %67 = arith.mulf %52, %66 : vector<128x256xf32>
    %c1_28 = arith.constant 1 : index
    %c0_29 = arith.constant 0 : index
    %c0_30 = arith.constant 0 : index
    %68 = vector.load %arg4[%c1_28, %c0_29, %c0_30] : memref<2x1x256xf32, #tpu.memory_space<vmem>>, vector<1x1x256xf32>
    %69 = vector.shape_cast %68 : vector<1x1x256xf32> to vector<1x256xf32>
    %70 = vector.broadcast %69 : vector<1x256xf32> to vector<128x256xf32>
    %71 = arith.addf %67, %70 : vector<128x256xf32>
    %cst_31 = arith.constant 0.00999999977 : f32
    %72 = vector.broadcast %cst_31 : f32 to vector<128x256xf32>
    %73 = arith.mulf %72, %71 : vector<128x256xf32>
    %74 = arith.maximumf %71, %73 : vector<128x256xf32>
    %75 = tpu.transpose %74, [1, 0] : vector<128x256xf32> -> vector<256x128xf32>
    %76 = arith.truncf %75 : vector<256x128xf32> to vector<256x128xbf16>
    %c0_32 = arith.constant 0 : index
    %c0_33 = arith.constant 0 : index
    %77 = vector.load %arg5[%c0_32, %c0_33] : memref<64x256xbf16, #tpu.memory_space<vmem>>, vector<64x256xbf16>
    %cst_34 = arith.constant dense<0.000000e+00> : vector<64x128xf32>
    %78 = tpu.matmul %77, %76, %cst_34 {dimension_numbers = #tpu.dot_dimension_numbers<[1], [0], [0], [1], [0, 0, 1, 1], [], []>} : vector<64x256xbf16>, vector<256x128xbf16>, vector<64x128xf32> -> vector<64x128xf32>
    %79 = vector.broadcast %4 : vector<1x128xf32> to vector<64x128xf32>
    %80 = arith.mulf %78, %79 : vector<64x128xf32>
    %cst_35 = arith.constant dense<0.000000e+00> : vector<64xf32>
    %81 = vector.multi_reduction <add>, %80, %cst_35 [1] : vector<64x128xf32> to vector<64xf32>
    %82 = vector.shape_cast %81 : vector<64xf32> to vector<64x1xf32>
    %cst_36 = arith.constant 1.250000e-01 : f32
    %83 = vector.broadcast %cst_36 : f32 to vector<64x1xf32>
    %84 = arith.mulf %82, %83 : vector<64x1xf32>
    %85 = vector.broadcast %84 : vector<64x1xf32> to vector<64x128xf32>
    %86 = arith.subf %78, %85 : vector<64x128xf32>
    %87 = vector.broadcast %4 : vector<1x128xf32> to vector<64x128xf32>
    %88 = arith.mulf %86, %87 : vector<64x128xf32>
    %89 = arith.mulf %88, %86 : vector<64x128xf32>
    %cst_37 = arith.constant dense<0.000000e+00> : vector<64xf32>
    %90 = vector.multi_reduction <add>, %89, %cst_37 [1] : vector<64x128xf32> to vector<64xf32>
    %91 = vector.shape_cast %90 : vector<64xf32> to vector<64x1xf32>
    %cst_38 = arith.constant 1.250000e-01 : f32
    %92 = vector.broadcast %cst_38 : f32 to vector<64x1xf32>
    %93 = arith.mulf %91, %92 : vector<64x1xf32>
    %c0_39 = arith.constant 0 : index
    %c0_40 = arith.constant 0 : index
    %c0_41 = arith.constant 0 : index
    %94 = vector.load %arg10[%c0_39, %c0_40, %c0_41] : memref<5x64x1xf32, #tpu.memory_space<vmem>>, vector<1x64x1xf32>
    %95 = vector.shape_cast %94 : vector<1x64x1xf32> to vector<64x1xf32>
    %c0_42 = arith.constant 0 : index
    %c0_43 = arith.constant 0 : index
    %c0_44 = arith.constant 0 : index
    %96 = vector.load %arg11[%c0_42, %c0_43, %c0_44] : memref<5x64x1xf32, #tpu.memory_space<vmem>>, vector<1x64x1xf32>
    %97 = vector.shape_cast %96 : vector<1x64x1xf32> to vector<64x1xf32>
    %cst_45 = arith.constant 9.99999974E-6 : f32
    %98 = vector.broadcast %cst_45 : f32 to vector<64x1xf32>
    %99 = arith.addf %93, %98 : vector<64x1xf32>
    %100 = math.rsqrt %99 : vector<64x1xf32>
    %101 = arith.mulf %95, %100 : vector<64x1xf32>
    %102 = vector.broadcast %101 : vector<64x1xf32> to vector<64x128xf32>
    %103 = arith.mulf %86, %102 : vector<64x128xf32>
    %104 = vector.broadcast %97 : vector<64x1xf32> to vector<64x128xf32>
    %105 = arith.addf %103, %104 : vector<64x128xf32>
    %cst_46 = arith.constant 0.00999999977 : f32
    %106 = vector.broadcast %cst_46 : f32 to vector<64x128xf32>
    %107 = arith.mulf %106, %105 : vector<64x128xf32>
    %108 = arith.maximumf %105, %107 : vector<64x128xf32>
    %109 = arith.truncf %108 : vector<64x128xf32> to vector<64x128xbf16>
    %c0_47 = arith.constant 0 : index
    %c0_48 = arith.constant 0 : index
    %110 = vector.load %arg6[%c0_47, %c0_48] : memref<64x64xbf16, #tpu.memory_space<vmem>>, vector<64x64xbf16>
    %cst_49 = arith.constant dense<0.000000e+00> : vector<64x128xf32>
    %111 = tpu.matmul %110, %109, %cst_49 {dimension_numbers = #tpu.dot_dimension_numbers<[1], [0], [0], [1], [0, 0, 1, 1], [], []>} : vector<64x64xbf16>, vector<64x128xbf16>, vector<64x128xf32> -> vector<64x128xf32>
    %112 = vector.broadcast %4 : vector<1x128xf32> to vector<64x128xf32>
    %113 = arith.mulf %111, %112 : vector<64x128xf32>
    %cst_50 = arith.constant dense<0.000000e+00> : vector<64xf32>
    %114 = vector.multi_reduction <add>, %113, %cst_50 [1] : vector<64x128xf32> to vector<64xf32>
    %115 = vector.shape_cast %114 : vector<64xf32> to vector<64x1xf32>
    %cst_51 = arith.constant 1.250000e-01 : f32
    %116 = vector.broadcast %cst_51 : f32 to vector<64x1xf32>
    %117 = arith.mulf %115, %116 : vector<64x1xf32>
    %118 = vector.broadcast %117 : vector<64x1xf32> to vector<64x128xf32>
    %119 = arith.subf %111, %118 : vector<64x128xf32>
    %120 = vector.broadcast %4 : vector<1x128xf32> to vector<64x128xf32>
    %121 = arith.mulf %119, %120 : vector<64x128xf32>
    %122 = arith.mulf %121, %119 : vector<64x128xf32>
    %cst_52 = arith.constant dense<0.000000e+00> : vector<64xf32>
    %123 = vector.multi_reduction <add>, %122, %cst_52 [1] : vector<64x128xf32> to vector<64xf32>
    %124 = vector.shape_cast %123 : vector<64xf32> to vector<64x1xf32>
    %cst_53 = arith.constant 1.250000e-01 : f32
    %125 = vector.broadcast %cst_53 : f32 to vector<64x1xf32>
    %126 = arith.mulf %124, %125 : vector<64x1xf32>
    %c1_54 = arith.constant 1 : index
    %c0_55 = arith.constant 0 : index
    %c0_56 = arith.constant 0 : index
    %127 = vector.load %arg10[%c1_54, %c0_55, %c0_56] : memref<5x64x1xf32, #tpu.memory_space<vmem>>, vector<1x64x1xf32>
    %128 = vector.shape_cast %127 : vector<1x64x1xf32> to vector<64x1xf32>
    %c1_57 = arith.constant 1 : index
    %c0_58 = arith.constant 0 : index
    %c0_59 = arith.constant 0 : index
    %129 = vector.load %arg11[%c1_57, %c0_58, %c0_59] : memref<5x64x1xf32, #tpu.memory_space<vmem>>, vector<1x64x1xf32>
    %130 = vector.shape_cast %129 : vector<1x64x1xf32> to vector<64x1xf32>
    %cst_60 = arith.constant 9.99999974E-6 : f32
    %131 = vector.broadcast %cst_60 : f32 to vector<64x1xf32>
    %132 = arith.addf %126, %131 : vector<64x1xf32>
    %133 = math.rsqrt %132 : vector<64x1xf32>
    %134 = arith.mulf %128, %133 : vector<64x1xf32>
    %135 = vector.broadcast %134 : vector<64x1xf32> to vector<64x128xf32>
    %136 = arith.mulf %119, %135 : vector<64x128xf32>
    %137 = vector.broadcast %130 : vector<64x1xf32> to vector<64x128xf32>
    %138 = arith.addf %136, %137 : vector<64x128xf32>
    %cst_61 = arith.constant 0.00999999977 : f32
    %139 = vector.broadcast %cst_61 : f32 to vector<64x128xf32>
    %140 = arith.mulf %139, %138 : vector<64x128xf32>
    %141 = arith.maximumf %138, %140 : vector<64x128xf32>
    %142 = arith.truncf %141 : vector<64x128xf32> to vector<64x128xbf16>
    %c0_62 = arith.constant 0 : index
    %c0_63 = arith.constant 0 : index
    %143 = vector.load %arg7[%c0_62, %c0_63] : memref<16x64xbf16, #tpu.memory_space<vmem>>, vector<16x64xbf16>
    %cst_64 = arith.constant dense<0.000000e+00> : vector<16x128xf32>
    %144 = tpu.matmul %143, %142, %cst_64 {dimension_numbers = #tpu.dot_dimension_numbers<[1], [0], [0], [1], [0, 0, 1, 1], [], []>} : vector<16x64xbf16>, vector<64x128xbf16>, vector<16x128xf32> -> vector<16x128xf32>
    %145 = vector.broadcast %4 : vector<1x128xf32> to vector<16x128xf32>
    %146 = arith.mulf %144, %145 : vector<16x128xf32>
    %cst_65 = arith.constant dense<0.000000e+00> : vector<16xf32>
    %147 = vector.multi_reduction <add>, %146, %cst_65 [1] : vector<16x128xf32> to vector<16xf32>
    %148 = vector.shape_cast %147 : vector<16xf32> to vector<16x1xf32>
    %cst_66 = arith.constant 1.250000e-01 : f32
    %149 = vector.broadcast %cst_66 : f32 to vector<16x1xf32>
    %150 = arith.mulf %148, %149 : vector<16x1xf32>
    %151 = vector.broadcast %150 : vector<16x1xf32> to vector<16x128xf32>
    %152 = arith.subf %144, %151 : vector<16x128xf32>
    %153 = vector.broadcast %4 : vector<1x128xf32> to vector<16x128xf32>
    %154 = arith.mulf %152, %153 : vector<16x128xf32>
    %155 = arith.mulf %154, %152 : vector<16x128xf32>
    %cst_67 = arith.constant dense<0.000000e+00> : vector<16xf32>
    %156 = vector.multi_reduction <add>, %155, %cst_67 [1] : vector<16x128xf32> to vector<16xf32>
    %157 = vector.shape_cast %156 : vector<16xf32> to vector<16x1xf32>
    %cst_68 = arith.constant 1.250000e-01 : f32
    %158 = vector.broadcast %cst_68 : f32 to vector<16x1xf32>
    %159 = arith.mulf %157, %158 : vector<16x1xf32>
    %c2 = arith.constant 2 : index
    %c0_69 = arith.constant 0 : index
    %c0_70 = arith.constant 0 : index
    %160 = vector.load %arg10[%c2, %c0_69, %c0_70] : memref<5x64x1xf32, #tpu.memory_space<vmem>>, vector<1x64x1xf32>
    %161 = vector.shape_cast %160 : vector<1x64x1xf32> to vector<64x1xf32>
    %162 = vector.extract_strided_slice %161 {offsets = [0, 0], sizes = [16, 1], strides = [1, 1]} : vector<64x1xf32> to vector<16x1xf32>
    %c2_71 = arith.constant 2 : index
    %c0_72 = arith.constant 0 : index
    %c0_73 = arith.constant 0 : index
    %163 = vector.load %arg11[%c2_71, %c0_72, %c0_73] : memref<5x64x1xf32, #tpu.memory_space<vmem>>, vector<1x64x1xf32>
    %164 = vector.shape_cast %163 : vector<1x64x1xf32> to vector<64x1xf32>
    %165 = vector.extract_strided_slice %164 {offsets = [0, 0], sizes = [16, 1], strides = [1, 1]} : vector<64x1xf32> to vector<16x1xf32>
    %cst_74 = arith.constant 9.99999974E-6 : f32
    %166 = vector.broadcast %cst_74 : f32 to vector<16x1xf32>
    %167 = arith.addf %159, %166 : vector<16x1xf32>
    %168 = math.rsqrt %167 : vector<16x1xf32>
    %169 = arith.mulf %162, %168 : vector<16x1xf32>
    %170 = vector.broadcast %169 : vector<16x1xf32> to vector<16x128xf32>
    %171 = arith.mulf %152, %170 : vector<16x128xf32>
    %172 = vector.broadcast %165 : vector<16x1xf32> to vector<16x128xf32>
    %173 = arith.addf %171, %172 : vector<16x128xf32>
    %cst_75 = arith.constant 0.00999999977 : f32
    %174 = vector.broadcast %cst_75 : f32 to vector<16x128xf32>
    %175 = arith.mulf %174, %173 : vector<16x128xf32>
    %176 = arith.maximumf %173, %175 : vector<16x128xf32>
    %177 = arith.truncf %176 : vector<16x128xf32> to vector<16x128xbf16>
    %c0_76 = arith.constant 0 : index
    %c0_77 = arith.constant 0 : index
    %178 = vector.load %arg8[%c0_76, %c0_77] : memref<16x16xbf16, #tpu.memory_space<vmem>>, vector<16x16xbf16>
    %cst_78 = arith.constant dense<0.000000e+00> : vector<16x128xf32>
    %179 = tpu.matmul %178, %177, %cst_78 {dimension_numbers = #tpu.dot_dimension_numbers<[1], [0], [0], [1], [0, 0, 1, 1], [], []>} : vector<16x16xbf16>, vector<16x128xbf16>, vector<16x128xf32> -> vector<16x128xf32>
    %180 = vector.broadcast %4 : vector<1x128xf32> to vector<16x128xf32>
    %181 = arith.mulf %179, %180 : vector<16x128xf32>
    %cst_79 = arith.constant dense<0.000000e+00> : vector<16xf32>
    %182 = vector.multi_reduction <add>, %181, %cst_79 [1] : vector<16x128xf32> to vector<16xf32>
    %183 = vector.shape_cast %182 : vector<16xf32> to vector<16x1xf32>
    %cst_80 = arith.constant 1.250000e-01 : f32
    %184 = vector.broadcast %cst_80 : f32 to vector<16x1xf32>
    %185 = arith.mulf %183, %184 : vector<16x1xf32>
    %186 = vector.broadcast %185 : vector<16x1xf32> to vector<16x128xf32>
    %187 = arith.subf %179, %186 : vector<16x128xf32>
    %188 = vector.broadcast %4 : vector<1x128xf32> to vector<16x128xf32>
    %189 = arith.mulf %187, %188 : vector<16x128xf32>
    %190 = arith.mulf %189, %187 : vector<16x128xf32>
    %cst_81 = arith.constant dense<0.000000e+00> : vector<16xf32>
    %191 = vector.multi_reduction <add>, %190, %cst_81 [1] : vector<16x128xf32> to vector<16xf32>
    %192 = vector.shape_cast %191 : vector<16xf32> to vector<16x1xf32>
    %cst_82 = arith.constant 1.250000e-01 : f32
    %193 = vector.broadcast %cst_82 : f32 to vector<16x1xf32>
    %194 = arith.mulf %192, %193 : vector<16x1xf32>
    %c3 = arith.constant 3 : index
    %c0_83 = arith.constant 0 : index
    %c0_84 = arith.constant 0 : index
    %195 = vector.load %arg10[%c3, %c0_83, %c0_84] : memref<5x64x1xf32, #tpu.memory_space<vmem>>, vector<1x64x1xf32>
    %196 = vector.shape_cast %195 : vector<1x64x1xf32> to vector<64x1xf32>
    %197 = vector.extract_strided_slice %196 {offsets = [0, 0], sizes = [16, 1], strides = [1, 1]} : vector<64x1xf32> to vector<16x1xf32>
    %c3_85 = arith.constant 3 : index
    %c0_86 = arith.constant 0 : index
    %c0_87 = arith.constant 0 : index
    %198 = vector.load %arg11[%c3_85, %c0_86, %c0_87] : memref<5x64x1xf32, #tpu.memory_space<vmem>>, vector<1x64x1xf32>
    %199 = vector.shape_cast %198 : vector<1x64x1xf32> to vector<64x1xf32>
    %200 = vector.extract_strided_slice %199 {offsets = [0, 0], sizes = [16, 1], strides = [1, 1]} : vector<64x1xf32> to vector<16x1xf32>
    %cst_88 = arith.constant 9.99999974E-6 : f32
    %201 = vector.broadcast %cst_88 : f32 to vector<16x1xf32>
    %202 = arith.addf %194, %201 : vector<16x1xf32>
    %203 = math.rsqrt %202 : vector<16x1xf32>
    %204 = arith.mulf %197, %203 : vector<16x1xf32>
    %205 = vector.broadcast %204 : vector<16x1xf32> to vector<16x128xf32>
    %206 = arith.mulf %187, %205 : vector<16x128xf32>
    %207 = vector.broadcast %200 : vector<16x1xf32> to vector<16x128xf32>
    %208 = arith.addf %206, %207 : vector<16x128xf32>
    %cst_89 = arith.constant 0.00999999977 : f32
    %209 = vector.broadcast %cst_89 : f32 to vector<16x128xf32>
    %210 = arith.mulf %209, %208 : vector<16x128xf32>
    %211 = arith.maximumf %208, %210 : vector<16x128xf32>
    %212 = arith.truncf %211 : vector<16x128xf32> to vector<16x128xbf16>
    %c0_90 = arith.constant 0 : index
    %c0_91 = arith.constant 0 : index
    %213 = vector.load %arg9[%c0_90, %c0_91] : memref<4x16xbf16, #tpu.memory_space<vmem>>, vector<4x16xbf16>
    %cst_92 = arith.constant dense<0.000000e+00> : vector<4x128xf32>
    %214 = tpu.matmul %213, %212, %cst_92 {dimension_numbers = #tpu.dot_dimension_numbers<[1], [0], [0], [1], [0, 0, 1, 1], [], []>} : vector<4x16xbf16>, vector<16x128xbf16>, vector<4x128xf32> -> vector<4x128xf32>
    %215 = vector.broadcast %4 : vector<1x128xf32> to vector<4x128xf32>
    %216 = arith.mulf %214, %215 : vector<4x128xf32>
    %cst_93 = arith.constant dense<0.000000e+00> : vector<4xf32>
    %217 = vector.multi_reduction <add>, %216, %cst_93 [1] : vector<4x128xf32> to vector<4xf32>
    %218 = vector.shape_cast %217 : vector<4xf32> to vector<4x1xf32>
    %cst_94 = arith.constant 1.250000e-01 : f32
    %219 = vector.broadcast %cst_94 : f32 to vector<4x1xf32>
    %220 = arith.mulf %218, %219 : vector<4x1xf32>
    %221 = vector.broadcast %220 : vector<4x1xf32> to vector<4x128xf32>
    %222 = arith.subf %214, %221 : vector<4x128xf32>
    %223 = vector.broadcast %4 : vector<1x128xf32> to vector<4x128xf32>
    %224 = arith.mulf %222, %223 : vector<4x128xf32>
    %225 = arith.mulf %224, %222 : vector<4x128xf32>
    %cst_95 = arith.constant dense<0.000000e+00> : vector<4xf32>
    %226 = vector.multi_reduction <add>, %225, %cst_95 [1] : vector<4x128xf32> to vector<4xf32>
    %227 = vector.shape_cast %226 : vector<4xf32> to vector<4x1xf32>
    %cst_96 = arith.constant 1.250000e-01 : f32
    %228 = vector.broadcast %cst_96 : f32 to vector<4x1xf32>
    %229 = arith.mulf %227, %228 : vector<4x1xf32>
    %c4 = arith.constant 4 : index
    %c0_97 = arith.constant 0 : index
    %c0_98 = arith.constant 0 : index
    %230 = vector.load %arg10[%c4, %c0_97, %c0_98] : memref<5x64x1xf32, #tpu.memory_space<vmem>>, vector<1x64x1xf32>
    %231 = vector.shape_cast %230 : vector<1x64x1xf32> to vector<64x1xf32>
    %232 = vector.extract_strided_slice %231 {offsets = [0, 0], sizes = [4, 1], strides = [1, 1]} : vector<64x1xf32> to vector<4x1xf32>
    %c4_99 = arith.constant 4 : index
    %c0_100 = arith.constant 0 : index
    %c0_101 = arith.constant 0 : index
    %233 = vector.load %arg11[%c4_99, %c0_100, %c0_101] : memref<5x64x1xf32, #tpu.memory_space<vmem>>, vector<1x64x1xf32>
    %234 = vector.shape_cast %233 : vector<1x64x1xf32> to vector<64x1xf32>
    %235 = vector.extract_strided_slice %234 {offsets = [0, 0], sizes = [4, 1], strides = [1, 1]} : vector<64x1xf32> to vector<4x1xf32>
    %cst_102 = arith.constant 9.99999974E-6 : f32
    %236 = vector.broadcast %cst_102 : f32 to vector<4x1xf32>
    %237 = arith.addf %229, %236 : vector<4x1xf32>
    %238 = math.rsqrt %237 : vector<4x1xf32>
    %239 = arith.mulf %232, %238 : vector<4x1xf32>
    %240 = vector.broadcast %239 : vector<4x1xf32> to vector<4x128xf32>
    %241 = arith.mulf %222, %240 : vector<4x128xf32>
    %242 = vector.broadcast %235 : vector<4x1xf32> to vector<4x128xf32>
    %243 = arith.addf %241, %242 : vector<4x128xf32>
    %cst_103 = arith.constant 0.00999999977 : f32
    %244 = vector.broadcast %cst_103 : f32 to vector<4x128xf32>
    %245 = arith.mulf %244, %243 : vector<4x128xf32>
    %246 = arith.maximumf %243, %245 : vector<4x128xf32>
    %247 = arith.truncf %246 : vector<4x128xf32> to vector<4x128xbf16>
    %c0_104 = arith.constant 0 : index
    %c0_105 = arith.constant 0 : index
    %248 = vector.load %arg12[%c0_104, %c0_105] : memref<1x4xbf16, #tpu.memory_space<vmem>>, vector<1x4xbf16>
    %cst_106 = arith.constant dense<0.000000e+00> : vector<1x128xf32>
    %249 = tpu.matmul %248, %247, %cst_106 {dimension_numbers = #tpu.dot_dimension_numbers<[1], [0], [0], [1], [0, 0, 1, 1], [], []>} : vector<1x4xbf16>, vector<4x128xbf16>, vector<1x128xf32> -> vector<1x128xf32>
    %c0_107 = arith.constant 0 : index
    %c0_108 = arith.constant 0 : index
    %250 = vector.load %arg13[%c0_107, %c0_108] : memref<1x1xf32, #tpu.memory_space<vmem>>, vector<1x1xf32>
    %251 = vector.broadcast %250 : vector<1x1xf32> to vector<1x128xf32>
    %252 = arith.addf %249, %251 : vector<1x128xf32>
    %c0_109 = arith.constant 0 : index
    %c0_110 = arith.constant 0 : index
    %253 = vector.load %arg14[%c0_109, %c0_110] : memref<1x128xf32, #tpu.memory_space<vmem>>, vector<1x128xf32>
    tpu.vector_store %arg14[%c0_109, %c0_110], %252 {strides = array<i32>} : memref<1x128xf32, #tpu.memory_space<vmem>>, vector<1x128xf32>,
    return
  }
}

</mosaic_0001>

<bundles_post_ra>
// kernel: tpu_custom_call.1
= control target key start
LH: loop header
LB: loop body
LE: loop exit
PB: predicated region body
PF: predicated region fallthrough
CT: control target
= control target key end

     0   :  { %s4626_s0 = inlined_call_operand.vmem [shape: bf16[128,128], index: 0, kind: input, shape index: {}]   ;;  %s4627_s1 = inlined_call_operand.vmem [shape: bf16[128,256], index: 1, kind: input, shape index: {}]   ;;  %s4628_s2 = inlined_call_operand.vmem [shape: bf16[256,256], index: 2, kind: input, shape index: {}]   ;;  %s4629_s3 = inlined_call_operand.vmem [shape: f32[2,1,256], index: 3, kind: input, shape index: {}]   ;;  %s4630_s4 = inlined_call_operand.vmem [shape: f32[2,1,256], index: 4, kind: input, shape index: {}]   ;;  %s4631_s5 = inlined_call_operand.vmem [shape: bf16[64,256], index: 5, kind: input, shape index: {}]   ;;  %s4632_s6 = inlined_call_operand.vmem [shape: bf16[64,64], index: 6, kind: input, shape index: {}]   ;;  %s4633_s7 = inlined_call_operand.vmem [shape: bf16[16,64], index: 7, kind: input, shape index: {}]   ;;  %s4634_s8 = inlined_call_operand.vmem [shape: bf16[16,16], index: 8, kind: input, shape index: {}]   ;;  %s4635_s9 = inlined_call_operand.vmem [shape: bf16[4,16], index: 9, kind: input, shape index: {}]   ;;  %s4636_s10 = inlined_call_operand.vmem [shape: f32[5,64,1], index: 10, kind: input, shape index: {}]   ;;  %s4637_s11 = inlined_call_operand.vmem [shape: f32[5,64,1], index: 11, kind: input, shape index: {}]   ;;  %s4638_s12 = inlined_call_operand.vmem [shape: bf16[1,4], index: 12, kind: input, shape index: {}]   ;;  %s4639_s13 = inlined_call_operand.<no memory space> [shape: f32[1,1], index: 13, kind: input, shape index: {}]   ;;  %s4640_s14 = inlined_call_operand.hbm [shape: f32[1,128], index: 14, kind: output, shape index: {}]  }
   0x1   :  { %v19_v0 = vstv %s4639_s13 }
   0x2   :  { %20 = vst [vmem:[#allocation2] sm:$0x1] %v19_v0 }
   0x3   :  { %v3309_v1 = vld [vmem:[%s4626_s0] sm:$0xff]   ;;  %v4642_v2 = vmov 0.0   ;;  %v3316_v3 = vld [vmem:[%s4626_s0 + $0x8] sm:$0xff]   ;;  %vm3223_vm0 = vmmov 0   ;;  %v3325_v4 = vld [vmem:[%s4626_s0 + $0x10] sm:$0xff]   ;;  %v4641_v8 = vmov 0   ;;  %v4645_v9 = vlaneseq }
   0x4   :  { %2864 = vmatprep.subr.bf16.mxu1 %v4642_v2  ;;  %2880 = vmatprep.mubr.msk.bf16.mxu1 %vm3223_vm0, %v4642_v2  ;;  %v3331_v5 = vld [vmem:[%s4626_s0 + $0x18] sm:$0xff]   ;;  %v3058_v6 = vld [vmem:[%s4627_s1 + $0x4] ss:$8 sps:$4 sm:$0xff]   ;;  %v3060_v7 = vld [vmem:[%s4627_s1] ss:$8 sps:$4 sm:$0xff]   ;;  %v4680_v21 = vmov 0 }
   0x5   :  { %2865 = vmatpush3.bf16.msra.mxu1 %v3309_v1  ;;  %314 = vmatprep.mubr.bf16.mxu0 %v4641_v8  ;;  %v3061_v10 = vld [vmem:[%s4627_s1 + $0x14] ss:$8 sps:$4 sm:$0xff]   ;;  %v3063_v11 = vld [vmem:[%s4627_s1 + $0x10] ss:$8 sps:$4 sm:$0xff]   ;;  %v3353_v12 = vld [vmem:[%s4626_s0 + $0x20] sm:$0xff]   ;;  %v3360_v14 = vand.u32 127, %v4645_v9 }
   0x6   :  { %2866 = vmatprep.subr.bf16.mxu1 %v4642_v2  ;;  %3048 = vset.pattern.permute.xlu1 %v4641_v8  ;;  %v3064_v13 = vld [vmem:[%s4627_s1 + $0x24] ss:$8 sps:$4 sm:$0xff]   ;;  %v3066_v15 = vld [vmem:[%s4627_s1 + $0x20] ss:$8 sps:$4 sm:$0xff]   ;;  %v3067_v17 = vld [vmem:[%s4627_s1 + $0x34] ss:$8 sps:$4 sm:$0xff]  }
   0x7   :  { %282 = vmatprep.subr.bf16.mxu0 %v3058_v6  ;;  %4679 = vst [vmem:[#allocation6_spill] sm:$0xff] %v3360_v14  ;;  %v3055_v16 = vld [vmem:[%s4626_s0 + $0x28] sm:$0xff]   ;;  %vm53_vm1 = vcmp.lt.s32.totalorder %v3360_v14, 8  ;;  %v3069_v18 = vld [vmem:[%s4627_s1 + $0x30] ss:$8 sps:$4 sm:$0xff]  }
   0x8   :  { %283 = vmatpush1.bf16.msra.mxu0 %v3060_v7  ;;  %v3056_v19 = vld [vmem:[%s4626_s0 + $0x30] sm:$0xff]   ;;  %v3070_v20 = vld [vmem:[%s4627_s1 + $0x44] ss:$8 sps:$4 sm:$0xff]   ;;  %vm3386_vm2 = vmpackc.low %vm53_vm1, %vm53_vm1  ;;  %v4644_v29 = vmov 1.0|1.0  }
   0x9   :  { %2867 = vmatpush3.bf16.msra.mxu1 %v3316_v3  ;;  %284 = vmatprep.subr.bf16.mxu0 %v3061_v10  ;;  %v4681_v21 = vsel %vm3386_vm2, 4294967295, %v4680_v21  ;;  %v3072_v22 = vld [vmem:[%s4627_s1 + $0x40] ss:$8 sps:$4 sm:$0xff]   ;;  %v3057_v23 = vld [vmem:[%s4626_s0 + $0x38] sm:$0xff]   ;;  %v3076_v26 = vld [vmem:[%s4627_s1 + $0x64] ss:$8 sps:$4 sm:$0xff]  }
   0xa   :  { %2868 = vmatprep.subr.bf16.mxu1 %v4642_v2  ;;  %4682 = vst [vmem:[#allocation7_spill] sm:$0xff] %v4681_v21  ;;  %v3073_v24 = vld [vmem:[%s4627_s1 + $0x54] ss:$8 sps:$4 sm:$0xff]   ;;  %v3075_v25 = vld [vmem:[%s4627_s1 + $0x50] ss:$8 sps:$4 sm:$0xff]  }
   0xb   :  { %v3078_v27 = vld [vmem:[%s4627_s1 + $0x60] ss:$8 sps:$4 sm:$0xff]   ;;  %v3079_v28 = vld [vmem:[%s4627_s1 + $0x74] ss:$8 sps:$4 sm:$0xff]   ;;  %v3081_v30 = vld [vmem:[%s4627_s1 + $0x70] ss:$8 sps:$4 sm:$0xff]  }
   0xc   :  { %285 = vmatpush1.bf16.msra.mxu0 %v3063_v11 }
   0xd   :  { %2869 = vmatpush3.bf16.msra.mxu1 %v3325_v4  ;;  %286 = vmatprep.subr.bf16.mxu0 %v3064_v13 }
   0xe   :  { %2870 = vmatprep.subr.bf16.mxu1 %v4642_v2 }
  0x10   :  { %287 = vmatpush1.bf16.msra.mxu0 %v3066_v15 }
  0x11   :  { %2871 = vmatpush3.bf16.msra.mxu1 %v3331_v5  ;;  %288 = vmatprep.subr.bf16.mxu0 %v3067_v17 }
  0x12   :  { %2872 = vmatprep.subr.bf16.mxu1 %v4642_v2 }
  0x14   :  { %289 = vmatpush1.bf16.msra.mxu0 %v3069_v18 }
  0x15   :  { %2873 = vmatpush3.bf16.msra.mxu1 %v3353_v12  ;;  %290 = vmatprep.subr.bf16.mxu0 %v3070_v20 }
  0x16   :  { %2874 = vmatprep.subr.bf16.mxu1 %v4642_v2 }
  0x18   :  { %291 = vmatpush1.bf16.msra.mxu0 %v3072_v22 }
  0x19   :  { %2875 = vmatpush3.bf16.msra.mxu1 %v3055_v16  ;;  %292 = vmatprep.subr.bf16.mxu0 %v3073_v24 }
  0x1a   :  { %2876 = vmatprep.subr.bf16.mxu1 %v4642_v2 }
  0x1c   :  { %293 = vmatpush1.bf16.msra.mxu0 %v3075_v25 }
  0x1d   :  { %2877 = vmatpush3.bf16.msra.mxu1 %v3056_v19  ;;  %294 = vmatprep.subr.bf16.mxu0 %v3076_v26 }
  0x1e   :  { %2878 = vmatprep.subr.bf16.mxu1 %v4642_v2 }
  0x20   :  { %295 = vmatpush1.bf16.msra.mxu0 %v3078_v27 }
  0x21   :  { %2879 = vmatpush3.bf16.msra.mxu1 %v3057_v23 }
  0x22   :  { %436 = vmatprep.subr.bf16.mxu1 %v3058_v6 }
  0x24   :  { %2881 = vmatmul.mubr.msk.bf16.vlgmr.msra.gmra.mrb[0].mxu1 %vm3386_vm2, %v4644_v29 }
  0x25   :  { %437 = vmatpush1.bf16.msra.mxu1 %v3060_v7  ;;  %468 = vmatprep.mubr.bf16.mxu1 %v4641_v8 }
  0x26   :  { %438 = vmatprep.subr.bf16.mxu1 %v3061_v10 }
  0x27   :  { %21 = vsyncpa [#allocation4], 0  ;;  %296 = vmatprep.subr.bf16.mxu0 %v3079_v28  ;;  %v3505_v6 = vld [vmem:[%s4628_s2] ss:$8 sps:$4 sm:$0xff]   ;;  %v3512_v7 = vld [vmem:[%s4628_s2 + $0x14] ss:$8 sps:$4 sm:$0xff]  }
  0x28   :  { %297 = vmatpush1.bf16.msra.mxu0 %v3081_v30  ;;  %v3517_v10 = vld [vmem:[%s4628_s2 + $0x10] ss:$8 sps:$4 sm:$0xff]   ;;  %v3667_v29 = vld [vmem:[%s4628_s2 + $0xe4] ss:$8 sps:$4 sm:$0xff]   ;;  %v3673_v9 = vld [vmem:[%s4628_s2 + $0xe0] ss:$8 sps:$4 sm:$0xff]  }
  0x29   :  { %439 = vmatpush1.bf16.msra.mxu1 %v3063_v11  ;;  %v3524_v11 = vld [vmem:[%s4628_s2 + $0x24] ss:$8 sps:$4 sm:$0xff]   ;;  %v3661_v2 = vld [vmem:[%s4628_s2 + $0xd0] ss:$8 sps:$4 sm:$0xff]   ;;  %4702 = vst [vmem:[#allocation27_spill] sm:$0xff] %v3667_v29  ;;  %4703 = vst [vmem:[#allocation28_spill] sm:$0xff] %v3673_v9 }
  0x2a   :  { %440 = vmatprep.subr.bf16.mxu1 %v3064_v13  ;;  %v3536_v13 = vld [vmem:[%s4628_s2 + $0x34] ss:$8 sps:$4 sm:$0xff]   ;;  %4701 = vst [vmem:[#allocation26_spill] sm:$0xff] %v3661_v2  ;;  %vm1991_vm3 = vcmask 523264   ;;  %vm2426_vm4 = vcmask 130048   ;;  %vm2577_vm5 = vcmask 1043456  }
  0x2b   :  { %315 = vmatmul.mubr.bf16.vlgmr.msra.gmra.mrb[0].mxu0 %v3309_v1  ;;  %v3679_v14 = vld [vmem:[%s4628_s2 + $0xf4] ss:$8 sps:$4 sm:$0xff]   ;;  %vm2626_vm6 = vcmask 1041408   ;;  %vm2622_vm7 = vcmask 31744  }
  0x2c   :  { %324 = vmatprep.mubr.bf16.mxu0 %v4641_v8  ;;  %4704 = vst [vmem:[#allocation29_spill] sm:$0xff] %v3679_v14 }
  0x2d   :  { %441 = vmatpush1.bf16.msra.mxu1 %v3066_v15  ;;  %v3541_v15 = vld [vmem:[%s4628_s2 + $0x30] ss:$8 sps:$4 sm:$0xff]  }
  0x2e   :  { %442 = vmatprep.subr.bf16.mxu1 %v3067_v17  ;;  %v3553_v17 = vld [vmem:[%s4628_s2 + $0x40] ss:$8 sps:$4 sm:$0xff]  }
  0x2f   :  { %4683 = vst [vmem:[#allocation8_spill] sm:$0xff] %v3553_v17 }
  0x31   :  { %443 = vmatpush1.bf16.msra.mxu1 %v3069_v18  ;;  %v3560_v18 = vld [vmem:[%s4628_s2 + $0x54] ss:$8 sps:$4 sm:$0xff]  }
  0x32   :  { %444 = vmatprep.subr.bf16.mxu1 %v3070_v20  ;;  %4684 = vst [vmem:[#allocation9_spill] sm:$0xff] %v3560_v18  ;;  %v3572_v20 = vld [vmem:[%s4628_s2 + $0x64] ss:$8 sps:$4 sm:$0xff]  }
  0x33   :  { %325 = vmatmul.mubr.bf16.gmra.mrb[4].mxu0 %v3316_v3  ;;  %4686 = vst [vmem:[#allocation11_spill] sm:$0xff] %v3572_v20 }
  0x34   :  { %334 = vmatprep.mubr.bf16.mxu0 %v4641_v8 }
  0x35   :  { %445 = vmatpush1.bf16.msra.mxu1 %v3072_v22  ;;  %v3577_v22 = vld [vmem:[%s4628_s2 + $0x60] ss:$8 sps:$4 sm:$0xff]  }
  0x36   :  { %446 = vmatprep.subr.bf16.mxu1 %v3073_v24  ;;  %4687 = vst [vmem:[#allocation12_spill] sm:$0xff] %v3577_v22  ;;  %v3589_v24 = vld [vmem:[%s4628_s2 + $0x70] ss:$8 sps:$4 sm:$0xff]  }
  0x37   :  { %4689 = vst [vmem:[#allocation14_spill] sm:$0xff] %v3589_v24 }
  0x39   :  { %447 = vmatpush1.bf16.msra.mxu1 %v3075_v25  ;;  %v3596_v25 = vld [vmem:[%s4628_s2 + $0x84] ss:$8 sps:$4 sm:$0xff]  }
  0x3a   :  { %448 = vmatprep.subr.bf16.mxu1 %v3076_v26  ;;  %4690 = vst [vmem:[#allocation15_spill] sm:$0xff] %v3596_v25  ;;  %v3601_v26 = vld [vmem:[%s4628_s2 + $0x80] ss:$8 sps:$4 sm:$0xff]  }
  0x3b   :  { %335 = vmatmul.mubr.bf16.gmra.mrb[8].mxu0 %v3325_v4  ;;  %4691 = vst [vmem:[#allocation16_spill] sm:$0xff] %v3601_v26 }
  0x3c   :  { %344 = vmatprep.mubr.bf16.mxu0 %v4641_v8 }
  0x3d   :  { %449 = vmatpush1.bf16.msra.mxu1 %v3078_v27  ;;  %v3608_v27 = vld [vmem:[%s4628_s2 + $0x94] ss:$8 sps:$4 sm:$0xff]  }
  0x3e   :  { %450 = vmatprep.subr.bf16.mxu1 %v3079_v28  ;;  %4692 = vst [vmem:[#allocation17_spill] sm:$0xff] %v3608_v27  ;;  %v3613_v28 = vld [vmem:[%s4628_s2 + $0x90] ss:$8 sps:$4 sm:$0xff]  }
  0x3f   :  { %4693 = vst [vmem:[#allocation18_spill] sm:$0xff] %v3613_v28 }
  0x41   :  { %451 = vmatpush1.bf16.msra.mxu1 %v3081_v30  ;;  %v3620_v30 = vld [vmem:[%s4628_s2 + $0xa4] ss:$8 sps:$4 sm:$0xff]  }
  0x42   :  { %4694 = vst [vmem:[#allocation19_spill] sm:$0xff] %v3620_v30 }
  0x43   :  { %345 = vmatmul.mubr.bf16.gmra.mrb[12].mxu0 %v3331_v5  ;;  %v3500_v5 = vld [vmem:[%s4628_s2 + $0x4] ss:$8 sps:$4 sm:$0xff]  }
  0x44   :  { %354 = vmatprep.mubr.bf16.mxu0 %v4641_v8  ;;  %1010 = vmatprep.subr.bf16.mxu0 %v3500_v5 }
  0x45   :  { %1011 = vmatpush1.bf16.msra.mxu0 %v3505_v6 }
  0x46   :  { %1012 = vmatprep.subr.bf16.mxu0 %v3512_v7 }
  0x49   :  { %1013 = vmatpush1.bf16.msra.mxu0 %v3517_v10 }
  0x4a   :  { %1014 = vmatprep.subr.bf16.mxu0 %v3524_v11 }
  0x4b   :  { %355 = vmatmul.mubr.bf16.gmra.mrb[16].mxu0 %v3353_v12  ;;  %v3529_v12 = vld [vmem:[%s4628_s2 + $0x20] ss:$8 sps:$4 sm:$0xff]  }
  0x4c   :  { %364 = vmatprep.mubr.bf16.mxu0 %v4641_v8 }
  0x4d   :  { %1015 = vmatpush1.bf16.msra.mxu0 %v3529_v12 }
  0x4e   :  { %1016 = vmatprep.subr.bf16.mxu0 %v3536_v13 }
  0x51   :  { %1017 = vmatpush1.bf16.msra.mxu0 %v3541_v15 }
  0x53   :  { %365 = vmatmul.mubr.bf16.gmra.mrb[20].mxu0 %v3055_v16  ;;  %v3548_v16 = vld [vmem:[%s4628_s2 + $0x44] ss:$8 sps:$4 sm:$0xff]  }
  0x54   :  { %374 = vmatprep.mubr.bf16.mxu0 %v4641_v8  ;;  %1018 = vmatprep.subr.bf16.mxu0 %v3548_v16 }
  0x55   :  { %1019 = vmatpush1.bf16.msra.mxu0 %v3553_v17 }
  0x56   :  { %1020 = vmatprep.subr.bf16.mxu0 %v3560_v18 }
  0x5b   :  { %375 = vmatmul.mubr.bf16.gmra.mrb[24].mxu0 %v3056_v19  ;;  %v3565_v19 = vld [vmem:[%s4628_s2 + $0x50] ss:$8 sps:$4 sm:$0xff]  }
  0x5c   :  { %384 = vmatprep.mubr.bf16.mxu0 %v4641_v8  ;;  %4685 = vst [vmem:[#allocation10_spill] sm:$0xff] %v3565_v19  ;;  %1021 = vmatpush1.bf16.msra.mxu0 %v3565_v19 }
  0x5d   :  { %1022 = vmatprep.subr.bf16.mxu0 %v3572_v20 }
  0x60   :  { %1023 = vmatpush1.bf16.msra.mxu0 %v3577_v22 }
  0x63   :  { %385 = vmatmul.mubr.bf16.gmra.mrb[28].mxu0 %v3057_v23  ;;  %v3584_v23 = vld [vmem:[%s4628_s2 + $0x74] ss:$8 sps:$4 sm:$0xff]  }
  0x64   :  { %4688 = vst [vmem:[#allocation13_spill] sm:$0xff] %v3584_v23  ;;  %1024 = vmatprep.subr.bf16.mxu0 %v3584_v23 }
  0x65   :  { %1025 = vmatpush1.bf16.msra.mxu0 %v3589_v24 }
  0x66   :  { %1026 = vmatprep.subr.bf16.mxu0 %v3596_v25 }
  0x69   :  { %1027 = vmatpush1.bf16.msra.mxu0 %v3601_v26 }
  0x6a   :  { %1028 = vmatprep.subr.bf16.mxu0 %v3608_v27 }
  0x6d   :  { %1029 = vmatpush1.bf16.msra.mxu0 %v3613_v28 }
  0x6e   :  { %1030 = vmatprep.subr.bf16.mxu0 %v3620_v30 }
  0xf7   :  { %v429_v31 = vpop.f32.mrb[0].mxu1 }
  0xf8   :  { %v435_v32 = vpack.c.bf16 %v429_v31, %v429_v31  ;;  %v2882_v33 = vpop.f32.mrb[1].mxu1  ;;  %v3625_v31 = vld [vmem:[%s4628_s2 + $0xa0] ss:$8 sps:$4 sm:$0xff]  }
  0xf9   :  { %v432_v34 = vpop.f32.mrb[2].mxu1  ;;  %4695 = vst [vmem:[#allocation20_spill] sm:$0xff] %v3625_v31  ;;  %1031 = vmatpush1.bf16.msra.mxu0 %v3625_v31  ;;  %v3637_v33 = vld [vmem:[%s4628_s2 + $0xb0] ss:$8 sps:$4 sm:$0xff]  }
  0xfa   :  { %v2883_v35 = vpop.f32.mrb[3].mxu1  ;;  %469 = vmatmul.mubr.bf16.vlgmr.msra.gmra.mrb[4].mxu1 %v435_v32  ;;  %v3632_v32 = vld [vmem:[%s4628_s2 + $0xb4] ss:$8 sps:$4 sm:$0xff]   ;;  %4697 = vst [vmem:[#allocation22_spill] sm:$0xff] %v3637_v33  ;;  %v3644_v34 = vld [vmem:[%s4628_s2 + $0xc4] ss:$8 sps:$4 sm:$0xff]  }
  0xfb   :  { %1155 = vmatprep.mubr.bf16.mxu1 %v4641_v8  ;;  %4696 = vst [vmem:[#allocation21_spill] sm:$0xff] %v3632_v32  ;;  %1032 = vmatprep.subr.bf16.mxu0 %v3632_v32  ;;  %4698 = vst [vmem:[#allocation23_spill] sm:$0xff] %v3644_v34  ;;  %v3649_v35 = vld [vmem:[%s4628_s2 + $0xc0] ss:$8 sps:$4 sm:$0xff]   ;;  %v3654_v8 = vld [vmem:[%s4628_s2 + $0xd4] ss:$8 sps:$4 sm:$0xff]  }
  0xfc   :  { %4699 = vst [vmem:[#allocation24_spill] sm:$0xff] %v3649_v35  ;;  %4700 = vst [vmem:[#allocation25_spill] sm:$0xff] %v3654_v8 }
  0xfd   :  { %1033 = vmatpush1.bf16.msra.mxu0 %v3637_v33 }
  0xfe   :  { %v3433_v36 = vpop.f32.mrb[0].mxu0  ;;  %1034 = vmatprep.subr.bf16.mxu0 %v3644_v34 }
  0xff   :  { %v3435_v37 = vpop.f32.mrb[1].mxu0 }
 0x100   :  { %v3437_v38 = vpop.f32.mrb[2].mxu0 }
 0x101   :  { %v3439_v39 = vpop.f32.mrb[3].mxu0  ;;  %1035 = vmatpush1.bf16.msra.mxu0 %v3649_v35 }
 0x102   :  { %1036 = vmatprep.subr.bf16.mxu0 %v3654_v8  ;;  %v3685_v8 = vld [vmem:[%s4628_s2 + $0xf0] ss:$8 sps:$4 sm:$0xff]  }
 0x103   :  { %4705 = vst [vmem:[#allocation30_spill] sm:$0xff] %v3685_v8 }
 0x105   :  { %1037 = vmatpush1.bf16.msra.mxu0 %v3661_v2  ;;  %v4706_v2 = vlaneseq }
 0x106   :  { %v3441_v40 = vpop.f32.mrb[4].mxu0  ;;  %1038 = vmatprep.subr.bf16.mxu0 %v3667_v29 }
 0x107   :  { %v3443_v41 = vpop.f32.mrb[5].mxu0  ;;  %v3691_v29 = vshrl.u32 %v4706_v2, 7 }
 0x108   :  { %v3445_v42 = vpop.f32.mrb[6].mxu0 }
 0x109   :  { %v3447_v43 = vpop.f32.mrb[7].mxu0  ;;  %1039 = vmatpush1.bf16.msra.mxu0 %v3673_v9  ;;  %v3694_v35 = vsub.s32 0, %v3691_v29 }
 0x10a   :  { %1040 = vmatprep.subr.bf16.mxu0 %v3679_v14 }
 0x10b   :  { %4707 = vst [vmem:[#allocation31_spill] sm:$0xff] %v3694_v35 }
 0x10d   :  { %1041 = vmatpush1.bf16.msra.mxu0 %v3685_v8 }
 0x10e   :  { %v3449_v44 = vpop.f32.mrb[8].mxu0  ;;  %1166 = vmatprep.subr.bf16.mxu0 %v3500_v5 }
 0x10f   :  { %v3451_v45 = vpop.f32.mrb[9].mxu0 }
 0x110   :  { %v3453_v46 = vpop.f32.mrb[10].mxu0 }
 0x111   :  { %v3455_v47 = vpop.f32.mrb[11].mxu0 }
 0x116   :  { %v3457_v48 = vpop.f32.mrb[12].mxu0 }
 0x117   :  { %v3459_v49 = vpop.f32.mrb[13].mxu0 }
 0x118   :  { %v3461_v50 = vpop.f32.mrb[14].mxu0 }
 0x119   :  { %v3463_v51 = vpop.f32.mrb[15].mxu0 }
 0x11e   :  { %v3465_v52 = vpop.f32.mrb[16].mxu0 }
 0x11f   :  { %v3467_v53 = vpop.f32.mrb[17].mxu0 }
 0x120   :  { %v3469_v54 = vpop.f32.mrb[18].mxu0 }
 0x121   :  { %v3471_v55 = vpop.f32.mrb[19].mxu0 }
 0x126   :  { %v3473_v56 = vpop.f32.mrb[20].mxu0 }
 0x127   :  { %v3475_v57 = vpop.f32.mrb[21].mxu0 }
 0x128   :  { %v3477_v58 = vpop.f32.mrb[22].mxu0 }
 0x129   :  { %v3479_v59 = vpop.f32.mrb[23].mxu0 }
 0x12e   :  { %v3481_v60 = vpop.f32.mrb[24].mxu0 }
 0x12f   :  { %v3483_v61 = vpop.f32.mrb[25].mxu0 }
 0x130   :  { %v3485_v62 = vpop.f32.mrb[26].mxu0 }
 0x131   :  { %v3487_v63 = vpop.f32.mrb[27].mxu0 }
 0x136   :  { %v3489_v0 = vpop.f32.mrb[28].mxu0 }
 0x137   :  { %v3491_v1 = vpop.f32.mrb[29].mxu0 }
 0x138   :  { %v3493_v3 = vpop.f32.mrb[30].mxu0 }
 0x139   :  { %v3495_v4 = vpop.f32.mrb[31].mxu0 }
 0x1cd   :  { %v470_v34 = vpop.f32.mrb[4].mxu1 }
 0x1ce   :  { %v477_v33 = vmul.f32 0.125, %v470_v34  ;;  %v472_v9 = vpop.f32.mrb[5].mxu1 }
 0x1cf   :  { %v474_v32 = vpop.f32.mrb[6].mxu1  ;;  %v478_v28 = vmul.f32 0.125, %v472_v9 }
 0x1d0   :  { %v3697_v31 = vrot.slane %v477_v33, %v3694_v35  ;;  %v475_v30 = vpop.f32.mrb[7].mxu1 }
 0x1d2   :  { %v3701_v8 = vsub.f32 %v3433_v36, %v3697_v31  ;;  %v3705_v2 = vsub.f32 %v3437_v38, %v3697_v31  ;;  %v3709_v5 = vsub.f32 %v3441_v40, %v3697_v31  ;;  %v3713_v32 = vsub.f32 %v3445_v42, %v3697_v31 }
 0x1d3   :  { %v3717_v30 = vsub.f32 %v3449_v44, %v3697_v31  ;;  %v3721_v9 = vsub.f32 %v3453_v46, %v3697_v31  ;;  %v3725_v36 = vsub.f32 %v3457_v48, %v3697_v31  ;;  %v3729_v38 = vsub.f32 %v3461_v50, %v3697_v31 }
 0x1d4   :  { %v3733_v40 = vsub.f32 %v3465_v52, %v3697_v31  ;;  %v3737_v42 = vsub.f32 %v3469_v54, %v3697_v31  ;;  %v3741_v44 = vsub.f32 %v3473_v56, %v3697_v31  ;;  %v3745_v46 = vsub.f32 %v3477_v58, %v3697_v31 }
 0x1d5   :  { %v3749_v48 = vsub.f32 %v3481_v60, %v3697_v31  ;;  %v3753_v50 = vsub.f32 %v3485_v62, %v3697_v31  ;;  %v3757_v52 = vsub.f32 %v3489_v0, %v3697_v31  ;;  %v521_v54 = vmul.f32 0.0, %v3705_v2 }
 0x1d6   :  { %v523_v56 = vmul.f32 0.0, %v3709_v5  ;;  %v525_v33 = vmul.f32 0.0, %v3713_v32  ;;  %v486_v58 = vrot.slane %v478_v28, %v3694_v35  ;;  %v527_v60 = vmul.f32 0.0, %v3717_v30 }
 0x1d7   :  { %4708 = vst [vmem:[#allocation32_spill] sm:$0xff] %v3757_v52  ;;  %v553_v34 = vmul.f32 %v521_v54, %v3705_v2  ;;  %v551_v62 = vmul.f32 %v3701_v8, %v3701_v8  ;;  %v529_v14 = vmul.f32 0.0, %v3721_v9  ;;  %v531_v0 = vmul.f32 0.0, %v3725_v36 }
 0x1d8   :  { %v555_v27 = vmul.f32 %v523_v56, %v3709_v5  ;;  %v557_v26 = vmul.f32 %v525_v33, %v3713_v32  ;;  %v3772_v25 = vsub.f32 %v3435_v37, %v486_v58  ;;  %v3775_v28 = vsub.f32 %v3439_v39, %v486_v58 }
 0x1d9   :  { %v583_v21 = vadd.f32 %v553_v34, %v551_v62  ;;  %v3778_v54 = vsub.f32 %v3443_v41, %v486_v58  ;;  %v3781_v24 = vsub.f32 %v3447_v43, %v486_v58  ;;  %v3784_v23 = vsub.f32 %v3451_v45, %v486_v58 }
 0x1da   :  { %v3787_v56 = vsub.f32 %v3455_v47, %v486_v58  ;;  %v3790_v33 = vsub.f32 %v3459_v49, %v486_v58  ;;  %v3793_v34 = vsub.f32 %v3463_v51, %v486_v58  ;;  %v3796_v39 = vsub.f32 %v3467_v53, %v486_v58 }
 0x1db   :  { %v584_v37 = vadd.f32 %v583_v21, %v555_v27  ;;  %v3799_v41 = vsub.f32 %v3471_v55, %v486_v58  ;;  %v3802_v43 = vsub.f32 %v3475_v57, %v486_v58  ;;  %v3805_v45 = vsub.f32 %v3479_v59, %v486_v58 }
 0x1dc   :  { %v3808_v47 = vsub.f32 %v3483_v61, %v486_v58  ;;  %v3811_v21 = vsub.f32 %v3487_v63, %v486_v58  ;;  %v559_v49 = vmul.f32 %v527_v60, %v3717_v30  ;;  %v3815_v53 = vsub.f32 %v3491_v1, %v486_v58 }
 0x1dd   :  { %v585_v51 = vadd.f32 %v584_v37, %v557_v26  ;;  %v522_v55 = vmul.f32 0.0, %v3775_v28  ;;  %v533_v57 = vmul.f32 0.0, %v3729_v38  ;;  %v561_v27 = vmul.f32 %v529_v14, %v3721_v9 }
 0x1de   :  { %v535_v62 = vmul.f32 0.0, %v3733_v40  ;;  %v563_v61 = vmul.f32 %v531_v0, %v3725_v36  ;;  %v524_v63 = vmul.f32 0.0, %v3778_v54  ;;  %v537_v26 = vmul.f32 0.0, %v3737_v42 }
 0x1df   :  { %v586_v59 = vadd.f32 %v585_v51, %v559_v49  ;;  %v554_v60 = vmul.f32 %v522_v55, %v3775_v28  ;;  %v565_v1 = vmul.f32 %v533_v57, %v3729_v38  ;;  %v526_v20 = vmul.f32 0.0, %v3781_v24 }
 0x1e0   :  { %v552_v14 = vmul.f32 %v3772_v25, %v3772_v25  ;;  %v539_v49 = vmul.f32 0.0, %v3741_v44  ;;  %v567_v51 = vmul.f32 %v535_v62, %v3733_v40  ;;  %v541_v19 = vmul.f32 0.0, %v3745_v46 }
 0x1e1   :  { %v587_v22 = vadd.f32 %v586_v59, %v561_v27  ;;  %v528_v27 = vmul.f32 0.0, %v3784_v23  ;;  %v556_v59 = vmul.f32 %v524_v63, %v3778_v54  ;;  %v569_v57 = vmul.f32 %v537_v26, %v3737_v42 }
 0x1e2   :  { %v604_v55 = vadd.f32 %v554_v60, %v552_v14  ;;  %v530_v62 = vmul.f32 0.0, %v3787_v56  ;;  %v543_v63 = vmul.f32 0.0, %v3749_v48  ;;  %v571_v60 = vmul.f32 %v539_v49, %v3741_v44 }
 0x1e3   :  { %v588_v37 = vadd.f32 %v587_v22, %v563_v61  ;;  %v3837_v22 = vsub.f32 %v3493_v3, %v3697_v31  ;;  %v3840_v61 = vsub.f32 %v3495_v4, %v486_v58  ;;  %v532_v26 = vmul.f32 0.0, %v3790_v33 }
 0x1e4   :  { %v560_v17 = vmul.f32 %v528_v27, %v3784_v23  ;;  %v545_v31 = vmul.f32 0.0, %v3753_v50  ;;  %v573_v4 = vmul.f32 %v541_v19, %v3745_v46  ;;  %v575_v49 = vmul.f32 %v543_v63, %v3749_v48 }
 0x1e5   :  { %v589_v0 = vadd.f32 %v588_v37, %v565_v1  ;;  %4709 = vst [vmem:[#allocation33_spill] sm:$0xff] %v3837_v22  ;;  %v558_v1 = vmul.f32 %v526_v20, %v3781_v24  ;;  %v605_v37 = vadd.f32 %v604_v55, %v556_v59  ;;  %v562_v20 = vmul.f32 %v530_v62, %v3787_v56 }
 0x1e6   :  { %v547_v59 = vmul.f32 0.0, %v3757_v52  ;;  %v536_v55 = vmul.f32 0.0, %v3796_v39  ;;  %v564_v27 = vmul.f32 %v532_v26, %v3790_v33  ;;  %v538_v19 = vmul.f32 0.0, %v3799_v41 }
 0x1e7   :  { %v590_v18 = vadd.f32 %v589_v0, %v567_v51  ;;  %v606_v3 = vadd.f32 %v605_v37, %v558_v1  ;;  %v534_v51 = vmul.f32 0.0, %v3793_v34  ;;  %v577_v1 = vmul.f32 %v545_v31, %v3753_v50 }
 0x1e8   :  { %v579_v62 = vmul.f32 %v547_v59, %v3757_v52  ;;  %v540_v63 = vmul.f32 0.0, %v3802_v43  ;;  %v542_v26 = vmul.f32 0.0, %v3805_v45  ;;  %v570_v31 = vmul.f32 %v538_v19, %v3799_v41 }
 0x1e9   :  { %v591_v14 = vadd.f32 %v590_v18, %v569_v57  ;;  %v607_v0 = vadd.f32 %v606_v3, %v560_v17  ;;  %v549_v17 = vmul.f32 0.0, %v3837_v22 }
 0x1eb   :  { %v592_v58 = vadd.f32 %v591_v14, %v571_v60  ;;  %v608_v57 = vadd.f32 %v607_v0, %v562_v20  ;;  %v566_v60 = vmul.f32 %v534_v51, %v3793_v34  ;;  %v544_v51 = vmul.f32 0.0, %v3808_v47 }
 0x1ed   :  { %v593_v18 = vadd.f32 %v592_v58, %v573_v4  ;;  %v609_v14 = vadd.f32 %v608_v57, %v564_v27  ;;  %v568_v4 = vmul.f32 %v536_v55, %v3796_v39  ;;  %v546_v57 = vmul.f32 0.0, %v3811_v21 }
 0x1ef   :  { %v594_v37 = vadd.f32 %v593_v18, %v575_v49  ;;  %v610_v58 = vadd.f32 %v609_v14, %v566_v60  ;;  %v581_v49 = vmul.f32 %v549_v17, %v3837_v22  ;;  %v572_v18 = vmul.f32 %v540_v63, %v3802_v43 }
 0x1f0   :  { %v548_v60 = vmul.f32 0.0, %v3815_v53  ;;  %v576_v14 = vmul.f32 %v544_v51, %v3808_v47  ;;  %v578_v17 = vmul.f32 %v546_v57, %v3811_v21  ;;  %v550_v63 = vmul.f32 0.0, %v3840_v61 }
 0x1f1   :  { %v595_v3 = vadd.f32 %v594_v37, %v577_v1  ;;  %v611_v0 = vadd.f32 %v610_v58, %v568_v4  ;;  %v574_v1 = vmul.f32 %v542_v26, %v3805_v45 }
 0x1f2   :  { %v580_v58 = vmul.f32 %v548_v60, %v3815_v53  ;;  %v582_v26 = vmul.f32 %v550_v63, %v3840_v61  ;;  %v3226_v60 = vmov 1966171168  }
 0x1f3   :  { %v596_v20 = vadd.f32 %v595_v3, %v579_v62  ;;  %v612_v27 = vadd.f32 %v611_v0, %v570_v31 }
 0x1f5   :  { %v597_v59 = vadd.f32 %v596_v20, %v581_v49  ;;  %v613_v55 = vadd.f32 %v612_v27, %v572_v18 }
 0x1f7   :  { %v598_v37 = vrot.slane %v597_v59, 4  ;;  %v614_v19 = vadd.f32 %v613_v55, %v574_v1 }
 0x1f9   :  { %v599_v62 = vadd.f32 %v598_v37, %v597_v59  ;;  %v615_v3 = vadd.f32 %v614_v19, %v576_v14 }
 0x1fb   :  { %v600_v4 = vrot.slane %v599_v62, 2  ;;  %v616_v20 = vadd.f32 %v615_v3, %v578_v17 }
 0x1fd   :  { %v601_v31 = vadd.f32 %v600_v4, %v599_v62  ;;  %v617_v0 = vadd.f32 %v616_v20, %v580_v58  ;;  %v636_v62 = vunpack.c.l.s4 %v3226_v60 }
 0x1ff   :  { %v602_v49 = vrot.slane %v601_v31, 1  ;;  %v618_v18 = vadd.f32 %v617_v0, %v582_v26  ;;  %v637_v17 = vunpack.c.0.s8 %v636_v62  ;;  %v694_v0 = vld [vmem:[%s4630_s4] sm:$0x3] }
 0x201   :  { %v619_v27 = vrot.slane %v618_v18, 4  ;;  %v603_v22 = vadd.f32 %v602_v49, %v601_v31  ;;  %v3877_v4 = vsub.s32 %v637_v17, %v3691_v29  ;;  %v3884_v31 = vsub.s32 1, %v3691_v29 }
 0x202   :  { %v3891_v49 = vrot.slane %v694_v0, %v3694_v35 }
 0x203   :  { %v620_v51 = vadd.f32 %v619_v27, %v618_v18  ;;  %v625_v59 = vmul.f32 0.125, %v603_v22  ;;  %4710 = vst [vmem:[#allocation34_spill] sm:$0xff] %v3877_v4  ;;  %v627_v22 = vld [vmem:[%s4629_s3] sm:$0x3]  ;;  %4711 = vst [vmem:[#allocation35_spill] sm:$0xff] %v3884_v31  ;;  %v3894_v18 = vrot.slane %v694_v0, %v3884_v31 }
 0x205   :  { %v621_v1 = vrot.slane %v620_v51, 2  ;;  %v628_v37 = vadd.f32 1e-05, %v625_v59 }
 0x207   :  { %v622_v55 = vadd.f32 %v621_v1, %v620_v51  ;;  %3148 = vrsqrt.f32 %v628_v37 }
 0x209   :  { %v623_v57 = vrot.slane %v622_v55, 1 }
 0x20b   :  { %v624_v14 = vadd.f32 %v623_v57, %v622_v55 }
 0x20d   :  { %v626_v19 = vmul.f32 0.125, %v624_v14 }
 0x20f   :  { %v629_v52 = vadd.f32 1e-05, %v626_v19 }
 0x211   :  { %3150 = vrsqrt.f32 %v629_v52  ;;  %v3149_v3 = vpop.eup %3148 }
 0x21b   :  { %v3151_v63 = vpop.eup %3150 }
 0x21c   :  { %v634_v58 = vcombine.low %v3149_v3, %v3151_v63 }
 0x21e   :  { %v641_v20 = vrot.slane %v634_v58, %v3877_v4 }
 0x220   :  { %v648_v52 = vrot.slane %v641_v20, %v3877_v4 }
 0x222   :  { %v650_v26 = vmul.f32 %v648_v52, %v627_v22 }
 0x224   :  { %v3897_v27 = vrot.slane %v650_v26, %v3694_v35  ;;  %v3900_v51 = vrot.slane %v650_v26, %v3884_v31 }
 0x226   :  { %v693_v29 = vmul.f32 %v3900_v51, %v3840_v61  ;;  %v663_v1 = vmul.f32 %v3900_v51, %v3772_v25  ;;  %v665_v59 = vmul.f32 %v3900_v51, %v3775_v28  ;;  %v662_v55 = vmul.f32 %v3897_v27, %v3701_v8 }
 0x227   :  { %v664_v57 = vmul.f32 %v3897_v27, %v3705_v2  ;;  %v667_v37 = vmul.f32 %v3900_v51, %v3778_v54  ;;  %v669_v14 = vmul.f32 %v3900_v51, %v3781_v24  ;;  %v666_v61 = vmul.f32 %v3897_v27, %v3709_v5 }
 0x228   :  { %v3919_v25 = vadd.f32 %v3894_v18, %v693_v29  ;;  %v707_v28 = vadd.f32 %v3894_v18, %v663_v1  ;;  %v709_v19 = vadd.f32 %v3894_v18, %v665_v59  ;;  %v706_v8 = vadd.f32 %v3891_v49, %v662_v55 }
 0x229   :  { %v708_v2 = vadd.f32 %v3891_v49, %v664_v57  ;;  %v711_v60 = vadd.f32 %v3894_v18, %v667_v37  ;;  %v713_v54 = vadd.f32 %v3894_v18, %v669_v14  ;;  %v668_v24 = vmul.f32 %v3897_v27, %v3713_v32 }
 0x22a   :  { %v739_v62 = vmul.f32 0.01, %v707_v28  ;;  %v741_v5 = vmul.f32 0.01, %v709_v19  ;;  %v738_v17 = vmul.f32 0.01, %v706_v8  ;;  %v710_v3 = vadd.f32 %v3891_v49, %v666_v61 }
 0x22b   :  { %v740_v63 = vmul.f32 0.01, %v708_v2  ;;  %v743_v58 = vmul.f32 0.01, %v711_v60  ;;  %v745_v20 = vmul.f32 0.01, %v713_v54  ;;  %v712_v22 = vadd.f32 %v3891_v49, %v668_v24 }
 0x22c   :  { %v771_v52 = vmax.f32 %v707_v28, %v739_v62  ;;  %v773_v0 = vmax.f32 %v709_v19, %v741_v5  ;;  %v770_v26 = vmax.f32 %v706_v8, %v738_v17  ;;  %v742_v29 = vmul.f32 0.01, %v710_v3 }
 0x22d   :  { %v772_v1 = vmax.f32 %v708_v2, %v740_v63  ;;  %v775_v59 = vmax.f32 %v711_v60, %v743_v58  ;;  %v777_v55 = vmax.f32 %v713_v54, %v745_v20  ;;  %v744_v57 = vmul.f32 0.01, %v712_v22 }
 0x22e   :  { %v803_v37 = vpack.c.bf16 %v773_v0, %v771_v52  ;;  %v774_v32 = vmax.f32 %v710_v3, %v742_v29  ;;  %v671_v14 = vmul.f32 %v3900_v51, %v3784_v23  ;;  %v673_v61 = vmul.f32 %v3900_v51, %v3787_v56 }
 0x22f   :  { %v802_v31 = vpack.c.bf16 %v772_v1, %v770_v26  ;;  %v805_v4 = vpack.c.bf16 %v777_v55, %v775_v59  ;;  %v776_v35 = vmax.f32 %v712_v22, %v744_v57  ;;  %v670_v28 = vmul.f32 %v3897_v27, %v3717_v30 }
 0x230   :  { %1042 = vmatprep.mubr.bf16.mxu0 %v803_v37  ;;  %1123 = vmatprep.subr.bf16.mxu1 %v803_v37  ;;  %v715_v19 = vadd.f32 %v3894_v18, %v671_v14  ;;  %v717_v8 = vadd.f32 %v3894_v18, %v673_v61  ;;  %v672_v2 = vmul.f32 %v3897_v27, %v3721_v9  ;;  %v3945_v54 = vmul.f32 0.01, %v3919_v25 }
 0x231   :  { %1043 = vmatmul.mubr.bf16.vlgmr.msra.gmra.mrb[32].mxu0 %v802_v31  ;;  %1124 = vmatpush1.bf16.msra.mxu1 %v802_v31  ;;  %v804_v23 = vpack.c.bf16 %v776_v35, %v774_v32  ;;  %v714_v56 = vadd.f32 %v3891_v49, %v670_v28  ;;  %v675_v60 = vmul.f32 %v3900_v51, %v3790_v33 }
 0x232   :  { %1052 = vmatprep.mubr.bf16.mxu0 %v805_v4  ;;  %1125 = vmatprep.subr.bf16.mxu1 %v805_v4  ;;  %v747_v30 = vmul.f32 0.01, %v715_v19  ;;  %v749_v24 = vmul.f32 0.01, %v717_v8  ;;  %v716_v62 = vadd.f32 %v3891_v49, %v672_v2  ;;  %v677_v9 = vmul.f32 %v3900_v51, %v3793_v34 }
 0x233   :  { %v746_v5 = vmul.f32 0.01, %v714_v56  ;;  %v719_v35 = vadd.f32 %v3894_v18, %v675_v60  ;;  %v674_v31 = vmul.f32 %v3897_v27, %v3725_v36  ;;  %v676_v33 = vmul.f32 %v3897_v27, %v3729_v38  ;;  %1167 = vmatpush1.bf16.msra.mxu0 %v3505_v6 }
 0x234   :  { %v779_v17 = vmax.f32 %v715_v19, %v747_v30  ;;  %v781_v4 = vmax.f32 %v717_v8, %v749_v24  ;;  %v748_v3 = vmul.f32 0.01, %v716_v62  ;;  %v721_v63 = vadd.f32 %v3894_v18, %v677_v9  ;;  %1168 = vmatprep.subr.bf16.mxu0 %v3512_v7 }
 0x235   :  { %1126 = vmatpush1.bf16.msra.mxu1 %v804_v23  ;;  %v778_v34 = vmax.f32 %v714_v56, %v746_v5  ;;  %v751_v58 = vmul.f32 0.01, %v719_v35  ;;  %v718_v20 = vadd.f32 %v3891_v49, %v674_v31  ;;  %v720_v22 = vadd.f32 %v3891_v49, %v676_v33 }
 0x236   :  { %v807_v36 = vpack.c.bf16 %v781_v4, %v779_v17  ;;  %v780_v52 = vmax.f32 %v716_v62, %v748_v3  ;;  %v753_v0 = vmul.f32 0.01, %v721_v63  ;;  %v679_v6 = vmul.f32 %v3900_v51, %v3796_v39 }
 0x237   :  { %v783_v38 = vmax.f32 %v719_v35, %v751_v58  ;;  %v750_v26 = vmul.f32 0.01, %v718_v20  ;;  %v752_v29 = vmul.f32 0.01, %v720_v22  ;;  %v681_v1 = vmul.f32 %v3900_v51, %v3799_v41  ;;  %1169 = vmatpush1.bf16.msra.mxu0 %v3517_v10 }
 0x238   :  { %1127 = vmatprep.subr.bf16.mxu1 %v807_v36  ;;  %v806_v7 = vpack.c.bf16 %v780_v52, %v778_v34  ;;  %v785_v59 = vmax.f32 %v721_v63, %v753_v0  ;;  %v723_v55 = vadd.f32 %v3894_v18, %v679_v6  ;;  %v678_v57 = vmul.f32 %v3897_v27, %v3733_v40 }
 0x239   :  { %1053 = vmatmul.mubr.bf16.gmra.mrb[36].mxu0 %v804_v23  ;;  %v782_v37 = vmax.f32 %v718_v20, %v750_v26  ;;  %v784_v32 = vmax.f32 %v720_v22, %v752_v29  ;;  %v725_v39 = vadd.f32 %v3894_v18, %v681_v1  ;;  %v680_v14 = vmul.f32 %v3897_v27, %v3737_v42 }
 0x23a   :  { %1128 = vmatpush1.bf16.msra.mxu1 %v806_v7  ;;  %1062 = vmatprep.mubr.bf16.mxu0 %v807_v36  ;;  %v809_v41 = vpack.c.bf16 %v785_v59, %v783_v38  ;;  %v755_v10 = vmul.f32 0.01, %v723_v55  ;;  %v722_v61 = vadd.f32 %v3891_v49, %v678_v57  ;;  %v683_v28 = vmul.f32 %v3900_v51, %v3802_v43  ;;  %v4712_v38 = vld [vmem:[#allocation8_spill] sm:$0xff]  ;;  %v4715_v57 = vld [vmem:[#allocation33_spill] sm:$0xff] }
 0x23b   :  { %v3974_v19 = vpack.c.bf16 %v784_v32, %v782_v37  ;;  %v757_v40 = vmul.f32 0.01, %v725_v39  ;;  %v724_v8 = vadd.f32 %v3891_v49, %v680_v14  ;;  %v685_v2 = vmul.f32 %v3900_v51, %v3805_v45  ;;  %1170 = vmatprep.subr.bf16.mxu0 %v3524_v11 }
 0x23c   :  { %1129 = vmatprep.subr.bf16.mxu1 %v809_v41  ;;  %v787_v42 = vmax.f32 %v723_v55, %v755_v10  ;;  %v754_v23 = vmul.f32 0.01, %v722_v61  ;;  %v727_v56 = vadd.f32 %v3894_v18, %v683_v28  ;;  %v682_v60 = vmul.f32 %v3897_v27, %v3741_v44  ;;  %1171 = vmatpush1.bf16.msra.mxu0 %v3529_v12  ;;  %v4716_v10 = vld [vmem:[#allocation10_spill] sm:$0xff] }
 0x23d   :  { %v789_v43 = vmax.f32 %v725_v39, %v757_v40  ;;  %v756_v30 = vmul.f32 0.01, %v724_v8  ;;  %v729_v24 = vadd.f32 %v3894_v18, %v685_v2  ;;  %v684_v62 = vmul.f32 %v3897_v27, %v3745_v46  ;;  %1172 = vmatprep.subr.bf16.mxu0 %v3536_v13  ;;  %v4717_v40 = vld [vmem:[#allocation11_spill] sm:$0xff] }
 0x23e   :  { %1130 = vmatpush1.bf16.msra.mxu1 %v3974_v19  ;;  %v786_v11 = vmax.f32 %v722_v61, %v754_v23  ;;  %v759_v45 = vmul.f32 0.01, %v727_v56  ;;  %v726_v9 = vadd.f32 %v3891_v49, %v682_v60  ;;  %v687_v44 = vmul.f32 %v3900_v51, %v3808_v47 }
 0x23f   :  { %v811_v5 = vpack.c.bf16 %v789_v43, %v787_v42  ;;  %v788_v12 = vmax.f32 %v724_v8, %v756_v30  ;;  %v761_v35 = vmul.f32 0.01, %v729_v24  ;;  %v728_v31 = vadd.f32 %v3891_v49, %v684_v62  ;;  %v4718_v42 = vld [vmem:[#allocation12_spill] sm:$0xff]  ;;  %v4726_v62 = vld [vmem:[#allocation18_spill] sm:$0xff] }
 0x240   :  { %v791_v33 = vmax.f32 %v727_v56, %v759_v45  ;;  %v758_v17 = vmul.f32 0.01, %v726_v9  ;;  %v689_v46 = vmul.f32 %v3900_v51, %v3811_v21  ;;  %v731_v13 = vadd.f32 %v3894_v18, %v687_v44  ;;  %1173 = vmatpush1.bf16.msra.mxu0 %v3541_v15  ;;  %v4721_v56 = vld [vmem:[#allocation15_spill] sm:$0xff]  ;;  %v4724_v30 = vld [vmem:[#allocation16_spill] sm:$0xff]  ;;  %v4730_v44 = vld [vmem:[#allocation22_spill] sm:$0xff] }
 0x241   :  { %1131 = vmatprep.subr.bf16.mxu1 %v811_v5  ;;  %1063 = vmatmul.mubr.bf16.gmra.mrb[40].mxu0 %v806_v7  ;;  %v810_v4 = vpack.c.bf16 %v788_v12, %v786_v11  ;;  %v793_v3 = vmax.f32 %v729_v24, %v761_v35  ;;  %v760_v63 = vmul.f32 0.01, %v728_v31  ;;  %v686_v47 = vmul.f32 %v3897_v27, %v3749_v48  ;;  %v4714_v7 = vld [vmem:[#allocation9_spill] sm:$0xff]  ;;  %v4727_v11 = vld [vmem:[#allocation19_spill] sm:$0xff]  ;;  %v4728_v45 = vld [vmem:[#allocation20_spill] sm:$0xff] }
 0x242   :  { %1072 = vmatprep.mubr.bf16.mxu0 %v809_v41  ;;  %v790_v34 = vmax.f32 %v726_v9, %v758_v17  ;;  %v733_v58 = vadd.f32 %v3894_v18, %v689_v46  ;;  %v763_v20 = vmul.f32 0.01, %v731_v13  ;;  %v688_v21 = vmul.f32 %v3897_v27, %v3753_v50  ;;  %1174 = vmatprep.subr.bf16.mxu0 %v3548_v16  ;;  %v4713_v16 = vld [vmem:[#allocation32_spill] sm:$0xff]  ;;  %v4725_v24 = vld [vmem:[#allocation17_spill] sm:$0xff] }
 0x243   :  { %1132 = vmatpush1.bf16.msra.mxu1 %v810_v4  ;;  %v813_v15 = vpack.c.bf16 %v793_v3, %v791_v33  ;;  %v792_v22 = vmax.f32 %v728_v31, %v760_v63  ;;  %v730_v36 = vadd.f32 %v3891_v49, %v686_v47  ;;  %v691_v52 = vmul.f32 %v3900_v51, %v3815_v53  ;;  %v4729_v9 = vld [vmem:[#allocation21_spill] sm:$0xff]  ;;  %v4732_v12 = vld [vmem:[#allocation24_spill] sm:$0xff]  ;;  %v4734_v31 = vld [vmem:[#allocation26_spill] sm:$0xff] }
 0x244   :  { %v765_v0 = vmul.f32 0.01, %v733_v58  ;;  %v795_v48 = vmax.f32 %v731_v13, %v763_v20  ;;  %v732_v6 = vadd.f32 %v3891_v49, %v688_v21  ;;  %1175 = vmatpush1.bf16.msra.mxu0 %v4712_v38  ;;  %v690_v1 = vmul.f32 %v3897_v27, %v4713_v16  ;;  %v4733_v35 = vld [vmem:[#allocation25_spill] sm:$0xff]  ;;  %v4735_v33 = vld [vmem:[#allocation27_spill] sm:$0xff]  ;;  %v4736_v17 = vld [vmem:[#allocation28_spill] sm:$0xff] }
 0x245   :  { %1133 = vmatprep.subr.bf16.mxu1 %v813_v15  ;;  %v812_v26 = vpack.c.bf16 %v792_v22, %v790_v34  ;;  %v762_v29 = vmul.f32 0.01, %v730_v36  ;;  %v735_v50 = vadd.f32 %v3894_v18, %v691_v52  ;;  %1176 = vmatprep.subr.bf16.mxu0 %v4714_v7  ;;  %v692_v53 = vmul.f32 %v3897_v27, %v4715_v57  ;;  %v4737_v46 = vld [vmem:[#allocation29_spill] sm:$0xff]  ;;  %v4738_v13 = vld [vmem:[#allocation30_spill] sm:$0xff] }
 0x246   :  { %v797_v59 = vmax.f32 %v733_v58, %v765_v0  ;;  %v764_v55 = vmul.f32 0.01, %v732_v6  ;;  %v801_v32 = vmax.f32 %v3919_v25, %v3945_v54  ;;  %v734_v39 = vadd.f32 %v3891_v49, %v690_v1 }
 0x247   :  { %1134 = vmatpush1.bf16.msra.mxu1 %v812_v26  ;;  %v794_v51 = vmax.f32 %v730_v36, %v762_v29  ;;  %v767_v37 = vmul.f32 0.01, %v735_v50  ;;  %v736_v41 = vadd.f32 %v3891_v49, %v692_v53  ;;  %v4719_v49 = vld [vmem:[#allocation13_spill] sm:$0xff]  ;;  %v4722_v60 = vmov 1.0|1.0  }
 0x248   :  { %v815_v14 = vpack.c.bf16 %v797_v59, %v795_v48  ;;  %v796_v18 = vmax.f32 %v732_v6, %v764_v55  ;;  %1177 = vmatpush1.bf16.msra.mxu0 %v4716_v10  ;;  %v766_v28 = vmul.f32 0.01, %v734_v39 }
 0x249   :  { %1073 = vmatmul.mubr.bf16.gmra.mrb[44].mxu0 %v3974_v19  ;;  %v799_v61 = vmax.f32 %v735_v50, %v767_v37  ;;  %1178 = vmatprep.subr.bf16.mxu0 %v4717_v40  ;;  %v768_v8 = vmul.f32 0.01, %v736_v41  ;;  %v4720_v19 = vld [vmem:[#allocation14_spill] sm:$0xff] }
 0x24a   :  { %1135 = vmatprep.subr.bf16.mxu1 %v815_v14  ;;  %v814_v27 = vpack.c.bf16 %v796_v18, %v794_v51  ;;  %1082 = vmatprep.mubr.bf16.mxu0 %v811_v5  ;;  %v798_v25 = vmax.f32 %v734_v39, %v766_v28  ;;  %v4731_v5 = vld [vmem:[#allocation23_spill] sm:$0xff] }
 0x24b   :  { %v817_v2 = vpack.c.bf16 %v801_v32, %v799_v61  ;;  %v800_v54 = vmax.f32 %v736_v41, %v768_v8 }
 0x24c   :  { %1136 = vmatpush1.bf16.msra.mxu1 %v814_v27  ;;  %1179 = vmatpush1.bf16.msra.mxu0 %v4718_v42 }
 0x24d   :  { %1137 = vmatprep.subr.bf16.mxu1 %v817_v2  ;;  %1180 = vmatprep.subr.bf16.mxu0 %v4719_v49  ;;  %v816_v23 = vpack.c.bf16 %v800_v54, %v798_v25 }
 0x250   :  { %1138 = vmatpush1.bf16.msra.mxu1 %v816_v23  ;;  %1181 = vmatpush1.bf16.msra.mxu0 %v4720_v19 }
 0x251   :  { %1083 = vmatmul.mubr.bf16.gmra.mrb[48].mxu0 %v810_v4  ;;  %1182 = vmatprep.subr.bf16.mxu0 %v4721_v56  ;;  %v4739_v4 = vmov 0.0  }
 0x252   :  { %1092 = vmatprep.mubr.bf16.mxu0 %v813_v15 }
 0x253   :  { %2745 = vmatmul.mubr.msk.bf16.vlgmr.msra.gmra.mrb[8].mxu1 %vm3386_vm2, %v4722_v60 }
 0x254   :  { %1183 = vmatpush1.bf16.msra.mxu0 %v4724_v30 }
 0x255   :  { %1184 = vmatprep.subr.bf16.mxu0 %v4725_v24 }
 0x258   :  { %1185 = vmatpush1.bf16.msra.mxu0 %v4726_v62 }
 0x259   :  { %1093 = vmatmul.mubr.bf16.gmra.mrb[52].mxu0 %v812_v26  ;;  %1186 = vmatprep.subr.bf16.mxu0 %v4727_v11 }
 0x25a   :  { %1102 = vmatprep.mubr.bf16.mxu0 %v815_v14 }
 0x25c   :  { %1187 = vmatpush1.bf16.msra.mxu0 %v4728_v45 }
 0x25d   :  { %1188 = vmatprep.subr.bf16.mxu0 %v4729_v9 }
 0x260   :  { %1189 = vmatpush1.bf16.msra.mxu0 %v4730_v44 }
 0x261   :  { %1103 = vmatmul.mubr.bf16.gmra.mrb[56].mxu0 %v814_v27  ;;  %1190 = vmatprep.subr.bf16.mxu0 %v4731_v5 }
 0x262   :  { %1112 = vmatprep.mubr.bf16.mxu0 %v817_v2 }
 0x264   :  { %1191 = vmatpush1.bf16.msra.mxu0 %v4732_v12 }
 0x265   :  { %1192 = vmatprep.subr.bf16.mxu0 %v4733_v35 }
 0x268   :  { %1193 = vmatpush1.bf16.msra.mxu0 %v4734_v31 }
 0x269   :  { %1113 = vmatmul.mubr.bf16.gmra.mrb[60].mxu0 %v816_v23  ;;  %1194 = vmatprep.subr.bf16.mxu0 %v4735_v33  ;;  %v4740_v23 = vld [vmem:[#allocation31_spill] sm:$0xff] }
 0x26c   :  { %1195 = vmatpush1.bf16.msra.mxu0 %v4736_v17 }
 0x26d   :  { %1196 = vmatprep.subr.bf16.mxu0 %v4737_v46 }
 0x270   :  { %1197 = vmatpush1.bf16.msra.mxu0 %v4738_v13 }
 0x271   :  { %2900 = vmatprep.subr.bf16.mxu0 %v4739_v4 }
 0x304   :  { %v1044_v3 = vpop.f32.mrb[32].mxu0 }
 0x305   :  { %v1046_v63 = vpop.f32.mrb[33].mxu0 }
 0x306   :  { %v1048_v47 = vpop.f32.mrb[34].mxu0 }
 0x307   :  { %v1050_v34 = vpop.f32.mrb[35].mxu0 }
 0x30c   :  { %v1054_v58 = vpop.f32.mrb[36].mxu0 }
 0x30d   :  { %v1056_v20 = vpop.f32.mrb[37].mxu0 }
 0x30e   :  { %v1058_v21 = vpop.f32.mrb[38].mxu0 }
 0x30f   :  { %v1060_v15 = vpop.f32.mrb[39].mxu0 }
 0x314   :  { %v1064_v22 = vpop.f32.mrb[40].mxu0 }
 0x315   :  { %v1066_v36 = vpop.f32.mrb[41].mxu0 }
 0x316   :  { %v1068_v52 = vpop.f32.mrb[42].mxu0 }
 0x317   :  { %v1070_v0 = vpop.f32.mrb[43].mxu0 }
 0x31c   :  { %v1074_v48 = vpop.f32.mrb[44].mxu0 }
 0x31d   :  { %v1076_v6 = vpop.f32.mrb[45].mxu0 }
 0x31e   :  { %v1078_v38 = vpop.f32.mrb[46].mxu0 }
 0x31f   :  { %v1080_v26 = vpop.f32.mrb[47].mxu0 }
 0x324   :  { %v1084_v29 = vpop.f32.mrb[48].mxu0 }
 0x325   :  { %v1086_v50 = vpop.f32.mrb[49].mxu0 }
 0x326   :  { %v1157_v16 = vpop.f32.mrb[8].mxu1  ;;  %v1088_v1 = vpop.f32.mrb[50].mxu0 }
 0x327   :  { %v1159_v7 = vpop.f32.mrb[9].mxu1  ;;  %v1090_v59 = vpop.f32.mrb[51].mxu0  ;;  %v1164_v53 = vpack.c.bf16 %v1157_v16, %v1157_v16 }
 0x328   :  { %v1165_v55 = vpack.c.bf16 %v1159_v7, %v1159_v7  ;;  %v1161_v57 = vpop.f32.mrb[10].mxu1 }
 0x329   :  { %v1162_v51 = vpop.f32.mrb[11].mxu1 }
 0x32a   :  { %1198 = vmatprep.mubr.bf16.mxu0 %v1165_v55 }
 0x32b   :  { %1199 = vmatmul.mubr.bf16.vlgmr.msra.gmra.mrb[64].mxu0 %v1164_v53 }
 0x32c   :  { %v1094_v37 = vpop.f32.mrb[52].mxu0  ;;  %2908 = vmatprep.mubr.msk.bf16.mxu0 %vm3223_vm0, %v4739_v4 }
 0x32d   :  { %v1096_v32 = vpop.f32.mrb[53].mxu0 }
 0x32e   :  { %v1098_v39 = vpop.f32.mrb[54].mxu0 }
 0x32f   :  { %v1100_v14 = vpop.f32.mrb[55].mxu0 }
 0x334   :  { %v1104_v18 = vpop.f32.mrb[56].mxu0 }
 0x335   :  { %v1106_v41 = vpop.f32.mrb[57].mxu0 }
 0x336   :  { %v1108_v10 = vpop.f32.mrb[58].mxu0 }
 0x337   :  { %v1110_v61 = vpop.f32.mrb[59].mxu0 }
 0x33c   :  { %v1114_v28 = vpop.f32.mrb[60].mxu0 }
 0x33d   :  { %v1116_v40 = vpop.f32.mrb[61].mxu0 }
 0x33e   :  { %v1118_v27 = vpop.f32.mrb[62].mxu0 }
 0x33f   :  { %v1120_v8 = vpop.f32.mrb[63].mxu0 }
 0x3fe   :  { %v1200_v2 = vpop.f32.mrb[64].mxu0 }
 0x3ff   :  { %v1207_v25 = vmul.f32 0.125, %v1200_v2  ;;  %v1202_v54 = vpop.f32.mrb[65].mxu0 }
 0x400   :  { %v1208_v42 = vmul.f32 0.125, %v1202_v54  ;;  %v1204_v49 = vpop.f32.mrb[66].mxu0 }
 0x401   :  { %v1212_v19 = vrot.slane %v1207_v25, %v4740_v23  ;;  %v1205_v56 = vpop.f32.mrb[67].mxu0 }
 0x402   :  { %v1216_v60 = vrot.slane %v1208_v42, %v4740_v23 }
 0x403   :  { %v4048_v43 = vsub.f32 %v1044_v3, %v1212_v19  ;;  %v4050_v30 = vsub.f32 %v1048_v47, %v1212_v19  ;;  %v4052_v24 = vsub.f32 %v1054_v58, %v1212_v19  ;;  %v4054_v62 = vsub.f32 %v1058_v21, %v1212_v19 }
 0x404   :  { %v4056_v11 = vsub.f32 %v1046_v63, %v1216_v60  ;;  %v4058_v45 = vsub.f32 %v1050_v34, %v1216_v60  ;;  %v4060_v9 = vsub.f32 %v1056_v20, %v1216_v60  ;;  %v4062_v44 = vsub.f32 %v1060_v15, %v1216_v60 }
 0x405   :  { %v4064_v5 = vsub.f32 %v1064_v22, %v1212_v19  ;;  %v4066_v12 = vsub.f32 %v1066_v36, %v1216_v60  ;;  %v4068_v35 = vsub.f32 %v1068_v52, %v1212_v19  ;;  %v4070_v31 = vsub.f32 %v1070_v0, %v1216_v60 }
 0x406   :  { %v4072_v33 = vsub.f32 %v1074_v48, %v1212_v19  ;;  %v4074_v17 = vsub.f32 %v1076_v6, %v1216_v60  ;;  %v4076_v46 = vsub.f32 %v1078_v38, %v1212_v19  ;;  %v4078_v13 = vsub.f32 %v1080_v26, %v1216_v60 }
 0x407   :  { %v4080_v3 = vsub.f32 %v1084_v29, %v1212_v19  ;;  %v4082_v63 = vsub.f32 %v1086_v50, %v1216_v60  ;;  %v4084_v47 = vsub.f32 %v1088_v1, %v1212_v19  ;;  %v4086_v34 = vsub.f32 %v1090_v59, %v1216_v60 }
 0x408   :  { %v4088_v58 = vsub.f32 %v1094_v37, %v1212_v19  ;;  %v4090_v20 = vsub.f32 %v1096_v32, %v1216_v60  ;;  %v4092_v21 = vsub.f32 %v1098_v39, %v1212_v19  ;;  %v4094_v15 = vsub.f32 %v1100_v14, %v1216_v60 }
 0x409   :  { %v4096_v22 = vsub.f32 %v1104_v18, %v1212_v19  ;;  %v4098_v36 = vsub.f32 %v1106_v41, %v1216_v60  ;;  %v4100_v52 = vsub.f32 %v1108_v10, %v1212_v19  ;;  %v4102_v0 = vsub.f32 %v1110_v61, %v1216_v60 }
 0x40a   :  { %v4104_v48 = vsub.f32 %v1114_v28, %v1212_v19  ;;  %v4106_v6 = vsub.f32 %v1116_v40, %v1216_v60  ;;  %v4108_v38 = vsub.f32 %v1118_v27, %v1212_v19  ;;  %v4110_v26 = vsub.f32 %v1120_v8, %v1216_v60 }
 0x40b   :  { %v1251_v29 = vmul.f32 0.0, %v4050_v30  ;;  %v1252_v50 = vmul.f32 0.0, %v4058_v45  ;;  %v1253_v16 = vmul.f32 0.0, %v4052_v24  ;;  %v1254_v1 = vmul.f32 0.0, %v4060_v9 }
 0x40c   :  { %v1255_v55 = vmul.f32 0.0, %v4054_v62  ;;  %v1256_v57 = vmul.f32 0.0, %v4062_v44  ;;  %v1281_v53 = vmul.f32 %v4048_v43, %v4048_v43  ;;  %v1282_v51 = vmul.f32 %v4056_v11, %v4056_v11 }
 0x40d   :  { %v1283_v7 = vmul.f32 %v1251_v29, %v4050_v30  ;;  %v1284_v59 = vmul.f32 %v1252_v50, %v4058_v45  ;;  %v1257_v37 = vmul.f32 0.0, %v4064_v5  ;;  %v1258_v32 = vmul.f32 0.0, %v4066_v12 }
 0x40e   :  { %v1285_v39 = vmul.f32 %v1253_v16, %v4052_v24  ;;  %v1286_v14 = vmul.f32 %v1254_v1, %v4060_v9  ;;  %v1259_v10 = vmul.f32 0.0, %v4068_v35  ;;  %v1260_v61 = vmul.f32 0.0, %v4070_v31 }
 0x40f   :  { %v1313_v18 = vadd.f32 %v1283_v7, %v1281_v53  ;;  %v1334_v41 = vadd.f32 %v1284_v59, %v1282_v51  ;;  %v1287_v28 = vmul.f32 %v1255_v55, %v4054_v62  ;;  %v1288_v40 = vmul.f32 %v1256_v57, %v4062_v44 }
 0x410   :  { %v1261_v2 = vmul.f32 0.0, %v4072_v33  ;;  %v1262_v25 = vmul.f32 0.0, %v4074_v17  ;;  %v1289_v54 = vmul.f32 %v1257_v37, %v4064_v5  ;;  %v1290_v42 = vmul.f32 %v1258_v32, %v4066_v12 }
 0x411   :  { %v1314_v27 = vadd.f32 %v1313_v18, %v1285_v39  ;;  %v1335_v8 = vadd.f32 %v1334_v41, %v1286_v14  ;;  %v1263_v56 = vmul.f32 0.0, %v4076_v46  ;;  %v1264_v60 = vmul.f32 0.0, %v4078_v13 }
 0x412   :  { %v1291_v29 = vmul.f32 %v1259_v10, %v4068_v35  ;;  %v1292_v50 = vmul.f32 %v1260_v61, %v4070_v31  ;;  %v1265_v7 = vmul.f32 0.0, %v4080_v3  ;;  %v1266_v59 = vmul.f32 0.0, %v4082_v63 }
 0x413   :  { %v1315_v49 = vadd.f32 %v1314_v27, %v1287_v28  ;;  %v1336_v19 = vadd.f32 %v1335_v8, %v1288_v40  ;;  %v1293_v55 = vmul.f32 %v1261_v2, %v4072_v33  ;;  %v1294_v57 = vmul.f32 %v1262_v25, %v4074_v17 }
 0x414   :  { %v1267_v37 = vmul.f32 0.0, %v4084_v47  ;;  %v1268_v32 = vmul.f32 0.0, %v4086_v34  ;;  %v1295_v39 = vmul.f32 %v1263_v56, %v4076_v46  ;;  %v1296_v14 = vmul.f32 %v1264_v60, %v4078_v13 }
 0x415   :  { %v1316_v16 = vadd.f32 %v1315_v49, %v1289_v54  ;;  %v1337_v1 = vadd.f32 %v1336_v19, %v1290_v42  ;;  %v1269_v10 = vmul.f32 0.0, %v4088_v58  ;;  %v1270_v61 = vmul.f32 0.0, %v4090_v20 }
 0x416   :  { %v1297_v28 = vmul.f32 %v1265_v7, %v4080_v3  ;;  %v1298_v40 = vmul.f32 %v1266_v59, %v4082_v63  ;;  %v1271_v2 = vmul.f32 0.0, %v4092_v21  ;;  %v1272_v25 = vmul.f32 0.0, %v4094_v15 }
 0x417   :  { %v1317_v53 = vadd.f32 %v1316_v16, %v1291_v29  ;;  %v1338_v51 = vadd.f32 %v1337_v1, %v1292_v50  ;;  %v1299_v54 = vmul.f32 %v1267_v37, %v4084_v47  ;;  %v1300_v42 = vmul.f32 %v1268_v32, %v4086_v34 }
 0x418   :  { %v1273_v56 = vmul.f32 0.0, %v4096_v22  ;;  %v1274_v60 = vmul.f32 0.0, %v4098_v36  ;;  %v1301_v29 = vmul.f32 %v1269_v10, %v4088_v58  ;;  %v1302_v50 = vmul.f32 %v1270_v61, %v4090_v20 }
 0x419   :  { %v1318_v18 = vadd.f32 %v1317_v53, %v1293_v55  ;;  %v1339_v41 = vadd.f32 %v1338_v51, %v1294_v57  ;;  %v1275_v7 = vmul.f32 0.0, %v4100_v52  ;;  %v1276_v59 = vmul.f32 0.0, %v4102_v0 }
 0x41a   :  { %v1303_v55 = vmul.f32 %v1271_v2, %v4092_v21  ;;  %v1304_v57 = vmul.f32 %v1272_v25, %v4094_v15  ;;  %v1277_v37 = vmul.f32 0.0, %v4104_v48  ;;  %v1278_v32 = vmul.f32 0.0, %v4106_v6 }
 0x41b   :  { %v1319_v27 = vadd.f32 %v1318_v18, %v1295_v39  ;;  %v1340_v8 = vadd.f32 %v1339_v41, %v1296_v14  ;;  %v1305_v39 = vmul.f32 %v1273_v56, %v4096_v22  ;;  %v1306_v14 = vmul.f32 %v1274_v60, %v4098_v36 }
 0x41c   :  { %v1279_v10 = vmul.f32 0.0, %v4108_v38  ;;  %v1280_v61 = vmul.f32 0.0, %v4110_v26  ;;  %v1309_v2 = vmul.f32 %v1277_v37, %v4104_v48  ;;  %v1310_v25 = vmul.f32 %v1278_v32, %v4106_v6 }
 0x41d   :  { %v1320_v49 = vadd.f32 %v1319_v27, %v1297_v28  ;;  %v1341_v19 = vadd.f32 %v1340_v8, %v1298_v40  ;;  %v1307_v28 = vmul.f32 %v1275_v7, %v4100_v52  ;;  %v1308_v40 = vmul.f32 %v1276_v59, %v4102_v0 }
 0x41f   :  { %v1321_v16 = vadd.f32 %v1320_v49, %v1299_v54  ;;  %v1342_v1 = vadd.f32 %v1341_v19, %v1300_v42  ;;  %v1311_v49 = vmul.f32 %v1279_v10, %v4108_v38  ;;  %v1312_v19 = vmul.f32 %v1280_v61, %v4110_v26 }
 0x421   :  { %v1322_v53 = vadd.f32 %v1321_v16, %v1301_v29  ;;  %v1343_v51 = vadd.f32 %v1342_v1, %v1302_v50 }
 0x423   :  { %v1323_v18 = vadd.f32 %v1322_v53, %v1303_v55  ;;  %v1344_v41 = vadd.f32 %v1343_v51, %v1304_v57 }
 0x425   :  { %v1324_v27 = vadd.f32 %v1323_v18, %v1305_v39  ;;  %v1345_v8 = vadd.f32 %v1344_v41, %v1306_v14 }
 0x427   :  { %v1325_v54 = vadd.f32 %v1324_v27, %v1307_v28  ;;  %v1346_v42 = vadd.f32 %v1345_v8, %v1308_v40  ;;  %v4741_v8 = vld [vmem:[#allocation34_spill] sm:$0xff] }
 0x429   :  { %v1326_v56 = vadd.f32 %v1325_v54, %v1309_v2  ;;  %v1347_v60 = vadd.f32 %v1346_v42, %v1310_v25  ;;  %v2746_v25 = vld [vmem:[%s4629_s3 + $0x2] sm:$0x3] }
 0x42a   :  { %v2747_v42 = vld [vmem:[%s4630_s4 + $0x2] sm:$0x3] }
 0x42b   :  { %v1327_v29 = vadd.f32 %v1326_v56, %v1311_v49  ;;  %v1348_v50 = vadd.f32 %v1347_v60, %v1312_v19  ;;  %v4185_v19 = vrot.slane %v2747_v42, %v4740_v23  ;;  %v4742_v56 = vld [vmem:[#allocation35_spill] sm:$0xff] }
 0x42c   :  { %v4188_v60 = vrot.slane %v2747_v42, %v4742_v56 }
 0x42d   :  { %v1328_v16 = vrot.slane %v1327_v29, 4  ;;  %v1349_v1 = vrot.slane %v1348_v50, 4 }
 0x42f   :  { %v1329_v7 = vadd.f32 %v1328_v16, %v1327_v29  ;;  %v1350_v59 = vadd.f32 %v1349_v1, %v1348_v50 }
 0x431   :  { %v1330_v55 = vrot.slane %v1329_v7, 2  ;;  %v1351_v57 = vrot.slane %v1350_v59, 2 }
 0x433   :  { %v1331_v53 = vadd.f32 %v1330_v55, %v1329_v7  ;;  %v1352_v51 = vadd.f32 %v1351_v57, %v1350_v59 }
 0x435   :  { %v1332_v37 = vrot.slane %v1331_v53, 1  ;;  %v1353_v32 = vrot.slane %v1352_v51, 1 }
 0x437   :  { %v1333_v39 = vadd.f32 %v1332_v37, %v1331_v53  ;;  %v1354_v14 = vadd.f32 %v1353_v32, %v1352_v51 }
 0x439   :  { %v1355_v18 = vmul.f32 0.125, %v1333_v39  ;;  %v1356_v41 = vmul.f32 0.125, %v1354_v14 }
 0x43b   :  { %v1359_v10 = vadd.f32 1e-05, %v1355_v18  ;;  %v1360_v61 = vadd.f32 1e-05, %v1356_v41 }
 0x43d   :  { %3152 = vrsqrt.f32 %v1359_v10 }
 0x43e   :  { %3154 = vrsqrt.f32 %v1360_v61 }
 0x447   :  { %v3153_v28 = vpop.eup %3152 }
 0x448   :  { %v3155_v40 = vpop.eup %3154 }
 0x449   :  { %v1365_v27 = vcombine.low %v3153_v28, %v3155_v40 }
 0x44b   :  { %v1372_v2 = vrot.slane %v1365_v27, %v4741_v8 }
 0x44d   :  { %v1379_v54 = vrot.slane %v1372_v2, %v4741_v8 }
 0x44f   :  { %v1381_v49 = vmul.f32 %v2746_v25, %v1379_v54 }
 0x451   :  { %v4191_v29 = vrot.slane %v1381_v49, %v4740_v23  ;;  %v4194_v50 = vrot.slane %v1381_v49, %v4742_v56 }
 0x453   :  { %v1393_v16 = vmul.f32 %v4191_v29, %v4048_v43  ;;  %v1394_v1 = vmul.f32 %v4194_v50, %v4056_v11  ;;  %v1395_v7 = vmul.f32 %v4191_v29, %v4050_v30  ;;  %v1396_v59 = vmul.f32 %v4194_v50, %v4058_v45 }
 0x454   :  { %v1397_v55 = vmul.f32 %v4191_v29, %v4052_v24  ;;  %v1398_v57 = vmul.f32 %v4194_v50, %v4060_v9  ;;  %v1399_v53 = vmul.f32 %v4191_v29, %v4054_v62  ;;  %v1400_v9 = vmul.f32 %v4194_v50, %v4062_v44 }
 0x455   :  { %v1438_v43 = vadd.f32 %v4185_v19, %v1393_v16  ;;  %v1439_v51 = vadd.f32 %v4188_v60, %v1394_v1  ;;  %v1440_v11 = vadd.f32 %v4185_v19, %v1395_v7  ;;  %v1441_v30 = vadd.f32 %v4188_v60, %v1396_v59 }
 0x456   :  { %v1442_v37 = vadd.f32 %v4185_v19, %v1397_v55  ;;  %v1443_v45 = vadd.f32 %v4188_v60, %v1398_v57  ;;  %v1444_v41 = vadd.f32 %v4185_v19, %v1399_v53  ;;  %v1401_v28 = vmul.f32 %v4191_v29, %v4064_v5 }
 0x457   :  { %v1470_v32 = vmul.f32 0.01, %v1438_v43  ;;  %v1471_v24 = vmul.f32 0.01, %v1439_v51  ;;  %v1472_v39 = vmul.f32 0.01, %v1440_v11  ;;  %v1402_v40 = vmul.f32 %v4194_v50, %v4066_v12 }
 0x458   :  { %v1473_v14 = vmul.f32 0.01, %v1441_v30  ;;  %v1474_v10 = vmul.f32 0.01, %v1442_v37  ;;  %v1475_v61 = vmul.f32 0.01, %v1443_v45  ;;  %v1445_v25 = vadd.f32 %v4188_v60, %v1400_v9 }
 0x459   :  { %v1502_v62 = vmax.f32 %v1438_v43, %v1470_v32  ;;  %v1503_v18 = vmax.f32 %v1439_v51, %v1471_v24  ;;  %v1504_v8 = vmax.f32 %v1440_v11, %v1472_v39  ;;  %v1476_v44 = vmul.f32 0.01, %v1444_v41 }
 0x45a   :  { %v1505_v2 = vmax.f32 %v1441_v30, %v1473_v14  ;;  %v1506_v54 = vmax.f32 %v1442_v37, %v1474_v10  ;;  %v1507_v42 = vmax.f32 %v1443_v45, %v1475_v61  ;;  %v1446_v49 = vadd.f32 %v4185_v19, %v1401_v28 }
 0x45b   :  { %v2936_v27 = vpack.i.bf16 %v1502_v62, %v1503_v18  ;;  %v1447_v56 = vadd.f32 %v4188_v60, %v1402_v40  ;;  %v1477_v1 = vmul.f32 0.01, %v1445_v25  ;;  %v1403_v5 = vmul.f32 %v4191_v29, %v4068_v35 }
 0x45c   :  { %v2938_v16 = vpack.i.bf16 %v1504_v8, %v1505_v2  ;;  %v1404_v12 = vmul.f32 %v4194_v50, %v4070_v31  ;;  %v1508_v7 = vmax.f32 %v1444_v41, %v1476_v44  ;;  %v1478_v59 = vmul.f32 0.01, %v1446_v49 }
 0x45d   :  { %2937 = vxpose.xlu0.b32.start [1/16] %v2936_v27, 128  ;;  %v1479_v55 = vmul.f32 0.01, %v1447_v56  ;;  %v1405_v57 = vmul.f32 %v4191_v29, %v4072_v33  ;;  %v1406_v53 = vmul.f32 %v4194_v50, %v4074_v17  ;;  %v2940_v43 = vpack.i.bf16 %v1506_v54, %v1507_v42 }
 0x45e   :  { %v1509_v51 = vmax.f32 %v1445_v25, %v1477_v1  ;;  %v1448_v11 = vadd.f32 %v4185_v19, %v1403_v5  ;;  %v1449_v30 = vadd.f32 %v4188_v60, %v1404_v12  ;;  %v1407_v35 = vmul.f32 %v4191_v29, %v4076_v46 }
 0x45f   :  { %v1510_v31 = vmax.f32 %v1446_v49, %v1478_v59  ;;  %v1511_v37 = vmax.f32 %v1447_v56, %v1479_v55  ;;  %v1450_v45 = vadd.f32 %v4185_v19, %v1405_v57  ;;  %v1451_v32 = vadd.f32 %v4188_v60, %v1406_v53 }
 0x460   :  { %v2942_v33 = vpack.i.bf16 %v1508_v7, %v1509_v51  ;;  %v1480_v24 = vmul.f32 0.01, %v1448_v11  ;;  %v1481_v39 = vmul.f32 0.01, %v1449_v30  ;;  %v1408_v17 = vmul.f32 %v4194_v50, %v4078_v13 }
 0x461   :  { %2939 = vxpose.xlu0.b32.cont [2/16] %v2938_v16, 128  ;;  %v1409_v9 = vmul.f32 %v4191_v29, %v4080_v3  ;;  %v2944_v14 = vpack.i.bf16 %v1510_v31, %v1511_v37  ;;  %v1482_v62 = vmul.f32 0.01, %v1450_v45  ;;  %v1483_v18 = vmul.f32 0.01, %v1451_v32 }
 0x462   :  { %v1452_v46 = vadd.f32 %v4185_v19, %v1407_v35  ;;  %v1512_v41 = vmax.f32 %v1448_v11, %v1480_v24  ;;  %v1513_v10 = vmax.f32 %v1449_v30, %v1481_v39  ;;  %v1453_v61 = vadd.f32 %v4188_v60, %v1408_v17 }
 0x463   :  { %v1410_v28 = vmul.f32 %v4194_v50, %v4082_v63  ;;  %v1454_v40 = vadd.f32 %v4185_v19, %v1409_v9  ;;  %v1514_v13 = vmax.f32 %v1450_v45, %v1482_v62  ;;  %v1515_v27 = vmax.f32 %v1451_v32, %v1483_v18 }
 0x464   :  { %v1484_v8 = vmul.f32 0.01, %v1452_v46  ;;  %v1411_v3 = vmul.f32 %v4191_v29, %v4084_v47  ;;  %v2946_v2 = vpack.i.bf16 %v1512_v41, %v1513_v10  ;;  %v1485_v25 = vmul.f32 0.01, %v1453_v61 }
 0x465   :  { %2941 = vxpose.xlu0.b32.cont [3/16] %v2940_v43, 128  ;;  %v1455_v44 = vadd.f32 %v4188_v60, %v1410_v28  ;;  %v1412_v54 = vmul.f32 %v4194_v50, %v4086_v34  ;;  %v1486_v42 = vmul.f32 0.01, %v1454_v40  ;;  %v2948_v49 = vpack.i.bf16 %v1514_v13, %v1515_v27 }
 0x466   :  { %v1516_v63 = vmax.f32 %v1452_v46, %v1484_v8  ;;  %v1456_v56 = vadd.f32 %v4185_v19, %v1411_v3  ;;  %v1413_v16 = vmul.f32 %v4191_v29, %v4088_v58  ;;  %v1517_v1 = vmax.f32 %v1453_v61, %v1485_v25 }
 0x467   :  { %v1487_v5 = vmul.f32 0.01, %v1455_v44  ;;  %v1457_v47 = vadd.f32 %v4188_v60, %v1412_v54  ;;  %v1414_v12 = vmul.f32 %v4194_v50, %v4090_v20  ;;  %v1518_v7 = vmax.f32 %v1454_v40, %v1486_v42 }
 0x468   :  { %v1488_v59 = vmul.f32 0.01, %v1456_v56  ;;  %v1458_v34 = vadd.f32 %v4185_v19, %v1413_v16  ;;  %v1415_v55 = vmul.f32 %v4191_v29, %v4092_v21  ;;  %v1416_v57 = vmul.f32 %v4194_v50, %v4094_v15 }
 0x469   :  { %2943 = vxpose.xlu0.b32.cont [4/16] %v2942_v33, 128  ;;  %v2950_v53 = vpack.i.bf16 %v1516_v63, %v1517_v1  ;;  %v1519_v58 = vmax.f32 %v1455_v44, %v1487_v5  ;;  %v1489_v43 = vmul.f32 0.01, %v1457_v47  ;;  %v1459_v51 = vadd.f32 %v4188_v60, %v1414_v12 }
 0x46a   :  { %v1417_v20 = vmul.f32 %v4191_v29, %v4096_v22  ;;  %v1520_v11 = vmax.f32 %v1456_v56, %v1488_v59  ;;  %v1490_v30 = vmul.f32 0.01, %v1458_v34  ;;  %v1460_v35 = vadd.f32 %v4185_v19, %v1415_v55 }
 0x46b   :  { %v1461_v31 = vadd.f32 %v4188_v60, %v1416_v57  ;;  %v2952_v37 = vpack.i.bf16 %v1518_v7, %v1519_v58  ;;  %v1521_v21 = vmax.f32 %v1457_v47, %v1489_v43  ;;  %v1491_v45 = vmul.f32 0.01, %v1459_v51 }
 0x46c   :  { %v1418_v15 = vmul.f32 %v4194_v50, %v4098_v36  ;;  %v1462_v32 = vadd.f32 %v4185_v19, %v1417_v20  ;;  %v1522_v33 = vmax.f32 %v1458_v34, %v1490_v30  ;;  %v1492_v24 = vmul.f32 0.01, %v1460_v35 }
 0x46d   :  { %2945 = vxpose.xlu0.b32.cont [5/16] %v2944_v14, 128  ;;  %v1493_v39 = vmul.f32 0.01, %v1461_v31  ;;  %v1419_v22 = vmul.f32 %v4191_v29, %v4100_v52  ;;  %v2954_v17 = vpack.i.bf16 %v1520_v11, %v1521_v21  ;;  %v1523_v9 = vmax.f32 %v1459_v51, %v1491_v45 }
 0x46e   :  { %v1463_v14 = vadd.f32 %v4188_v60, %v1418_v15  ;;  %v1420_v62 = vmul.f32 %v4194_v50, %v4102_v0  ;;  %v1494_v18 = vmul.f32 0.01, %v1462_v32  ;;  %v1524_v46 = vmax.f32 %v1460_v35, %v1492_v24 }
 0x46f   :  { %v1525_v36 = vmax.f32 %v1461_v31, %v1493_v39  ;;  %v1464_v41 = vadd.f32 %v4185_v19, %v1419_v22  ;;  %v1421_v10 = vmul.f32 %v4191_v29, %v4104_v48  ;;  %v2956_v61 = vpack.i.bf16 %v1522_v33, %v1523_v9 }
 0x470   :  { %v1495_v28 = vmul.f32 0.01, %v1463_v14  ;;  %v1465_v52 = vadd.f32 %v4188_v60, %v1420_v62  ;;  %v1422_v40 = vmul.f32 %v4194_v50, %v4106_v6  ;;  %v1526_v13 = vmax.f32 %v1462_v32, %v1494_v18 }
 0x471   :  { %2947 = vxpose.xlu0.b32.cont [6/16] %v2946_v2, 128  ;;  %v2958_v27 = vpack.i.bf16 %v1524_v46, %v1525_v36  ;;  %v1496_v0 = vmul.f32 0.01, %v1464_v41  ;;  %v1466_v8 = vadd.f32 %v4185_v19, %v1421_v10  ;;  %v1423_v3 = vmul.f32 %v4191_v29, %v4108_v38 }
 0x472   :  { %v1527_v2 = vmax.f32 %v1463_v14, %v1495_v28  ;;  %v1497_v25 = vmul.f32 0.01, %v1465_v52  ;;  %v1467_v48 = vadd.f32 %v4188_v60, %v1422_v40  ;;  %v1424_v44 = vmul.f32 %v4194_v50, %v4110_v26 }
 0x473   :  { %v1528_v54 = vmax.f32 %v1464_v41, %v1496_v0  ;;  %v1498_v42 = vmul.f32 0.01, %v1466_v8  ;;  %v1468_v6 = vadd.f32 %v4185_v19, %v1423_v3  ;;  %v3132_v19 = vld [vmem:[%s4631_s5 + $0x4] ss:$8 sps:$4 sm:$0xff]   ;;  %v4743_v59 = vmov 0  }
 0x474   :  { %v1529_v63 = vmax.f32 %v1465_v52, %v1497_v25  ;;  %v1499_v56 = vmul.f32 0.01, %v1467_v48  ;;  %v1469_v16 = vadd.f32 %v4188_v60, %v1424_v44  ;;  %1694 = vmatprep.mubr.bf16.mxu1 %v3132_v19 }
 0x475   :  { %2949 = vxpose.xlu0.b32.cont [7/16] %v2948_v49, 128  ;;  %v2960_v49 = vpack.i.bf16 %v1526_v13, %v1527_v2  ;;  %v1530_v1 = vmax.f32 %v1466_v8, %v1498_v42  ;;  %v1500_v5 = vmul.f32 0.01, %v1468_v6 }
 0x476   :  { %v2962_v38 = vpack.i.bf16 %v1528_v54, %v1529_v63  ;;  %v1531_v29 = vmax.f32 %v1467_v48, %v1499_v56  ;;  %v1501_v47 = vmul.f32 0.01, %v1469_v16 }
 0x477   :  { %v1532_v7 = vmax.f32 %v1468_v6, %v1500_v5 }
 0x478   :  { %v2964_v12 = vpack.i.bf16 %v1530_v1, %v1531_v29  ;;  %v1533_v26 = vmax.f32 %v1469_v16, %v1501_v47 }
 0x479   :  { %2951 = vxpose.xlu0.b32.cont [8/16] %v2950_v53, 128 }
 0x47a   :  { %v2966_v50 = vpack.i.bf16 %v1532_v7, %v1533_v26 }
 0x47d   :  { %2953 = vxpose.xlu0.b32.cont [9/16] %v2952_v37, 128 }
 0x481   :  { %2955 = vxpose.xlu0.b32.cont [10/16] %v2954_v17, 128 }
 0x485   :  { %2957 = vxpose.xlu0.b32.cont [11/16] %v2956_v61, 128 }
 0x489   :  { %2959 = vxpose.xlu0.b32.cont [12/16] %v2958_v27, 128 }
 0x48d   :  { %2961 = vxpose.xlu0.b32.cont [13/16] %v2960_v49, 128 }
 0x491   :  { %2963 = vxpose.xlu0.b32.cont [14/16] %v2962_v38, 128 }
 0x495   :  { %2965 = vxpose.xlu0.b32.cont [15/16] %v2964_v12, 128 }
 0x499   :  { %2967 = vxpose.xlu0.b32.end [16/16] %v2966_v50, 128 }
 0x4c2   :  { %3049 = vset.pattern.permute.xlu0 %v4743_v59 }
 0x4dd   :  { %v2968_v60 = vpop.trf.xlu0 }
 0x4de   :  { %v2972_v34 = vunpack.i.h.bf16 %v2968_v60  ;;  %v2969_v55 = vunpack.i.l.bf16 %v2968_v60 }
 0x4e1   :  { %v2973_v57 = vpop.trf.xlu0 }
 0x4e2   :  { %v2977_v53 = vunpack.i.h.bf16 %v2973_v57  ;;  %v2974_v58 = vunpack.i.l.bf16 %v2973_v57  ;;  %v3133_v57 = vld [vmem:[%s4631_s5 + $0x14] ss:$8 sps:$4 sm:$0xff]  }
 0x4e4   :  { %v1606_v43 = vpack.c.bf16 %v2974_v58, %v2969_v55  ;;  %v1598_v51 = vpack.c.bf16 %v2977_v53, %v2972_v34  ;;  %v3130_v55 = vld [vmem:[%s4631_s5] ss:$8 sps:$4 sm:$0xff]   ;;  %v3135_v53 = vld [vmem:[%s4631_s5 + $0x10] ss:$8 sps:$4 sm:$0xff]   ;;  %v3136_v58 = vld [vmem:[%s4631_s5 + $0x24] ss:$8 sps:$4 sm:$0xff]  }
 0x4e5   :  { %v2978_v20 = vpop.trf.xlu0 }
 0x4e6   :  { %2805 = vmatprep.subr.bf16.mxu1 %v1606_v43  ;;  %v2982_v11 = vunpack.i.h.bf16 %v2978_v20  ;;  %v2979_v30 = vunpack.i.l.bf16 %v2978_v20  ;;  %v3138_v43 = vld [vmem:[%s4631_s5 + $0x20] ss:$8 sps:$4 sm:$0xff]   ;;  %v3141_v20 = vld [vmem:[%s4631_s5 + $0x30] ss:$8 sps:$4 sm:$0xff]  }
 0x4e7   :  { %2806 = vmatpush3.bf16.msra.mxu1 %v1598_v51  ;;  %v3139_v51 = vld [vmem:[%s4631_s5 + $0x34] ss:$8 sps:$4 sm:$0xff]  }
 0x4e9   :  { %v2983_v35 = vpop.trf.xlu0 }
 0x4ea   :  { %v2987_v31 = vunpack.i.h.bf16 %v2983_v35  ;;  %v2984_v37 = vunpack.i.l.bf16 %v2983_v35  ;;  %v4320_v35 = vsel %vm53_vm1, 1.0, %v4739_v4 }
 0x4ec   :  { %v1607_v21 = vpack.c.bf16 %v2984_v37, %v2979_v30  ;;  %v1599_v45 = vpack.c.bf16 %v2987_v31, %v2982_v11 }
 0x4ed   :  { %v2988_v15 = vpop.trf.xlu0 }
 0x4ee   :  { %2807 = vmatprep.subr.bf16.mxu1 %v1607_v21  ;;  %v2992_v32 = vunpack.i.h.bf16 %v2988_v15  ;;  %v2989_v33 = vunpack.i.l.bf16 %v2988_v15 }
 0x4ef   :  { %2808 = vmatpush3.bf16.msra.mxu1 %v1599_v45 }
 0x4f1   :  { %v2993_v24 = vpop.trf.xlu0 }
 0x4f2   :  { %v2997_v39 = vunpack.i.h.bf16 %v2993_v24  ;;  %v2994_v22 = vunpack.i.l.bf16 %v2993_v24 }
 0x4f4   :  { %v1608_v17 = vpack.c.bf16 %v2994_v22, %v2989_v33  ;;  %v1600_v9 = vpack.c.bf16 %v2997_v39, %v2992_v32 }
 0x4f5   :  { %v2998_v14 = vpop.trf.xlu0 }
 0x4f6   :  { %2809 = vmatprep.subr.bf16.mxu1 %v1608_v17  ;;  %v3002_v62 = vunpack.i.h.bf16 %v2998_v14  ;;  %v2999_v18 = vunpack.i.l.bf16 %v2998_v14 }
 0x4f7   :  { %2810 = vmatpush3.bf16.msra.mxu1 %v1600_v9 }
 0x4f9   :  { %v3003_v46 = vpop.trf.xlu0 }
 0x4fa   :  { %v3007_v36 = vunpack.i.h.bf16 %v3003_v46  ;;  %v3004_v41 = vunpack.i.l.bf16 %v3003_v46 }
 0x4fc   :  { %v1609_v10 = vpack.c.bf16 %v3004_v41, %v2999_v18  ;;  %v1601_v61 = vpack.c.bf16 %v3007_v36, %v3002_v62 }
 0x4fd   :  { %v3008_v28 = vpop.trf.xlu0 }
 0x4fe   :  { %2811 = vmatprep.subr.bf16.mxu1 %v1609_v10  ;;  %v3012_v52 = vunpack.i.h.bf16 %v3008_v28  ;;  %v3009_v40 = vunpack.i.l.bf16 %v3008_v28 }
 0x4ff   :  { %2812 = vmatpush3.bf16.msra.mxu1 %v1601_v61 }
 0x501   :  { %v3013_v13 = vpop.trf.xlu0 }
 0x502   :  { %v3017_v27 = vunpack.i.h.bf16 %v3013_v13  ;;  %v3014_v0 = vunpack.i.l.bf16 %v3013_v13 }
 0x504   :  { %v1610_v8 = vpack.c.bf16 %v3014_v0, %v3009_v40  ;;  %v1602_v3 = vpack.c.bf16 %v3017_v27, %v3012_v52 }
 0x505   :  { %v3018_v2 = vpop.trf.xlu0 }
 0x506   :  { %2813 = vmatprep.subr.bf16.mxu1 %v1610_v8  ;;  %v3022_v25 = vunpack.i.h.bf16 %v3018_v2  ;;  %v3019_v48 = vunpack.i.l.bf16 %v3018_v2 }
 0x507   :  { %2814 = vmatpush3.bf16.msra.mxu1 %v1602_v3 }
 0x509   :  { %v3023_v44 = vpop.trf.xlu0 }
 0x50a   :  { %v3027_v54 = vunpack.i.h.bf16 %v3023_v44  ;;  %v3024_v42 = vunpack.i.l.bf16 %v3023_v44 }
 0x50c   :  { %v1611_v6 = vpack.c.bf16 %v3024_v42, %v3019_v48  ;;  %v1603_v49 = vpack.c.bf16 %v3027_v54, %v3022_v25 }
 0x50d   :  { %v3028_v63 = vpop.trf.xlu0 }
 0x50e   :  { %2815 = vmatprep.subr.bf16.mxu1 %v1611_v6  ;;  %v3032_v56 = vunpack.i.h.bf16 %v3028_v63  ;;  %v3029_v16 = vunpack.i.l.bf16 %v3028_v63 }
 0x50f   :  { %2816 = vmatpush3.bf16.msra.mxu1 %v1603_v49 }
 0x511   :  { %v3033_v1 = vpop.trf.xlu0 }
 0x512   :  { %v3037_v38 = vunpack.i.h.bf16 %v3033_v1  ;;  %v3034_v29 = vunpack.i.l.bf16 %v3033_v1 }
 0x514   :  { %v1612_v5 = vpack.c.bf16 %v3034_v29, %v3029_v16  ;;  %v1604_v47 = vpack.c.bf16 %v3037_v38, %v3032_v56 }
 0x515   :  { %v3038_v12 = vpop.trf.xlu0 }
 0x516   :  { %2817 = vmatprep.subr.bf16.mxu1 %v1612_v5  ;;  %v3042_v7 = vunpack.i.h.bf16 %v3038_v12  ;;  %v3039_v26 = vunpack.i.l.bf16 %v3038_v12 }
 0x517   :  { %2818 = vmatpush3.bf16.msra.mxu1 %v1604_v47 }
 0x519   :  { %v3043_v50 = vpop.trf.xlu0 }
 0x51a   :  { %v3047_v19 = vunpack.i.h.bf16 %v3043_v50  ;;  %v3044_v59 = vunpack.i.l.bf16 %v3043_v50 }
 0x51c   :  { %v1613_v60 = vpack.c.bf16 %v3044_v59, %v3039_v26  ;;  %v1605_v34 = vpack.c.bf16 %v3047_v19, %v3042_v7 }
 0x51e   :  { %2819 = vmatprep.subr.bf16.mxu1 %v1613_v60 }
 0x51f   :  { %2820 = vmatpush3.bf16.msra.mxu1 %v1605_v34 }
 0x522   :  { %1695 = vmatmul.mubr.bf16.vlgmr.msra.gmra.mrb[12].mxu1 %v3130_v55 }
 0x523   :  { %1702 = vmatprep.mubr.bf16.mxu1 %v3133_v57 }
 0x52a   :  { %1703 = vmatmul.mubr.bf16.gmra.mrb[16].mxu1 %v3135_v53 }
 0x52b   :  { %1710 = vmatprep.mubr.bf16.mxu1 %v3136_v58 }
 0x532   :  { %1711 = vmatmul.mubr.bf16.gmra.mrb[20].mxu1 %v3138_v43 }
 0x533   :  { %1718 = vmatprep.mubr.bf16.mxu1 %v3139_v51 }
 0x53a   :  { %1719 = vmatmul.mubr.bf16.gmra.mrb[24].mxu1 %v3141_v20 }
 0x5f5   :  { %v2821_v11 = vpop.f32.mrb[12].mxu1 }
 0x5f6   :  { %v2822_v31 = vpop.f32.mrb[13].mxu1 }
 0x5f7   :  { %v2823_v37 = vadd.f32 %v2822_v31, %v2821_v11  ;;  %v2824_v21 = vpop.f32.mrb[14].mxu1 }
 0x5f8   :  { %v2825_v45 = vpop.f32.mrb[15].mxu1 }
 0x5f9   :  { %v2826_v15 = vadd.f32 %v2825_v45, %v2824_v21  ;;  %v1727_v32 = vmul.f32 %v2823_v37, %v4320_v35 }
 0x5fb   :  { %1735 = vadd.xlane.f32.xlu1 %v1727_v32  ;;  %v1728_v24 = vmul.f32 %v2826_v15, %v4320_v35 }
 0x5fd   :  { %v2827_v33 = vpop.f32.mrb[16].mxu1 }
 0x5fe   :  { %v2828_v39 = vpop.f32.mrb[17].mxu1 }
 0x5ff   :  { %v2829_v22 = vadd.f32 %v2828_v39, %v2827_v33  ;;  %v2830_v17 = vpop.f32.mrb[18].mxu1  ;;  %1737 = vadd.xlane.f32.xlu1 %v1728_v24 }
 0x600   :  { %v2831_v9 = vpop.f32.mrb[19].mxu1 }
 0x601   :  { %v2832_v14 = vadd.f32 %v2831_v9, %v2830_v17  ;;  %v1729_v62 = vmul.f32 %v2829_v22, %v4320_v35  ;;  %v1815_v17 = vld [vmem:[%s4637_s11] sm:$0xff]  ;;  %v1816_v9 = vld [vmem:[%s4637_s11 + $0x8] sm:$0xff] }
 0x603   :  { %1739 = vadd.xlane.f32.xlu1 %v1729_v62  ;;  %v1730_v46 = vmul.f32 %v2832_v14, %v4320_v35  ;;  %v1818_v62 = vld [vmem:[%s4637_s11 + $0x18] sm:$0xff] }
 0x605   :  { %v2833_v18 = vpop.f32.mrb[20].mxu1 }
 0x606   :  { %v2834_v36 = vpop.f32.mrb[21].mxu1 }
 0x607   :  { %v2835_v41 = vadd.f32 %v2834_v36, %v2833_v18  ;;  %v2836_v10 = vpop.f32.mrb[22].mxu1  ;;  %1741 = vadd.xlane.f32.xlu1 %v1730_v46  ;;  %v1820_v18 = vld [vmem:[%s4637_s11 + $0x28] sm:$0xff] }
 0x608   :  { %v2837_v61 = vpop.f32.mrb[23].mxu1 }
 0x609   :  { %v2838_v28 = vadd.f32 %v2837_v61, %v2836_v10  ;;  %v1731_v52 = vmul.f32 %v2835_v41, %v4320_v35 }
 0x60b   :  { %1743 = vadd.xlane.f32.xlu1 %v1731_v52  ;;  %v1732_v13 = vmul.f32 %v2838_v28, %v4320_v35 }
 0x60d   :  { %v2839_v40 = vpop.f32.mrb[24].mxu1 }
 0x60e   :  { %v2840_v27 = vpop.f32.mrb[25].mxu1 }
 0x60f   :  { %v2841_v0 = vadd.f32 %v2840_v27, %v2839_v40  ;;  %v2842_v8 = vpop.f32.mrb[26].mxu1  ;;  %1745 = vadd.xlane.f32.xlu1 %v1732_v13 }
 0x610   :  { %v2843_v3 = vpop.f32.mrb[27].mxu1 }
 0x611   :  { %v2844_v2 = vadd.f32 %v2843_v3, %v2842_v8  ;;  %v1733_v25 = vmul.f32 %v2841_v0, %v4320_v35  ;;  %v1807_v8 = vld [vmem:[%s4636_s10] sm:$0xff] }
 0x613   :  { %1747 = vadd.xlane.f32.xlu1 %v1733_v25  ;;  %v1734_v48 = vmul.f32 %v2844_v2, %v4320_v35 }
 0x617   :  { %1749 = vadd.xlane.f32.xlu1 %v1734_v48 }
 0x688   :  { %v1736_v44 = vpop.xlane.xlu1 %1735 }
 0x689   :  { %v1751_v54 = vmul.f32 0.125, %v1736_v44 }
 0x68b   :  { %v4330_v42 = vsub.f32 %v2823_v37, %v1751_v54  ;;  %v1808_v54 = vld [vmem:[%s4636_s10 + $0x8] sm:$0xff] }
 0x68c   :  { %v1738_v6 = vpop.xlane.xlu1 %1737 }
 0x68d   :  { %v1752_v49 = vmul.f32 0.125, %v1738_v6  ;;  %v1767_v63 = vmul.f32 %v4320_v35, %v4330_v42 }
 0x68f   :  { %v4334_v56 = vsub.f32 %v2826_v15, %v1752_v49  ;;  %v1775_v16 = vmul.f32 %v1767_v63, %v4330_v42  ;;  %v1819_v63 = vld [vmem:[%s4637_s11 + $0x20] sm:$0xff] }
 0x690   :  { %v1740_v1 = vpop.xlane.xlu1 %1739 }
 0x691   :  { %v1753_v38 = vmul.f32 0.125, %v1740_v1  ;;  %1783 = vadd.xlane.f32.xlu1 %v1775_v16  ;;  %v1768_v29 = vmul.f32 %v4320_v35, %v4334_v56 }
 0x693   :  { %v4339_v5 = vsub.f32 %v2829_v22, %v1753_v38  ;;  %v1776_v47 = vmul.f32 %v1768_v29, %v4334_v56  ;;  %v1809_v29 = vld [vmem:[%s4636_s10 + $0x10] sm:$0xff] }
 0x694   :  { %v1742_v12 = vpop.xlane.xlu1 %1741 }
 0x695   :  { %v1754_v7 = vmul.f32 0.125, %v1742_v12  ;;  %1785 = vadd.xlane.f32.xlu1 %v1776_v47  ;;  %v1769_v26 = vmul.f32 %v4320_v35, %v4339_v5 }
 0x697   :  { %v4344_v50 = vsub.f32 %v2832_v14, %v1754_v7  ;;  %v1777_v19 = vmul.f32 %v1769_v26, %v4339_v5  ;;  %v1817_v14 = vld [vmem:[%s4637_s11 + $0x10] sm:$0xff] }
 0x698   :  { %v1744_v59 = vpop.xlane.xlu1 %1743 }
 0x699   :  { %v1755_v60 = vmul.f32 0.125, %v1744_v59  ;;  %1787 = vadd.xlane.f32.xlu1 %v1777_v19  ;;  %v1770_v34 = vmul.f32 %v4320_v35, %v4344_v50  ;;  %v1810_v59 = vld [vmem:[%s4636_s10 + $0x18] sm:$0xff] }
 0x69b   :  { %v4349_v55 = vsub.f32 %v2835_v41, %v1755_v60  ;;  %v1778_v57 = vmul.f32 %v1770_v34, %v4344_v50 }
 0x69c   :  { %v1746_v53 = vpop.xlane.xlu1 %1745 }
 0x69d   :  { %v1756_v58 = vmul.f32 0.125, %v1746_v53  ;;  %1789 = vadd.xlane.f32.xlu1 %v1778_v57  ;;  %v1771_v43 = vmul.f32 %v4320_v35, %v4349_v55 }
 0x69f   :  { %v4354_v51 = vsub.f32 %v2838_v28, %v1756_v58  ;;  %v1779_v20 = vmul.f32 %v1771_v43, %v4349_v55  ;;  %v1811_v43 = vld [vmem:[%s4636_s10 + $0x20] sm:$0xff] }
 0x6a0   :  { %v1748_v11 = vpop.xlane.xlu1 %1747 }
 0x6a1   :  { %v1757_v30 = vmul.f32 0.125, %v1748_v11  ;;  %1791 = vadd.xlane.f32.xlu1 %v1779_v20  ;;  %v1772_v31 = vmul.f32 %v4320_v35, %v4354_v51 }
 0x6a3   :  { %v4359_v37 = vsub.f32 %v2841_v0, %v1757_v30  ;;  %v1780_v21 = vmul.f32 %v1772_v31, %v4354_v51  ;;  %v1812_v31 = vld [vmem:[%s4636_s10 + $0x28] sm:$0xff] }
 0x6a4   :  { %v1750_v45 = vpop.xlane.xlu1 %1749 }
 0x6a5   :  { %v1758_v15 = vmul.f32 0.125, %v1750_v45  ;;  %1793 = vadd.xlane.f32.xlu1 %v1780_v21  ;;  %v1773_v32 = vmul.f32 %v4320_v35, %v4359_v37 }
 0x6a7   :  { %v4364_v33 = vsub.f32 %v2844_v2, %v1758_v15  ;;  %v1781_v24 = vmul.f32 %v1773_v32, %v4359_v37  ;;  %v1813_v15 = vld [vmem:[%s4636_s10 + $0x30] sm:$0xff] }
 0x6a9   :  { %1795 = vadd.xlane.f32.xlu1 %v1781_v24  ;;  %v1774_v39 = vmul.f32 %v4320_v35, %v4364_v33 }
 0x6ab   :  { %v1782_v22 = vmul.f32 %v1774_v39, %v4364_v33  ;;  %v1814_v39 = vld [vmem:[%s4636_s10 + $0x38] sm:$0xff] }
 0x6ad   :  { %1797 = vadd.xlane.f32.xlu1 %v1782_v22 }
 0x6be   :  { %1897 = vperm.xlu1 %3048, %v1815_v17   ;;  %v1821_v17 = vld [vmem:[%s4637_s11 + $0x30] sm:$0xff] }
 0x6c2   :  { %1902 = vperm.xlu1 %3048, %v1816_v9  }
 0x6c6   :  { %1907 = vperm.xlu1 %3048, %v1817_v14   ;;  %v1822_v14 = vld [vmem:[%s4637_s11 + $0x38] sm:$0xff] }
 0x6ca   :  { %1912 = vperm.xlu1 %3048, %v1818_v62   ;;  %v3142_v62 = vld [vmem:[%s4632_s6] sm:$0xff]  }
 0x6cb   :  { %2892 = vmatprep.mubr.msk.bf16.mxu1 %vm1991_vm3, %v3142_v62 }
 0x6ce   :  { %1922 = vperm.xlu1 %3048, %v1820_v18  }
 0x71e   :  { %v1784_v46 = vpop.xlane.xlu1 %1783 }
 0x71f   :  { %v1799_v36 = vmul.f32 0.125, %v1784_v46 }
 0x721   :  { %v1823_v41 = vadd.f32 1e-05, %v1799_v36 }
 0x722   :  { %v1786_v10 = vpop.xlane.xlu1 %1785 }
 0x723   :  { %3156 = vrsqrt.f32 %v1823_v41  ;;  %v1800_v61 = vmul.f32 0.125, %v1786_v10 }
 0x725   :  { %v1824_v28 = vadd.f32 1e-05, %v1800_v61 }
 0x726   :  { %v1788_v52 = vpop.xlane.xlu1 %1787 }
 0x727   :  { %3158 = vrsqrt.f32 %v1824_v28  ;;  %v1801_v40 = vmul.f32 0.125, %v1788_v52 }
 0x729   :  { %v1825_v13 = vadd.f32 1e-05, %v1801_v40 }
 0x72a   :  { %v1790_v27 = vpop.xlane.xlu1 %1789 }
 0x72b   :  { %3160 = vrsqrt.f32 %v1825_v13  ;;  %v1802_v0 = vmul.f32 0.125, %v1790_v27 }
 0x72d   :  { %v3157_v3 = vpop.eup %3156  ;;  %v1826_v2 = vadd.f32 1e-05, %v1802_v0 }
 0x72e   :  { %v1792_v25 = vpop.xlane.xlu1 %1791  ;;  %v1839_v48 = vmul.f32 %v3157_v3, %v1807_v8 }
 0x72f   :  { %3162 = vrsqrt.f32 %v1826_v2  ;;  %v1803_v44 = vmul.f32 0.125, %v1792_v25 }
 0x730   :  { %1849 = vperm.xlu0 %3049, %v1839_v48  }
 0x731   :  { %v3159_v6 = vpop.eup %3158  ;;  %v1827_v49 = vadd.f32 1e-05, %v1803_v44 }
 0x732   :  { %v1794_v16 = vpop.xlane.xlu1 %1793  ;;  %v1840_v1 = vmul.f32 %v3159_v6, %v1808_v54 }
 0x733   :  { %3164 = vrsqrt.f32 %v1827_v49  ;;  %v1804_v38 = vmul.f32 0.125, %v1794_v16 }
 0x734   :  { %1854 = vperm.xlu1 %3048, %v1840_v1   ;;  %1917 = vperm.xlu0 %3049, %v1819_v63  }
 0x735   :  { %v3161_v47 = vpop.eup %3160  ;;  %v1828_v12 = vadd.f32 1e-05, %v1804_v38 }
 0x736   :  { %v1796_v7 = vpop.xlane.xlu1 %1795  ;;  %v1841_v26 = vmul.f32 %v3161_v47, %v1809_v29 }
 0x737   :  { %3166 = vrsqrt.f32 %v1828_v12  ;;  %v1805_v19 = vmul.f32 0.125, %v1796_v7 }
 0x738   :  { %1859 = vperm.xlu1 %3048, %v1841_v26  }
 0x739   :  { %v3163_v60 = vpop.eup %3162  ;;  %v1829_v34 = vadd.f32 1e-05, %v1805_v19 }
 0x73a   :  { %v1798_v57 = vpop.xlane.xlu1 %1797  ;;  %v1842_v53 = vmul.f32 %v3163_v60, %v1810_v59 }
 0x73b   :  { %3168 = vrsqrt.f32 %v1829_v34  ;;  %v1806_v58 = vmul.f32 0.125, %v1798_v57 }
 0x73c   :  { %1864 = vperm.xlu1 %3048, %v1842_v53  }
 0x73d   :  { %v3165_v20 = vpop.eup %3164  ;;  %v1830_v11 = vadd.f32 1e-05, %v1806_v58 }
 0x73e   :  { %v1843_v30 = vmul.f32 %v3165_v20, %v1811_v43  ;;  %v1898_v18 = vpop.permute.xlu1 %1897 }
 0x73f   :  { %3170 = vrsqrt.f32 %v1830_v11 }
 0x740   :  { %1869 = vperm.xlu0 %3049, %v1843_v30  }
 0x741   :  { %v3167_v21 = vpop.eup %3166 }
 0x742   :  { %v1844_v45 = vmul.f32 %v3167_v21, %v1812_v31  ;;  %v1903_v46 = vpop.permute.xlu1 %1902 }
 0x744   :  { %1874 = vperm.xlu1 %3048, %v1844_v45  }
 0x745   :  { %v3169_v32 = vpop.eup %3168 }
 0x746   :  { %v1845_v24 = vmul.f32 %v3169_v32, %v1813_v15  ;;  %v1908_v36 = vpop.permute.xlu1 %1907 }
 0x748   :  { %1879 = vperm.xlu0 %3049, %v1845_v24   ;;  %v3144_v24 = vld [vmem:[%s4632_s6 + $0x10] sm:$0xff]  }
 0x749   :  { %v3171_v22 = vpop.eup %3170 }
 0x74a   :  { %v1846_v9 = vmul.f32 %v3171_v22, %v1814_v39  ;;  %v1913_v41 = vpop.permute.xlu1 %1912 }
 0x74c   :  { %1927 = vperm.xlu0 %3049, %v1821_v17   ;;  %1884 = vperm.xlu1 %3048, %v1846_v9  }
 0x74e   :  { %v1923_v10 = vpop.permute.xlu1 %1922 }
 0x750   :  { %1932 = vperm.xlu1 %3048, %v1822_v14  }
 0x7af   :  { %v1850_v61 = vpop.permute.xlu0 %1849 }
 0x7b0   :  { %v1887_v28 = vmul.f32 %v1850_v61, %v4330_v42 }
 0x7b2   :  { %v1935_v52 = vadd.f32 %v1898_v18, %v1887_v28 }
 0x7b3   :  { %v1855_v40 = vpop.permute.xlu1 %1854  ;;  %v1918_v25 = vpop.permute.xlu0 %1917 }
 0x7b4   :  { %v1888_v13 = vmul.f32 %v1855_v40, %v4334_v56  ;;  %v1943_v27 = vmul.f32 0.01, %v1935_v52 }
 0x7b6   :  { %v1936_v0 = vadd.f32 %v1903_v46, %v1888_v13  ;;  %v1951_v48 = vmax.f32 %v1935_v52, %v1943_v27 }
 0x7b7   :  { %v1860_v8 = vpop.permute.xlu1 %1859 }
 0x7b8   :  { %v1944_v3 = vmul.f32 0.01, %v1936_v0  ;;  %v1889_v2 = vmul.f32 %v1860_v8, %v4339_v5 }
 0x7ba   :  { %v1952_v44 = vmax.f32 %v1936_v0, %v1944_v3  ;;  %v1937_v54 = vadd.f32 %v1908_v36, %v1889_v2 }
 0x7bb   :  { %v1865_v6 = vpop.permute.xlu1 %1864 }
 0x7bc   :  { %v1890_v49 = vmul.f32 %v1865_v6, %v4344_v50  ;;  %v1959_v63 = vpack.c.bf16 %v1952_v44, %v1951_v48  ;;  %v1945_v16 = vmul.f32 0.01, %v1937_v54 }
 0x7be   :  { %v1938_v42 = vadd.f32 %v1913_v41, %v1890_v49  ;;  %2884 = vmatprep.subr.bf16.mxu1 %v1959_v63  ;;  %v1953_v29 = vmax.f32 %v1937_v54, %v1945_v16 }
 0x7bf   :  { %v1870_v1 = vpop.permute.xlu0 %1869  ;;  %2885 = vmatpush3.bf16.msra.mxu1 %v1959_v63 }
 0x7c0   :  { %v1946_v56 = vmul.f32 0.01, %v1938_v42  ;;  %v1891_v38 = vmul.f32 %v1870_v1, %v4349_v55 }
 0x7c2   :  { %v1954_v47 = vmax.f32 %v1938_v42, %v1946_v56  ;;  %v1939_v12 = vadd.f32 %v1918_v25, %v1891_v38 }
 0x7c3   :  { %v1875_v5 = vpop.permute.xlu1 %1874 }
 0x7c4   :  { %v1892_v7 = vmul.f32 %v1875_v5, %v4354_v51  ;;  %v1960_v26 = vpack.c.bf16 %v1954_v47, %v1953_v29  ;;  %v1947_v19 = vmul.f32 0.01, %v1939_v12 }
 0x7c6   :  { %v1940_v59 = vadd.f32 %v1923_v10, %v1892_v7  ;;  %2886 = vmatprep.subr.bf16.mxu1 %v1960_v26  ;;  %v1955_v34 = vmax.f32 %v1939_v12, %v1947_v19 }
 0x7c7   :  { %v1880_v50 = vpop.permute.xlu0 %1879  ;;  %2887 = vmatpush3.bf16.msra.mxu1 %v1960_v26 }
 0x7c8   :  { %v1948_v60 = vmul.f32 0.01, %v1940_v59  ;;  %v1893_v53 = vmul.f32 %v1880_v50, %v4359_v37  ;;  %v3143_v37 = vld [vmem:[%s4632_s6 + $0x8] sm:$0xff]  }
 0x7ca   :  { %v1956_v57 = vmax.f32 %v1940_v59, %v1948_v60 }
 0x7cb   :  { %v1928_v58 = vpop.permute.xlu0 %1927  ;;  %v1885_v43 = vpop.permute.xlu1 %1884 }
 0x7cc   :  { %v1941_v55 = vadd.f32 %v1928_v58, %v1893_v53  ;;  %v1961_v20 = vpack.c.bf16 %v1956_v57, %v1955_v34  ;;  %v1894_v11 = vmul.f32 %v1885_v43, %v4364_v33  ;;  %v3145_v33 = vld [vmem:[%s4632_s6 + $0x18] sm:$0xff]  }
 0x7ce   :  { %2888 = vmatprep.subr.bf16.mxu1 %v1961_v20  ;;  %v1949_v30 = vmul.f32 0.01, %v1941_v55 }
 0x7cf   :  { %2889 = vmatpush3.bf16.msra.mxu1 %v1961_v20  ;;  %v1933_v51 = vpop.permute.xlu1 %1932 }
 0x7d0   :  { %v1942_v31 = vadd.f32 %v1933_v51, %v1894_v11  ;;  %v1957_v45 = vmax.f32 %v1941_v55, %v1949_v30 }
 0x7d2   :  { %v1950_v21 = vmul.f32 0.01, %v1942_v31 }
 0x7d4   :  { %v1958_v15 = vmax.f32 %v1942_v31, %v1950_v21 }
 0x7d6   :  { %v1962_v32 = vpack.c.bf16 %v1958_v15, %v1957_v45  ;;  %v2772_v15 = vld [vmem:[%s4637_s11 + $0x40] sm:$0xff] }
 0x7d8   :  { %2890 = vmatprep.subr.bf16.mxu1 %v1962_v32 }
 0x7d9   :  { %2891 = vmatpush3.bf16.msra.mxu1 %v1962_v32  ;;  %v2773_v32 = vld [vmem:[%s4637_s11 + $0x48] sm:$0xff] }
 0x7da   :  { %2912 = vmatprep.subr.bf16.mxu1 %v4739_v4 }
 0x7dc   :  { %2893 = vmatmul.mubr.msk.bf16.vlgmr.msra.gmra.mrb[28].mxu1 %vm1991_vm3, %v3143_v37  ;;  %v2775_v37 = vld [vmem:[%s4637_s11 + $0x58] sm:$0xff] }
 0x7dd   :  { %2896 = vmatprep.mubr.msk.bf16.mxu1 %vm1991_vm3, %v3144_v24  ;;  %v2774_v24 = vld [vmem:[%s4637_s11 + $0x50] sm:$0xff] }
 0x7e4   :  { %2897 = vmatmul.mubr.msk.bf16.gmra.mrb[32].mxu1 %vm1991_vm3, %v3145_v33 }
 0x7e5   :  { %2914 = vmatprep.mubr.msk.bf16.mxu1 %vm3223_vm0, %v4739_v4 }
 0x8af   :  { %v2894_v39 = vpop.f32.mrb[28].mxu1 }
 0x8b0   :  { %v2038_v22 = vpop.f32.mrb[29].mxu1  ;;  %v2071_v18 = vmul.f32 %v2894_v39, %v4320_v35 }
 0x8b1   :  { %v2895_v17 = vpop.f32.mrb[30].mxu1  ;;  %v2069_v9 = vmul.f32 %v4320_v35, %v2038_v22 }
 0x8b2   :  { %v2041_v14 = vpop.f32.mrb[31].mxu1  ;;  %v2072_v41 = vmul.f32 %v2895_v17, %v4320_v35 }
 0x8b3   :  { %2077 = vadd.xlane.f32.xlu0 %v2069_v9  ;;  %v2070_v62 = vmul.f32 %v4320_v35, %v2041_v14 }
 0x8b5   :  { %2079 = vadd.xlane.f32.xlu1 %v2070_v62 }
 0x8b7   :  { %2081 = vadd.xlane.f32.xlu0 %v2071_v18  ;;  %v2898_v46 = vpop.f32.mrb[32].mxu1 }
 0x8b8   :  { %v2054_v36 = vpop.f32.mrb[33].mxu1  ;;  %v2075_v52 = vmul.f32 %v2898_v46, %v4320_v35 }
 0x8b9   :  { %v2073_v10 = vmul.f32 %v4320_v35, %v2054_v36  ;;  %v2899_v61 = vpop.f32.mrb[34].mxu1 }
 0x8ba   :  { %v2057_v28 = vpop.f32.mrb[35].mxu1  ;;  %v2076_v13 = vmul.f32 %v2899_v61, %v4320_v35 }
 0x8bb   :  { %2083 = vadd.xlane.f32.xlu0 %v2072_v41  ;;  %2085 = vadd.xlane.f32.xlu1 %v2073_v10  ;;  %v2074_v40 = vmul.f32 %v4320_v35, %v2057_v28 }
 0x8bf   :  { %2089 = vadd.xlane.f32.xlu1 %v2075_v52  ;;  %2087 = vadd.xlane.f32.xlu0 %v2074_v40 }
 0x8c3   :  { %2091 = vadd.xlane.f32.xlu0 %v2076_v13 }
 0x940   :  { %v2078_v27 = vpop.xlane.xlu0 %2077 }
 0x941   :  { %v2093_v0 = vmul.f32 0.125, %v2078_v27  ;;  %v2764_v27 = vld [vmem:[%s4636_s10 + $0x40] sm:$0xff] }
 0x942   :  { %v2080_v8 = vpop.xlane.xlu1 %2079 }
 0x943   :  { %v4453_v3 = vsub.f32 %v2038_v22, %v2093_v0  ;;  %v2094_v2 = vmul.f32 0.125, %v2080_v8 }
 0x944   :  { %v2082_v25 = vpop.xlane.xlu0 %2081 }
 0x945   :  { %v4455_v48 = vsub.f32 %v2041_v14, %v2094_v2  ;;  %v2095_v44 = vmul.f32 0.125, %v2082_v25  ;;  %v2109_v54 = vmul.f32 %v4320_v35, %v4453_v3 }
 0x947   :  { %v4459_v6 = vsub.f32 %v2894_v39, %v2095_v44  ;;  %v2117_v49 = vmul.f32 %v2109_v54, %v4453_v3  ;;  %v2110_v63 = vmul.f32 %v4320_v35, %v4455_v48 }
 0x948   :  { %v2084_v16 = vpop.xlane.xlu0 %2083  ;;  %v2086_v42 = vpop.xlane.xlu1 %2085 }
 0x949   :  { %v2096_v1 = vmul.f32 0.125, %v2084_v16  ;;  %v2097_v56 = vmul.f32 0.125, %v2086_v42  ;;  %2125 = vadd.xlane.f32.xlu1 %v2117_v49  ;;  %v2118_v38 = vmul.f32 %v2110_v63, %v4455_v48  ;;  %v2111_v29 = vmul.f32 %v4320_v35, %v4459_v6  ;;  %v2766_v63 = vld [vmem:[%s4636_s10 + $0x50] sm:$0xff] }
 0x94b   :  { %v4467_v47 = vsub.f32 %v2895_v17, %v2096_v1  ;;  %v4469_v12 = vsub.f32 %v2054_v36, %v2097_v56  ;;  %2127 = vadd.xlane.f32.xlu0 %v2118_v38  ;;  %v2119_v5 = vmul.f32 %v2111_v29, %v4459_v6  ;;  %v2765_v29 = vld [vmem:[%s4636_s10 + $0x48] sm:$0xff] }
 0x94c   :  { %v2090_v7 = vpop.xlane.xlu1 %2089  ;;  %v2088_v26 = vpop.xlane.xlu0 %2087 }
 0x94d   :  { %v2099_v19 = vmul.f32 0.125, %v2090_v7  ;;  %v2098_v59 = vmul.f32 0.125, %v2088_v26  ;;  %2129 = vadd.xlane.f32.xlu1 %v2119_v5  ;;  %v2113_v50 = vmul.f32 %v4320_v35, %v4469_v12  ;;  %v2112_v60 = vmul.f32 %v4320_v35, %v4467_v47  ;;  %v2767_v5 = vld [vmem:[%s4636_s10 + $0x58] sm:$0xff] }
 0x94f   :  { %v4476_v34 = vsub.f32 %v2898_v46, %v2099_v19  ;;  %v4478_v57 = vsub.f32 %v2057_v28, %v2098_v59  ;;  %v2121_v53 = vmul.f32 %v2113_v50, %v4469_v12  ;;  %v2120_v58 = vmul.f32 %v2112_v60, %v4467_v47  ;;  %v2776_v59 = vld [vmem:[%s4637_s11 + $0x60] sm:$0xff]  ;;  %v2777_v50 = vld [vmem:[%s4637_s11 + $0x68] sm:$0xff] }
 0x950   :  { %v2092_v43 = vpop.xlane.xlu0 %2091 }
 0x951   :  { %v2100_v55 = vmul.f32 0.125, %v2092_v43  ;;  %2133 = vadd.xlane.f32.xlu1 %v2121_v53  ;;  %2131 = vadd.xlane.f32.xlu0 %v2120_v58  ;;  %v2115_v20 = vmul.f32 %v4320_v35, %v4476_v34  ;;  %v2114_v11 = vmul.f32 %v4320_v35, %v4478_v57  ;;  %v2768_v53 = vld [vmem:[%s4636_s10 + $0x60] sm:$0xff]  ;;  %v2769_v43 = vld [vmem:[%s4636_s10 + $0x68] sm:$0xff] }
 0x953   :  { %v4486_v51 = vsub.f32 %v2899_v61, %v2100_v55  ;;  %v2123_v30 = vmul.f32 %v2115_v20, %v4476_v34  ;;  %v2122_v31 = vmul.f32 %v2114_v11, %v4478_v57 }
 0x955   :  { %2137 = vadd.xlane.f32.xlu1 %v2123_v30  ;;  %2135 = vadd.xlane.f32.xlu0 %v2122_v31  ;;  %v2116_v21 = vmul.f32 %v4320_v35, %v4486_v51  ;;  %v2770_v30 = vld [vmem:[%s4636_s10 + $0x70] sm:$0xff] }
 0x957   :  { %v2124_v45 = vmul.f32 %v2116_v21, %v4486_v51  ;;  %v2771_v21 = vld [vmem:[%s4636_s10 + $0x78] sm:$0xff] }
 0x959   :  { %2139 = vadd.xlane.f32.xlu0 %v2124_v45 }
 0x966   :  { %2241 = vperm.xlu1 %3048, %v2772_v15  }
 0x96a   :  { %2246 = vperm.xlu1 %3048, %v2773_v32   ;;  %v2778_v32 = vld [vmem:[%s4637_s11 + $0x70] sm:$0xff] }
 0x96e   :  { %2256 = vperm.xlu1 %3048, %v2775_v37   ;;  %v2779_v37 = vld [vmem:[%s4637_s11 + $0x78] sm:$0xff] }
 0x96f   :  { %2251 = vperm.xlu0 %3049, %v2774_v24  }
 0x9d6   :  { %v2126_v33 = vpop.xlane.xlu1 %2125 }
 0x9d7   :  { %v2141_v39 = vmul.f32 0.125, %v2126_v33 }
 0x9d8   :  { %v2128_v22 = vpop.xlane.xlu0 %2127 }
 0x9d9   :  { %v2167_v17 = vadd.f32 1e-05, %v2141_v39  ;;  %v2142_v9 = vmul.f32 0.125, %v2128_v22 }
 0x9da   :  { %v2130_v14 = vpop.xlane.xlu1 %2129 }
 0x9db   :  { %3172 = vrsqrt.f32 %v2167_v17  ;;  %v2143_v62 = vmul.f32 0.125, %v2130_v14  ;;  %v2168_v18 = vadd.f32 1e-05, %v2142_v9 }
 0x9dd   :  { %v2169_v46 = vadd.f32 1e-05, %v2143_v62 }
 0x9de   :  { %v2134_v36 = vpop.xlane.xlu1 %2133  ;;  %v2132_v41 = vpop.xlane.xlu0 %2131 }
 0x9df   :  { %3174 = vrsqrt.f32 %v2169_v46  ;;  %v2144_v10 = vmul.f32 0.125, %v2132_v41  ;;  %v2145_v61 = vmul.f32 0.125, %v2134_v36 }
 0x9e0   :  { %3176 = vrsqrt.f32 %v2168_v18 }
 0x9e1   :  { %v2170_v28 = vadd.f32 1e-05, %v2144_v10  ;;  %v2171_v8 = vadd.f32 1e-05, %v2145_v61 }
 0x9e2   :  { %v2138_v52 = vpop.xlane.xlu1 %2137  ;;  %v2136_v40 = vpop.xlane.xlu0 %2135 }
 0x9e3   :  { %v2146_v13 = vmul.f32 0.125, %v2136_v40  ;;  %3178 = vrsqrt.f32 %v2170_v28  ;;  %v2147_v2 = vmul.f32 0.125, %v2138_v52 }
 0x9e4   :  { %3180 = vrsqrt.f32 %v2171_v8 }
 0x9e5   :  { %v3173_v0 = vpop.eup %3172  ;;  %v2172_v25 = vadd.f32 1e-05, %v2146_v13  ;;  %v2173_v42 = vadd.f32 1e-05, %v2147_v2 }
 0x9e6   :  { %v2140_v44 = vpop.xlane.xlu0 %2139  ;;  %v2183_v54 = vmul.f32 %v3173_v0, %v2764_v27  ;;  %v2242_v24 = vpop.permute.xlu1 %2241 }
 0x9e7   :  { %v2148_v49 = vmul.f32 0.125, %v2140_v44  ;;  %3182 = vrsqrt.f32 %v2172_v25 }
 0x9e8   :  { %2193 = vperm.xlu1 %3048, %v2183_v54   ;;  %3184 = vrsqrt.f32 %v2173_v42 }
 0x9e9   :  { %v3175_v16 = vpop.eup %3174  ;;  %v2174_v1 = vadd.f32 1e-05, %v2148_v49 }
 0x9ea   :  { %v2185_v56 = vmul.f32 %v3175_v16, %v2766_v63  ;;  %v3177_v38 = vpop.eup %3176  ;;  %v2247_v33 = vpop.permute.xlu1 %2246 }
 0x9eb   :  { %3186 = vrsqrt.f32 %v2174_v1  ;;  %v2184_v26 = vmul.f32 %v3177_v38, %v2765_v29 }
 0x9ec   :  { %2203 = vperm.xlu0 %3049, %v2185_v56  }
 0x9ed   :  { %v3179_v7 = vpop.eup %3178 }
 0x9ee   :  { %v2186_v19 = vmul.f32 %v3179_v7, %v2767_v5  ;;  %v3181_v60 = vpop.eup %3180  ;;  %v2257_v39 = vpop.permute.xlu1 %2256 }
 0x9ef   :  { %v2187_v55 = vmul.f32 %v3181_v60, %v2768_v53  ;;  %v2252_v22 = vpop.permute.xlu0 %2251 }
 0x9f0   :  { %2198 = vperm.xlu0 %3049, %v2184_v26   ;;  %2208 = vperm.xlu1 %3048, %v2186_v19  }
 0x9f1   :  { %v3183_v58 = vpop.eup %3182 }
 0x9f2   :  { %v3185_v20 = vpop.eup %3184  ;;  %v2188_v11 = vmul.f32 %v3183_v58, %v2769_v43 }
 0x9f3   :  { %v2189_v45 = vmul.f32 %v3185_v20, %v2770_v30 }
 0x9f4   :  { %2261 = vperm.xlu0 %3049, %v2776_v59   ;;  %2266 = vperm.xlu1 %3048, %v2777_v50  }
 0x9f5   :  { %v3187_v31 = vpop.eup %3186 }
 0x9f6   :  { %v2190_v15 = vmul.f32 %v3187_v31, %v2771_v21 }
 0x9f8   :  { %2213 = vperm.xlu0 %3049, %v2187_v55   ;;  %2218 = vperm.xlu1 %3048, %v2188_v11  }
 0x9fc   :  { %2223 = vperm.xlu0 %3049, %v2189_v45   ;;  %2228 = vperm.xlu1 %3048, %v2190_v15  }
 0xa00   :  { %2271 = vperm.xlu0 %3049, %v2778_v32   ;;  %2276 = vperm.xlu1 %3048, %v2779_v37  }
 0xa67   :  { %v2194_v17 = vpop.permute.xlu1 %2193 }
 0xa68   :  { %v2231_v9 = vmul.f32 %v2194_v17, %v4453_v3 }
 0xa6a   :  { %v2279_v62 = vadd.f32 %v2242_v24, %v2231_v9 }
 0xa6b   :  { %v2204_v14 = vpop.permute.xlu0 %2203 }
 0xa6c   :  { %v2233_v18 = vmul.f32 %v2204_v14, %v4459_v6  ;;  %v2287_v61 = vmul.f32 0.01, %v2279_v62 }
 0xa6e   :  { %v2281_v28 = vadd.f32 %v2252_v22, %v2233_v18  ;;  %v2295_v2 = vmax.f32 %v2279_v62, %v2287_v61 }
 0xa6f   :  { %v2199_v46 = vpop.permute.xlu0 %2198  ;;  %v2209_v36 = vpop.permute.xlu1 %2208 }
 0xa70   :  { %v2232_v41 = vmul.f32 %v2199_v46, %v4455_v48  ;;  %v2234_v10 = vmul.f32 %v2209_v36, %v4467_v47  ;;  %v2289_v3 = vmul.f32 0.01, %v2281_v28 }
 0xa72   :  { %v2280_v52 = vadd.f32 %v2247_v33, %v2232_v41  ;;  %v2282_v40 = vadd.f32 %v2257_v39, %v2234_v10  ;;  %v2297_v47 = vmax.f32 %v2281_v28, %v2289_v3  ;;  %v2782_v28 = vld [vmem:[%s4636_s10 + $0x80] sm:$0xff] }
 0xa73   :  { %v2262_v13 = vpop.permute.xlu0 %2261  ;;  %v2267_v0 = vpop.permute.xlu1 %2266 }
 0xa74   :  { %v2288_v27 = vmul.f32 0.01, %v2280_v52  ;;  %v2290_v8 = vmul.f32 0.01, %v2282_v40 }
 0xa76   :  { %v2296_v25 = vmax.f32 %v2280_v52, %v2288_v27  ;;  %v2298_v54 = vmax.f32 %v2282_v40, %v2290_v8 }
 0xa77   :  { %v2214_v44 = vpop.permute.xlu0 %2213  ;;  %v2219_v49 = vpop.permute.xlu1 %2218 }
 0xa78   :  { %v2303_v6 = vpack.c.bf16 %v2296_v25, %v2295_v2  ;;  %v2235_v63 = vmul.f32 %v2214_v44, %v4469_v12  ;;  %v2236_v48 = vmul.f32 %v2219_v49, %v4478_v57  ;;  %v2304_v56 = vpack.c.bf16 %v2298_v54, %v2297_v47  ;;  %v2785_v2 = vld [vmem:[%s4637_s11 + $0x88] sm:$0xff] }
 0xa7a   :  { %v2283_v16 = vadd.f32 %v2262_v13, %v2235_v63  ;;  %2901 = vmatpush3.bf16.msra.mxu0 %v2303_v6  ;;  %v2284_v42 = vadd.f32 %v2267_v0, %v2236_v48  ;;  %v2783_v13 = vld [vmem:[%s4636_s10 + $0x88] sm:$0xff]  ;;  %v2784_v0 = vld [vmem:[%s4637_s11 + $0x80] sm:$0xff] }
 0xa7b   :  { %v2224_v1 = vpop.permute.xlu0 %2223  ;;  %2902 = vmatprep.subr.bf16.mxu0 %v4739_v4  ;;  %v2229_v29 = vpop.permute.xlu1 %2228 }
 0xa7c   :  { %v2291_v38 = vmul.f32 0.01, %v2283_v16  ;;  %v2292_v5 = vmul.f32 0.01, %v2284_v42  ;;  %v2237_v26 = vmul.f32 %v2224_v1, %v4476_v34  ;;  %v2238_v12 = vmul.f32 %v2229_v29, %v4486_v51  ;;  %v3146_v34 = vld [vmem:[%s4633_s7] sm:$0xff]  }
 0xa7e   :  { %v2299_v7 = vmax.f32 %v2283_v16, %v2291_v38  ;;  %2903 = vmatpush3.bf16.msra.mxu0 %v2304_v56  ;;  %v2300_v19 = vmax.f32 %v2284_v42, %v2292_v5  ;;  %v3147_v38 = vld [vmem:[%s4634_s8] sm:$0xff]  }
 0xa7f   :  { %v2272_v59 = vpop.permute.xlu0 %2271  ;;  %2904 = vmatprep.subr.bf16.mxu0 %v4739_v4  ;;  %v2277_v57 = vpop.permute.xlu1 %2276 }
 0xa80   :  { %v2285_v50 = vadd.f32 %v2272_v59, %v2237_v26  ;;  %v2305_v60 = vpack.c.bf16 %v2300_v19, %v2299_v7  ;;  %v2286_v53 = vadd.f32 %v2277_v57, %v2238_v12 }
 0xa82   :  { %v2293_v58 = vmul.f32 0.01, %v2285_v50  ;;  %v2294_v43 = vmul.f32 0.01, %v2286_v53  ;;  %2905 = vmatpush3.bf16.msra.mxu0 %v2305_v60 }
 0xa83   :  { %2906 = vmatprep.subr.bf16.mxu0 %v4739_v4 }
 0xa84   :  { %v2301_v55 = vmax.f32 %v2285_v50, %v2293_v58  ;;  %v2302_v20 = vmax.f32 %v2286_v53, %v2294_v43 }
 0xa86   :  { %v2306_v11 = vpack.c.bf16 %v2302_v20, %v2301_v55 }
 0xa88   :  { %2907 = vmatpush3.bf16.msra.mxu0 %v2306_v11 }
 0xa89   :  { %2918 = vmatprep.subr.bf16.mxu0 %v4739_v4 }
 0xa8b   :  { %2909 = vmatmul.mubr.msk.bf16.vlgmr.msra.gmra.mrb[68].mxu0 %vm1991_vm3, %v3146_v34 }
 0xa8c   :  { %2920 = vmatprep.mubr.msk.bf16.mxu0 %vm3223_vm0, %v4739_v4 }
 0xb5e   :  { %v2351_v51 = vpop.f32.mrb[68].mxu0 }
 0xb5f   :  { %v2910_v30 = vpop.f32.mrb[69].mxu0  ;;  %v2358_v31 = vmul.f32 %v4320_v35, %v2351_v51 }
 0xb60   :  { %v2354_v21 = vpop.f32.mrb[70].mxu0 }
 0xb61   :  { %2360 = vadd.xlane.f32.xlu0 %v2358_v31  ;;  %v2911_v45 = vpop.f32.mrb[71].mxu0  ;;  %v2359_v15 = vmul.f32 %v4320_v35, %v2354_v21 }
 0xb62   :  { %v2788_v45 = vld [vmem:[%s4636_s10 + $0xc0] sm:$0xff] }
 0xb63   :  { %2362 = vadd.xlane.f32.xlu1 %v2359_v15 }
 0xbee   :  { %v2361_v32 = vpop.xlane.xlu0 %2360 }
 0xbef   :  { %v2364_v37 = vmul.f32 0.125, %v2361_v32 }
 0xbf0   :  { %v2363_v24 = vpop.xlane.xlu1 %2362 }
 0xbf1   :  { %v2366_v33 = vsub.f32 %v2351_v51, %v2364_v37  ;;  %v2365_v39 = vmul.f32 0.125, %v2363_v24  ;;  %v2789_v37 = vld [vmem:[%s4636_s10 + $0xc8] sm:$0xff] }
 0xbf3   :  { %v2367_v22 = vsub.f32 %v2354_v21, %v2365_v39  ;;  %v2368_v17 = vmul.f32 %v4320_v35, %v2366_v33 }
 0xbf5   :  { %v2370_v9 = vmul.f32 %v2368_v17, %v2366_v33  ;;  %v2369_v14 = vmul.f32 %v4320_v35, %v2367_v22 }
 0xbf7   :  { %2372 = vadd.xlane.f32.xlu0 %v2370_v9  ;;  %v2371_v62 = vmul.f32 %v2369_v14, %v2367_v22 }
 0xbfb   :  { %2374 = vadd.xlane.f32.xlu0 %v2371_v62 }
 0xc84   :  { %v2373_v18 = vpop.xlane.xlu0 %2372 }
 0xc85   :  { %v2376_v46 = vmul.f32 0.125, %v2373_v18 }
 0xc87   :  { %v2384_v36 = vadd.f32 1e-05, %v2376_v46 }
 0xc88   :  { %v2375_v41 = vpop.xlane.xlu0 %2374 }
 0xc89   :  { %3188 = vrsqrt.f32 %v2384_v36  ;;  %v2377_v10 = vmul.f32 0.125, %v2375_v41 }
 0xc8b   :  { %v2385_v61 = vadd.f32 1e-05, %v2377_v10 }
 0xc8d   :  { %3190 = vrsqrt.f32 %v2385_v61 }
 0xc93   :  { %v3189_v52 = vpop.eup %3188 }
 0xc94   :  { %v2388_v40 = vmul.f32 %v3189_v52, %v2782_v28 }
 0xc96   :  { %2392 = vperm.xlu1 %3048, %v2388_v40  }
 0xc97   :  { %v3191_v27 = vpop.eup %3190 }
 0xc98   :  { %v2389_v8 = vmul.f32 %v3191_v27, %v2783_v13  ;;  %v2532_v13 = vld [vmem:[%s4635_s9] sm:$0x3] }
 0xc9a   :  { %2404 = vperm.xlu1 %3048, %v2784_v0   ;;  %2397 = vperm.xlu0 %3049, %v2389_v8  }
 0xc9e   :  { %2409 = vperm.xlu1 %3048, %v2785_v2  }
 0xd15   :  { %v2393_v3 = vpop.permute.xlu1 %2392 }
 0xd16   :  { %v2400_v25 = vmul.f32 %v2393_v3, %v2366_v33  ;;  %v2790_v33 = vld [vmem:[%s4637_s11 + $0xc0] sm:$0xff] }
 0xd19   :  { %v2398_v44 = vpop.permute.xlu0 %2397  ;;  %v2405_v54 = vpop.permute.xlu1 %2404 }
 0xd1a   :  { %v2412_v6 = vadd.f32 %v2405_v54, %v2400_v25  ;;  %v2401_v49 = vmul.f32 %v2398_v44, %v2367_v22  ;;  %v2791_v22 = vld [vmem:[%s4637_s11 + $0xc8] sm:$0xff] }
 0xd1c   :  { %v2414_v48 = vmul.f32 0.01, %v2412_v6 }
 0xd1d   :  { %v2410_v63 = vpop.permute.xlu1 %2409 }
 0xd1e   :  { %v2413_v47 = vadd.f32 %v2410_v63, %v2401_v49  ;;  %v2416_v42 = vmax.f32 %v2412_v6, %v2414_v48 }
 0xd20   :  { %v2415_v16 = vmul.f32 0.01, %v2413_v47 }
 0xd22   :  { %v2417_v1 = vmax.f32 %v2413_v47, %v2415_v16  ;;  %v2794_v47 = vld [vmem:[%s4637_s11 + $0x100] sm:$0xff] }
 0xd24   :  { %v2418_v56 = vpack.c.bf16 %v2417_v1, %v2416_v42 }
 0xd26   :  { %2913 = vmatpush3.bf16.msra.mxu1 %v2418_v56  ;;  %v2793_v56 = vld [vmem:[%s4636_s10 + $0x100] sm:$0xff]  ;;  %s3227_s10 = smov [#allocation3]  }
 0xd27   :  { %2924 = vmatprep.subr.bf16.mxu1 %v4739_v4  ;;  %s2677_s18 = sshll.u32 %s3227_s10, 4  ;;  %s2678_s18 = int_to_ptr.vmem [resolvable:$true] %s2677_s18 }
 0xd28   :  { %s3198_s13 = scalar_lea.vmem %s2678_s18, 16  ;;  %s3202_s7 = scalar_lea.vmem %s2678_s18, 32 }
 0xd29   :  { %2915 = vmatmul.mubr.msk.bf16.vlgmr.msra.gmra.mrb[36].mxu1 %vm2426_vm4, %v3147_v38  ;;  %p3199_p0 = scmp.ne.s32.totalorder %s2678_s18, %s3198_s13  ;;  %p3203_p1 = scmp.lt.s32.totalorder %s2678_s18, %s2678_s18 }
 0xd2a   :  { %2926 = vmatprep.mubr.msk.bf16.mxu1 %vm3223_vm0, %v4739_v4  ;;  %p3204_p2 = scmp.lt.s32.totalorder %s3202_s7, %s3198_s13 }
 0xd2c   :  { %p3205_p3 = por %p3204_p2, %p3203_p1 }
 0xd2e   :  { %p3206_p4 = pnand %p3205_p3, %p3199_p0 }
 0xdfc   :  { %v2464_v29 = vpop.f32.mrb[36].mxu1 }
 0xdfd   :  { %v2916_v5 = vpop.f32.mrb[37].mxu1  ;;  %v2471_v7 = vmul.f32 %v4320_v35, %v2464_v29 }
 0xdfe   :  { %v2467_v26 = vpop.f32.mrb[38].mxu1 }
 0xdff   :  { %2473 = vadd.xlane.f32.xlu0 %v2471_v7  ;;  %v2472_v19 = vmul.f32 %v4320_v35, %v2467_v26  ;;  %v2917_v12 = vpop.f32.mrb[39].mxu1 }
 0xe01   :  { %2475 = vadd.xlane.f32.xlu1 %v2472_v19 }
 0xe8c   :  { %v2474_v59 = vpop.xlane.xlu0 %2473 }
 0xe8d   :  { %v2477_v57 = vmul.f32 0.125, %v2474_v59 }
 0xe8e   :  { %v2476_v50 = vpop.xlane.xlu1 %2475 }
 0xe8f   :  { %v2479_v60 = vsub.f32 %v2464_v29, %v2477_v57  ;;  %v2478_v53 = vmul.f32 0.125, %v2476_v50 }
 0xe91   :  { %v2480_v58 = vsub.f32 %v2467_v26, %v2478_v53  ;;  %v2481_v43 = vmul.f32 %v4320_v35, %v2479_v60 }
 0xe93   :  { %v2483_v55 = vmul.f32 %v2481_v43, %v2479_v60  ;;  %v2482_v4 = vmul.f32 %v4320_v35, %v2480_v58 }
 0xe95   :  { %2485 = vadd.xlane.f32.xlu0 %v2483_v55  ;;  %v2484_v20 = vmul.f32 %v2482_v4, %v2480_v58 }
 0xe99   :  { %2487 = vadd.xlane.f32.xlu0 %v2484_v20 }
 0xf22   :  { %v2486_v11 = vpop.xlane.xlu0 %2485 }
 0xf23   :  { %v2489_v34 = vmul.f32 0.125, %v2486_v11 }
 0xf25   :  { %v2497_v51 = vadd.f32 1e-05, %v2489_v34 }
 0xf26   :  { %v2488_v30 = vpop.xlane.xlu0 %2487 }
 0xf27   :  { %3192 = vrsqrt.f32 %v2497_v51  ;;  %v2490_v31 = vmul.f32 0.125, %v2488_v30 }
 0xf29   :  { %v2498_v21 = vadd.f32 1e-05, %v2490_v31 }
 0xf2b   :  { %3194 = vrsqrt.f32 %v2498_v21 }
 0xf31   :  { %v3193_v15 = vpop.eup %3192 }
 0xf32   :  { %v2501_v32 = vmul.f32 %v3193_v15, %v2788_v45 }
 0xf34   :  { %2505 = vperm.xlu1 %3048, %v2501_v32  }
 0xf35   :  { %v3195_v24 = vpop.eup %3194 }
 0xf36   :  { %v2502_v39 = vmul.f32 %v3195_v24, %v2789_v37 }
 0xf38   :  { %2517 = vperm.xlu1 %3048, %v2790_v33   ;;  %2510 = vperm.xlu0 %3049, %v2502_v39  }
 0xf3c   :  { %2522 = vperm.xlu1 %3048, %v2791_v22  }
 0xfb3   :  { %v2506_v17 = vpop.permute.xlu1 %2505 }
 0xfb4   :  { %v2513_v9 = vmul.f32 %v2506_v17, %v2479_v60  ;;  %v2611_v60 = vld [vmem:[%s4638_s12] sm:$0x1] }
 0xfb7   :  { %v2511_v14 = vpop.permute.xlu0 %2510  ;;  %v2518_v62 = vpop.permute.xlu1 %2517 }
 0xfb8   :  { %v2525_v18 = vadd.f32 %v2518_v62, %v2513_v9  ;;  %v2514_v46 = vmul.f32 %v2511_v14, %v2480_v58 }
 0xfba   :  { %v2527_v41 = vmul.f32 0.01, %v2525_v18 }
 0xfbb   :  { %v2523_v36 = vpop.permute.xlu1 %2522 }
 0xfbc   :  { %v2526_v10 = vadd.f32 %v2523_v36, %v2514_v46  ;;  %v2529_v28 = vmax.f32 %v2525_v18, %v2527_v41 }
 0xfbe   :  { %v2528_v61 = vmul.f32 0.01, %v2526_v10 }
 0xfc0   :  { %v2530_v52 = vmax.f32 %v2526_v10, %v2528_v61 }
 0xfc2   :  { %v2531_v40 = vpack.c.bf16 %v2530_v52, %v2529_v28 }
 0xfc4   :  { %2919 = vmatpush3.bf16.msra.mxu0 %v2531_v40 }
 0xfc7   :  { %2921 = vmatmul.mubr.msk.bf16.vlgmr.msra.gmra.mrb[72].mxu0 %vm2426_vm4, %v2532_v13 }
0x109a   :  { %v2570_v27 = vpop.f32.mrb[72].mxu0 }
0x109b   :  { %v2576_v0 = vmul.f32 %v4320_v35, %v2570_v27  ;;  %v2922_v8 = vpop.f32.mrb[73].mxu0 }
0x109c   :  { %v2573_v2 = vpop.f32.mrb[74].mxu0 }
0x109d   :  { %v2578_v3 = vsel %vm2577_vm5, %v2576_v0, 0.0  ;;  %v2923_v25 = vpop.f32.mrb[75].mxu0 }
0x109e   :  { %2579 = vadd.xlane.f32.xlu0 %v2578_v3 }
0x112b   :  { %v2580_v44 = vpop.xlane.xlu0 %2579 }
0x112c   :  { %v2581_v54 = vmul.f32 0.125, %v2580_v44 }
0x112e   :  { %v2582_v6 = vsub.f32 %v2570_v27, %v2581_v54 }
0x1130   :  { %v2583_v49 = vmul.f32 %v4320_v35, %v2582_v6  ;;  %v2612_v35 = vld [vmem:[#allocation2] sm:$0x1] }
0x1132   :  { %v2584_v63 = vmul.f32 %v2583_v49, %v2582_v6 }
0x1134   :  { %v2585_v48 = vsel %vm2577_vm5, %v2584_v63, 0.0 }
0x1135   :  { %2586 = vadd.xlane.f32.xlu1 %v2585_v48 }
0x1146   :  { %2604 = vperm.xlu1 %3048, %v2794_v47  }
0x11c2   :  { %v2587_v16 = vpop.xlane.xlu1 %2586 }
0x11c3   :  { %v2588_v42 = vmul.f32 0.125, %v2587_v16 }
0x11c5   :  { %v2593_v1 = vadd.f32 1e-05, %v2588_v42 }
0x11c6   :  { %v2605_v26 = vpop.permute.xlu1 %2604 }
0x11c7   :  { %3196 = vrsqrt.f32 %v2593_v1 }
0x11d1   :  { %v3197_v38 = vpop.eup %3196 }
0x11d2   :  { %v2595_v29 = vmul.f32 %v3197_v38, %v2793_v56 }
0x11d4   :  { %2598 = vperm.xlu0 %3049, %v2595_v29  }
0x11d8   :  { %2615 = vperm.xlu0 %3049, %v2612_v35  }
0x1253   :  { %v2599_v5 = vpop.permute.xlu0 %2598 }
0x1254   :  { %v2601_v7 = vmul.f32 %v2599_v5, %v2582_v6 }
0x1256   :  { %v2607_v19 = vadd.f32 %v2605_v26, %v2601_v7 }
0x1257   :  { %v2616_v53 = vpop.permute.xlu0 %2615 }
0x1258   :  { %v2608_v12 = vmul.f32 0.01, %v2607_v19  ;;  %v2621_v58 = vrot.slane %v2616_v53, %v4740_v23 }
0x125a   :  { %v2609_v59 = vmax.f32 %v2607_v19, %v2608_v12 }
0x125c   :  { %v2610_v57 = vpack.c.bf16 %v2609_v59, %v2609_v59 }
0x125e   :  { %v2628_v50 = vsel %vm2626_vm6, %v2610_v57, 0 }
0x125f   :  { %2925 = vmatpush3.bf16.msra.mxu1 %v2628_v50 }
0x1262   :  { %2927 = vmatmul.mubr.msk.bf16.vlgmr.msra.gmra.mrb[40].mxu1 %vm2622_vm7, %v2611_v60 }
0x1335   :  { %v2664_v43 = vpop.f32.mrb[40].mxu1 }
0x1336   :  { %v2665_v55 = vadd.f32 %v2664_v43, %v2621_v58  ;;  %v2928_v4 = vpop.f32.mrb[41].mxu1 }
0x1337   :  { %v2667_v20 = vpop.f32.mrb[42].mxu1 }
0x1338   :  { %2670 = vst [vmem:[#allocation3] sm:$0x1] %v2665_v55  ;;  %v2929_v11 = vpop.f32.mrb[43].mxu1 }
0x1339   :  { %3209 = shalt.err (!%p3206_p4)
}
0x133a   :  { %s3210_s20 = scalar_lea.hbm %s4640_s14, 16 }
0x133b   :  { %p3211_p5 = scmp.ne.s32.totalorder %s4640_s14, %s3210_s20  ;;  %p3214_p6 = scmp.lt.u32.totalorder %s3210_s20, %s4640_s14 }
0x133d   :  { %p3216_p7 = pnand %p3214_p6, %p3211_p5 }
0x133f   :  { %3219 = shalt.err (!%p3216_p7)
}
0x1340   :  { %2680 = dma.vmem_to_hbm [thread:$0]  %s2678_s18, 16, %s4640_s14, [#allocation4]  }
0x1341   :  { %3220 = dma.done.wait [#allocation4], 16  }
0x1342   :  { %3221 = vsyncadd [#allocation4], 4294967280 }
0x1343   :  { %2684 = vsyncpa [#allocation4], 1 }

</bundles_post_ra>
